<compile_context>
chip_gen: v5e
topology: v5e:2x2
jax: 0.10.0
libtpu: 0.0.40
codegen_flags: <defaults>
</compile_context>

<pallas_src>
import functools

import numpy as np
import jax
import jax.numpy as jnp
from jax.experimental import pallas as pl
from jax.experimental.pallas import tpu as pltpu

BN_EPS = 1e-5
MARGIN = 2           # max padding among the three convs (the 5x5 uses pad=2)
RES_SCALE = 0.05     # residual: x + 0.05 * seq(x)
LANE = 128


def _round_up(x, m):
    return (x + m - 1) // m * m


def _gelu_tanh(x):
    """tanh-form GELU (torch GELU approximate='tanh'); tanh lowers to the EUP.
    Max abs deviation from the exact erf GELU is ~1e-3, far inside tolerance
    once scaled by the 0.05 residual factor."""
    c = 0.7978845608028654  # sqrt(2/pi)
    return 0.5 * x * (1.0 + jnp.tanh(c * (x + 0.044715 * x * x * x)))


# ----------------------------------------------------------------------------
# Fused ConvResBlock kernel (`bblk` batch elements per grid step)
# ----------------------------------------------------------------------------
def _convresblock_kernel(x_ref, w1_ref, s1_ref, w2_ref, s2_ref, w3_ref, s3_ref,
                         o_ref, tap_ref, buf1, buf2, *,
                         bblk, Wp, W, LB, N, N_pad, S_buf):
    """Layout: each activation plane is (channels, S_buf) with the H x W image
    window (flattened with a Wp-wide wrap) living at lanes [LB, LB+N_pad) and
    zeros in the margins.  For output window column j', tap (dy,dx) of a conv
    with padding p reads lane  LB + j' + (dy-p)*Wp + (dx-p)  of the source
    plane, i.e. one contiguous slice per tap.  All K*K slices (x bblk images)
    are stacked into `tap_ref` and each conv is a single deep GEMM."""
    C = x_ref.shape[1]          # in/out channels (residual requires equal)
    C1 = s1_ref.shape[0]        # hidden channels (= 5 * C)
    width = bblk * N_pad

    # Window-validity mask: column j' is a real image pixel iff
    # (j' % Wp) < W  and  j' < N  (the rest are row-wrap / lane-pad columns).
    col = jax.lax.broadcasted_iota(jnp.int32, (1, N_pad), 1)
    valid = jnp.logical_and(col % Wp < W, col < N)

    def conv(src_ref, cin, ksize, pad, w_ref, s_ref):
        kk = ksize * ksize
        # Stack the kk shifted slices of every image into tap_ref rows
        # [0, cin*kk); lane blocks of N_pad per image (aligned stores).
        for t in range(kk):
            off = (t // ksize - pad) * Wp + (t % ksize - pad)
            for bi in range(bblk):
                start = bi * S_buf + LB + off
                tap_ref[t * cin:(t + 1) * cin,
                        bi * N_pad:(bi + 1) * N_pad] = (
                    src_ref[:, start:start + N_pad])
        # One GEMM: (Cout, cin*kk) bf16 @ (cin*kk, width) bf16 -> f32.
        pre = jnp.dot(w_ref[...], tap_ref[:cin * kk, :],
                      preferred_element_type=jnp.float32)
        return _gelu_tanh(pre + s_ref[...])          # (Cout, width) f32

    # Stage 0: bf16 copy of the zero-padded input planes into buf2.  This also
    # gives buf2 zero margins for free (the wrapper padded them with zeros).
    for bi in range(bblk):
        buf2[:, bi * S_buf:(bi + 1) * S_buf] = x_ref[bi].astype(buf2.dtype)

    # Stage 1: conv1 3x3 pad 1 (+ folded BN shift + GELU) -> buf1 window.
    # Only the two small margin strips of buf1 need zeroing each step.
    a1 = conv(buf2, C, 3, 1, w1_ref, s1_ref)          # (C1, width)
    for bi in range(bblk):
        base = bi * S_buf
        buf1[:, base:base + LB] = jnp.zeros((C1, LB), buf1.dtype)
        buf1[:, base + LB + N_pad:base + S_buf] = jnp.zeros(
            (C1, S_buf - LB - N_pad), buf1.dtype)
        buf1[:, base + LB:base + LB + N_pad] = jnp.where(
            valid, a1[:, bi * N_pad:(bi + 1) * N_pad], 0.0).astype(buf1.dtype)

    # Stage 2: conv2 5x5 pad 2 -> buf2 window (buf2 margins already zero).
    a2 = conv(buf1, C1, 5, 2, w2_ref, s2_ref)         # (C, width)
    for bi in range(bblk):
        base = bi * S_buf
        buf2[:, base + LB:base + LB + N_pad] = jnp.where(
            valid, a2[:, bi * N_pad:(bi + 1) * N_pad], 0.0).astype(buf2.dtype)

    # Stage 3: conv3 3x3 pad 1, then fused residual x + 0.05*y in f32.
    # No mask needed: garbage columns are cropped by the wrapper and the
    # residual term (read from the f32 input) is zero there.
    a3 = conv(buf2, C, 3, 1, w3_ref, s3_ref)          # (C, width)
    for bi in range(bblk):
        o_ref[bi] = (x_ref[bi, :, LB:LB + N_pad]
                     + RES_SCALE * a3[:, bi * N_pad:(bi + 1) * N_pad])


# ----------------------------------------------------------------------------
# Wrapper
# ----------------------------------------------------------------------------
def _fold_conv_bn(p):
    """Fold conv bias + BatchNorm2d (eval) into the conv weights / a shift and
    lay the weights out for the stacked-tap GEMM: (Cout, K*K*Cin) bf16, where
    column index = (dy*K + dx)*Cin + cin."""
    scale = p["gamma"] / jnp.sqrt(p["var"] + BN_EPS)                 # (Cout,)
    shift = p["beta"] + scale * (p["b"] - p["mean"])                 # (Cout,)
    w = p["w"] * scale[:, None, None, None]
    cout, cin, k, _ = p["w"].shape
    w_mat = jnp.transpose(w, (0, 2, 3, 1)).reshape(cout, k * k * cin)
    return (w_mat.astype(jnp.bfloat16),
            shift.reshape(cout, 1).astype(jnp.float32))


def conv_res_block(x, params, *, batch_block=None):
    """x: (B, C, H, W) NCHW float32 -> (B, C, H, W)."""
    B, C, H, W = x.shape
    C1 = params["conv1"]["w"].shape[0]
    assert params["conv1"]["w"].shape[2] == 3
    assert params["conv2"]["w"].shape[2] == 5
    assert params["conv3"]["w"].shape[2] == 3
    assert params["conv2"]["w"].shape[1] == C1
    assert params["conv3"]["w"].shape[0] == C, "residual needs out == in channels"
    assert MARGIN >= 2, "margin must cover the largest conv padding (5x5 -> 2)"

    m = MARGIN
    Hp, Wp = H + 2 * m, W + 2 * m
    S = Hp * Wp                       # flat padded-plane length
    L = m * Wp + m                    # flat index of image pixel (0, 0)
    N = (H - 1) * Wp + W              # valid window length
    N_pad = _round_up(N, LANE)        # lane-dense window length
    LB = _round_up(L, LANE)           # aligned in-buffer window start (>= L)
    off_max = m * Wp + m              # largest positive tap offset (== L)
    S_buf = _round_up(LB + N_pad + off_max, LANE)
    assert LB >= off_max and LB + N_pad + off_max <= S_buf

    # Batch elements per grid step: keep grid length >= 2 (feeds both v7x
    # TensorCores); the lane-concatenated windows widen the per-step GEMMs.
    if batch_block is None:
        batch_block = B // 2 if (B >= 2 and B % 2 == 0) else 1
    bblk = batch_block
    assert B % bblk == 0
    grid = (B // bblk,)

    # Zero-padded input planes with the window at aligned offset LB.
    xpad = jnp.pad(x.astype(jnp.float32),
                   ((0, 0), (0, 0), (m, m), (m, m))).reshape(B, C, S)
    left = LB - L
    xbuf = jnp.pad(xpad, ((0, 0), (0, 0), (left, S_buf - S - left)))

    w1, s1 = _fold_conv_bn(params["conv1"])   # (C1, 9*C)   bf16, (C1, 1) f32
    w2, s2 = _fold_conv_bn(params["conv2"])   # (C,  25*C1) bf16, (C, 1)  f32
    w3, s3 = _fold_conv_bn(params["conv3"])   # (C,  9*C)   bf16, (C, 1)  f32

    tap_rows = max(C * 9, C1 * 25)
    width = bblk * N_pad

    # VMEM footprint estimate (double-buffered pallas blocks + scratch).
    est = (2 * bblk * C * S_buf * 4            # x blocks
           + 2 * bblk * C * N_pad * 4          # out blocks
           + 2 * 2 * (C1 * 9 * C + C * 25 * C1 + C * 9 * C)   # bf16 weights
           + 2 * 4 * (C1 + 2 * C)              # shifts
           + tap_rows * width * 2              # tap-stack scratch (bf16)
           + (C1 + C) * bblk * S_buf * 2)      # plane scratches (bf16)
    assert est < 56 * 1024 * 1024, (
        f"VMEM footprint {est} bytes too large for the whole-plane-resident "
        "design; add row-block tiling (see TODO)")
    vmem_limit = int(max(32 * 1024 * 1024, min(60 * 1024 * 1024, 2 * est)))

    kernel = functools.partial(_convresblock_kernel, bblk=bblk, Wp=Wp, W=W,
                               LB=LB, N=N, N_pad=N_pad, S_buf=S_buf)

    out_flat = pl.pallas_call(
        kernel,
        out_shape=jax.ShapeDtypeStruct((B, C, N_pad), jnp.float32),
        grid_spec=pltpu.PrefetchScalarGridSpec(
            num_scalar_prefetch=0,
            grid=grid,
            in_specs=[
                pl.BlockSpec((bblk, C, S_buf), lambda g: (g, 0, 0)),   # x
                pl.BlockSpec((C1, 9 * C), lambda g: (0, 0)),           # w1
                pl.BlockSpec((C1, 1), lambda g: (0, 0)),               # s1
                pl.BlockSpec((C, 25 * C1), lambda g: (0, 0)),          # w2
                pl.BlockSpec((C, 1), lambda g: (0, 0)),                # s2
                pl.BlockSpec((C, 9 * C), lambda g: (0, 0)),            # w3
                pl.BlockSpec((C, 1), lambda g: (0, 0)),                # s3
            ],
            out_specs=pl.BlockSpec((bblk, C, N_pad), lambda g: (g, 0, 0)),
            scratch_shapes=[
                pltpu.VMEM((tap_rows, width), jnp.bfloat16),     # tap stack
                pltpu.VMEM((C1, bblk * S_buf), jnp.bfloat16),    # conv1 act
                pltpu.VMEM((C, bblk * S_buf), jnp.bfloat16),     # x copy / conv2 act
            ]),
        compiler_params=pltpu.CompilerParams(
            dimension_semantics=("parallel",),
            vmem_limit_bytes=vmem_limit),
    )(xbuf, w1, s1, w2, s2, w3, s3)

    # Crop the flat window back to (B, C, H, W).
    out = out_flat[:, :, :N]
    out = jnp.pad(out, ((0, 0), (0, 0), (0, Wp - W)))
    out = out.reshape(B, C, H, Wp)[:, :, :, :W]
    return out


# ----------------------------------------------------------------------------
# Pure-JAX reference (torch semantics: eval-mode BN, exact erf GELU, f32)
# ----------------------------------------------------------------------------
def conv_res_block_ref(x, params):
    def conv_bn_gelu(h, p, pad):
        out = jax.lax.conv_general_dilated(
            h, p["w"], window_strides=(1, 1),
            padding=((pad, pad), (pad, pad)),
            dimension_numbers=("NCHW", "OIHW", "NCHW"),
            precision=jax.lax.Precision.HIGHEST)
        scale = p["gamma"] / jnp.sqrt(p["var"] + BN_EPS)
        shift = p["beta"] + scale * (p["b"] - p["mean"])
        out = out * scale[None, :, None, None] + shift[None, :, None, None]
        return jax.nn.gelu(out, approximate=False)

    y = conv_bn_gelu(x, params["conv1"], 1)
    y = conv_bn_gelu(y, params["conv2"], 2)
    y = conv_bn_gelu(y, params["conv3"], 1)
    return x + RES_SCALE * y


# ----------------------------------------------------------------------------
# Parameter init (deterministic, synthetic)
# ----------------------------------------------------------------------------
def _init_conv_bn(key, cin, cout, k):
    ks = jax.random.split(key, 6)
    fan = cin * k * k
    return dict(
        w=jax.random.normal(ks[0], (cout, cin, k, k), jnp.float32) / np.sqrt(fan),
        b=0.01 * jax.random.normal(ks[1], (cout,), jnp.float32),
        gamma=1.0 + 0.05 * jax.random.normal(ks[2], (cout,), jnp.float32),
        beta=0.05 * jax.random.normal(ks[3], (cout,), jnp.float32),
        mean=0.05 * jax.random.normal(ks[4], (cout,), jnp.float32),
        var=1.0 + 0.05 * jnp.abs(jax.random.normal(ks[5], (cout,), jnp.float32)),
    )


def init_conv_res_block(key, in_channel, out_channel):
    mult = 5   # `multiple = 5` in the torch module
    k1, k2, k3 = jax.random.split(key, 3)
    return {
        "conv1": _init_conv_bn(k1, in_channel, in_channel * mult, 3),
        "conv2": _init_conv_bn(k2, in_channel * mult, out_channel, 5),
        "conv3": _init_conv_bn(k3, out_channel, out_channel, 3),
    }


# ----------------------------------------------------------------------------
if __name__ == "__main__":
    # Small shapes consistent with the module (residual requires out == in).
    B, C, H, W = 2, 4, 16, 16
    key = jax.random.PRNGKey(0)
    kp, kx = jax.random.split(key)
    params = init_conv_res_block(kp, C, C)
    x = jax.random.normal(kx, (B, C, H, W), jnp.float32)

    fwd = jax.jit(conv_res_block)
    out = fwd(x, params)
    jax.block_until_ready(out)

    assert out.shape == (B, C, H, W), out.shape
    assert bool(jnp.all(jnp.isfinite(out)))

    ref = jax.jit(conv_res_block_ref)(x, params)
    jax.block_until_ready(ref)
    max_err = float(jnp.max(jnp.abs(out - ref)))
    assert max_err < 1e-2, f"max abs err vs reference = {max_err}"

    print("KERNEL_OK")
</pallas_src>

<mosaic_0001>
module attributes {stable_mosaic.version = 11 : i64} {
  func.func @_convresblock_kernel(%arg0: i32, %arg1: memref<1x4x640xf32, #tpu.memory_space<vmem>>, %arg2: memref<20x36xbf16, #tpu.memory_space<vmem>>, %arg3: memref<20x1xf32, #tpu.memory_space<vmem>>, %arg4: memref<4x500xbf16, #tpu.memory_space<vmem>>, %arg5: memref<4x1xf32, #tpu.memory_space<vmem>>, %arg6: memref<4x36xbf16, #tpu.memory_space<vmem>>, %arg7: memref<4x1xf32, #tpu.memory_space<vmem>>, %arg8: memref<1x4x384xf32, #tpu.memory_space<vmem>>, %arg9: memref<500x384xbf16, #tpu.memory_space<vmem>>, %arg10: memref<20x640xbf16, #tpu.memory_space<vmem>>, %arg11: memref<4x640xbf16, #tpu.memory_space<vmem>>) attributes {dimension_semantics = [#tpu.dimension_semantics<parallel>], iteration_bounds = array<i64: 2>, scalar_prefetch = 0 : i64, scratch_operands = 3 : i64, tpu.core_type = #tpu.core_type<tc>, window_params = [{transform_indices = @transform_0, window_bounds = array<i64: 1, 4, 640>}, {pipeline_mode = #tpu.pipeline_mode<synchronous>, transform_indices = @transform_1, window_bounds = array<i64: 20, 36>}, {pipeline_mode = #tpu.pipeline_mode<synchronous>, transform_indices = @transform_2, window_bounds = array<i64: 20, 1>}, {pipeline_mode = #tpu.pipeline_mode<synchronous>, transform_indices = @transform_3, window_bounds = array<i64: 4, 500>}, {pipeline_mode = #tpu.pipeline_mode<synchronous>, transform_indices = @transform_4, window_bounds = array<i64: 4, 1>}, {pipeline_mode = #tpu.pipeline_mode<synchronous>, transform_indices = @transform_5, window_bounds = array<i64: 4, 36>}, {pipeline_mode = #tpu.pipeline_mode<synchronous>, transform_indices = @transform_6, window_bounds = array<i64: 4, 1>}, {transform_indices = @transform_7, window_bounds = array<i64: 1, 4, 384>}]} {
    %0 = tpu.iota {dimensions = array<i32: 1>} : vector<1x384xi32>
    %c20_i32 = arith.constant 20 : i32
    %c0_i32 = arith.constant 0 : i32
    %1 = arith.cmpi eq, %c20_i32, %c0_i32 : i32
    %c1_i32 = arith.constant 1 : i32
    %2 = arith.select %1, %c1_i32, %c20_i32 : i32
    %3 = vector.broadcast %2 : i32 to vector<1x384xi32>
    %4 = arith.remsi %0, %3 : vector<1x384xi32>
    %c0_i32_0 = arith.constant 0 : i32
    %5 = vector.broadcast %c0_i32_0 : i32 to vector<1x384xi32>
    %6 = arith.cmpi ne, %4, %5 : vector<1x384xi32>
    %c0_i32_1 = arith.constant 0 : i32
    %7 = vector.broadcast %c0_i32_1 : i32 to vector<1x384xi32>
    %8 = arith.cmpi slt, %4, %7 : vector<1x384xi32>
    %c0_i32_2 = arith.constant 0 : i32
    %9 = arith.cmpi slt, %2, %c0_i32_2 : i32
    %10 = vector.broadcast %9 : i1 to vector<1x384xi1>
    %11 = vector.broadcast %10 : vector<1x384xi1> to vector<1x384xi1>
    %12 = arith.xori %8, %11 : vector<1x384xi1>
    %13 = arith.andi %12, %6 : vector<1x384xi1>
    %14 = vector.broadcast %2 : i32 to vector<1x384xi32>
    %15 = arith.addi %4, %14 : vector<1x384xi32>
    %16 = arith.select %13, %15, %4 : vector<1x384xi1>, vector<1x384xi32>
    %c16_i32 = arith.constant 16 : i32
    %17 = vector.broadcast %c16_i32 : i32 to vector<1x384xi32>
    %18 = arith.cmpi slt, %16, %17 : vector<1x384xi32>
    %c316_i32 = arith.constant 316 : i32
    %19 = vector.broadcast %c316_i32 : i32 to vector<1x384xi32>
    %20 = arith.cmpi slt, %0, %19 : vector<1x384xi32>
    %21 = arith.andi %18, %20 : vector<1x384xi1>
    %c0 = arith.constant 0 : index
    %c0_3 = arith.constant 0 : index
    %c0_4 = arith.constant 0 : index
    %22 = vector.load %arg1[%c0, %c0_3, %c0_4] : memref<1x4x640xf32, #tpu.memory_space<vmem>>, vector<1x4x640xf32>
    %23 = vector.shape_cast %22 : vector<1x4x640xf32> to vector<4x640xf32>
    %24 = arith.truncf %23 : vector<4x640xf32> to vector<4x640xbf16>
    %c0_5 = arith.constant 0 : index
    %c0_6 = arith.constant 0 : index
    %25 = vector.load %arg11[%c0_5, %c0_6] : memref<4x640xbf16, #tpu.memory_space<vmem>>, vector<4x640xbf16>
    tpu.vector_store %arg11[%c0_5, %c0_6], %24 {strides = array<i32>} : memref<4x640xbf16, #tpu.memory_space<vmem>>, vector<4x640xbf16>,
    %c0_7 = arith.constant 0 : index
    %c107 = arith.constant 107 : index
    %26 = vector.load %arg11[%c0_7, %c107] : memref<4x640xbf16, #tpu.memory_space<vmem>>, vector<4x384xbf16>
    %c0_8 = arith.constant 0 : index
    %c0_9 = arith.constant 0 : index
    %27 = vector.load %arg9[%c0_8, %c0_9] : memref<500x384xbf16, #tpu.memory_space<vmem>>, vector<4x384xbf16>
    tpu.vector_store %arg9[%c0_8, %c0_9], %26 {strides = array<i32>} : memref<500x384xbf16, #tpu.memory_space<vmem>>, vector<4x384xbf16>,
    %c0_10 = arith.constant 0 : index
    %c108 = arith.constant 108 : index
    %28 = vector.load %arg11[%c0_10, %c108] : memref<4x640xbf16, #tpu.memory_space<vmem>>, vector<4x384xbf16>
    %c4 = arith.constant 4 : index
    %c0_11 = arith.constant 0 : index
    %29 = vector.load %arg9[%c4, %c0_11] : memref<500x384xbf16, #tpu.memory_space<vmem>>, vector<4x384xbf16>
    tpu.vector_store %arg9[%c4, %c0_11], %28 {strides = array<i32>} : memref<500x384xbf16, #tpu.memory_space<vmem>>, vector<4x384xbf16>,
    %c0_12 = arith.constant 0 : index
    %c109 = arith.constant 109 : index
    %30 = vector.load %arg11[%c0_12, %c109] : memref<4x640xbf16, #tpu.memory_space<vmem>>, vector<4x384xbf16>
    %c8 = arith.constant 8 : index
    %c0_13 = arith.constant 0 : index
    %31 = vector.load %arg9[%c8, %c0_13] : memref<500x384xbf16, #tpu.memory_space<vmem>>, vector<4x384xbf16>
    tpu.vector_store %arg9[%c8, %c0_13], %30 {strides = array<i32>} : memref<500x384xbf16, #tpu.memory_space<vmem>>, vector<4x384xbf16>,
    %c0_14 = arith.constant 0 : index
    %c127 = arith.constant 127 : index
    %32 = vector.load %arg11[%c0_14, %c127] : memref<4x640xbf16, #tpu.memory_space<vmem>>, vector<4x384xbf16>
    %c12 = arith.constant 12 : index
    %c0_15 = arith.constant 0 : index
    %33 = vector.load %arg9[%c12, %c0_15] : memref<500x384xbf16, #tpu.memory_space<vmem>>, vector<4x384xbf16>
    tpu.vector_store %arg9[%c12, %c0_15], %32 {strides = array<i32>} : memref<500x384xbf16, #tpu.memory_space<vmem>>, vector<4x384xbf16>,
    %c0_16 = arith.constant 0 : index
    %c128 = arith.constant 128 : index
    %34 = vector.load %arg11[%c0_16, %c128] : memref<4x640xbf16, #tpu.memory_space<vmem>>, vector<4x384xbf16>
    %c16 = arith.constant 16 : index
    %c0_17 = arith.constant 0 : index
    %35 = vector.load %arg9[%c16, %c0_17] : memref<500x384xbf16, #tpu.memory_space<vmem>>, vector<4x384xbf16>
    tpu.vector_store %arg9[%c16, %c0_17], %34 {strides = array<i32>} : memref<500x384xbf16, #tpu.memory_space<vmem>>, vector<4x384xbf16>,
    %c0_18 = arith.constant 0 : index
    %c129 = arith.constant 129 : index
    %36 = vector.load %arg11[%c0_18, %c129] : memref<4x640xbf16, #tpu.memory_space<vmem>>, vector<4x384xbf16>
    %c20 = arith.constant 20 : index
    %c0_19 = arith.constant 0 : index
    %37 = vector.load %arg9[%c20, %c0_19] : memref<500x384xbf16, #tpu.memory_space<vmem>>, vector<4x384xbf16>
    tpu.vector_store %arg9[%c20, %c0_19], %36 {strides = array<i32>} : memref<500x384xbf16, #tpu.memory_space<vmem>>, vector<4x384xbf16>,
    %c0_20 = arith.constant 0 : index
    %c147 = arith.constant 147 : index
    %38 = vector.load %arg11[%c0_20, %c147] : memref<4x640xbf16, #tpu.memory_space<vmem>>, vector<4x384xbf16>
    %c24 = arith.constant 24 : index
    %c0_21 = arith.constant 0 : index
    %39 = vector.load %arg9[%c24, %c0_21] : memref<500x384xbf16, #tpu.memory_space<vmem>>, vector<4x384xbf16>
    tpu.vector_store %arg9[%c24, %c0_21], %38 {strides = array<i32>} : memref<500x384xbf16, #tpu.memory_space<vmem>>, vector<4x384xbf16>,
    %c0_22 = arith.constant 0 : index
    %c148 = arith.constant 148 : index
    %40 = vector.load %arg11[%c0_22, %c148] : memref<4x640xbf16, #tpu.memory_space<vmem>>, vector<4x384xbf16>
    %c28 = arith.constant 28 : index
    %c0_23 = arith.constant 0 : index
    %41 = vector.load %arg9[%c28, %c0_23] : memref<500x384xbf16, #tpu.memory_space<vmem>>, vector<4x384xbf16>
    tpu.vector_store %arg9[%c28, %c0_23], %40 {strides = array<i32>} : memref<500x384xbf16, #tpu.memory_space<vmem>>, vector<4x384xbf16>,
    %c0_24 = arith.constant 0 : index
    %c149 = arith.constant 149 : index
    %42 = vector.load %arg11[%c0_24, %c149] : memref<4x640xbf16, #tpu.memory_space<vmem>>, vector<4x384xbf16>
    %c32 = arith.constant 32 : index
    %c0_25 = arith.constant 0 : index
    %43 = vector.load %arg9[%c32, %c0_25] : memref<500x384xbf16, #tpu.memory_space<vmem>>, vector<4x384xbf16>
    tpu.vector_store %arg9[%c32, %c0_25], %42 {strides = array<i32>} : memref<500x384xbf16, #tpu.memory_space<vmem>>, vector<4x384xbf16>,
    %c0_26 = arith.constant 0 : index
    %c0_27 = arith.constant 0 : index
    %44 = vector.load %arg2[%c0_26, %c0_27] : memref<20x36xbf16, #tpu.memory_space<vmem>>, vector<20x36xbf16>
    %c0_28 = arith.constant 0 : index
    %c0_29 = arith.constant 0 : index
    %45 = vector.load %arg9[%c0_28, %c0_29] : memref<500x384xbf16, #tpu.memory_space<vmem>>, vector<36x384xbf16>
    %cst = arith.constant dense<0.000000e+00> : vector<20x384xf32>
    %46 = tpu.matmul %44, %45, %cst {dimension_numbers = #tpu.dot_dimension_numbers<[1], [0], [0], [1], [0, 0, 1, 1], [], []>} : vector<20x36xbf16>, vector<36x384xbf16>, vector<20x384xf32> -> vector<20x384xf32>
    %c0_30 = arith.constant 0 : index
    %c0_31 = arith.constant 0 : index
    %47 = vector.load %arg3[%c0_30, %c0_31] : memref<20x1xf32, #tpu.memory_space<vmem>>, vector<20x1xf32>
    %48 = vector.broadcast %47 : vector<20x1xf32> to vector<20x384xf32>
    %49 = arith.addf %46, %48 : vector<20x384xf32>
    %cst_32 = arith.constant 5.000000e-01 : f32
    %50 = vector.broadcast %cst_32 : f32 to vector<20x384xf32>
    %51 = arith.mulf %50, %49 : vector<20x384xf32>
    %cst_33 = arith.constant 4.471500e-02 : f32
    %52 = vector.broadcast %cst_33 : f32 to vector<20x384xf32>
    %53 = arith.mulf %52, %49 : vector<20x384xf32>
    %54 = arith.mulf %53, %49 : vector<20x384xf32>
    %55 = arith.mulf %54, %49 : vector<20x384xf32>
    %56 = arith.addf %49, %55 : vector<20x384xf32>
    %cst_34 = arith.constant 0.797884583 : f32
    %57 = vector.broadcast %cst_34 : f32 to vector<20x384xf32>
    %58 = arith.mulf %57, %56 : vector<20x384xf32>
    %59 = math.tanh %58 : vector<20x384xf32>
    %cst_35 = arith.constant 1.000000e+00 : f32
    %60 = vector.broadcast %cst_35 : f32 to vector<20x384xf32>
    %61 = arith.addf %60, %59 : vector<20x384xf32>
    %62 = arith.mulf %51, %61 : vector<20x384xf32>
    %cst_36 = arith.constant 0.000000e+00 : bf16
    %63 = vector.broadcast %cst_36 : bf16 to vector<20x128xbf16>
    %c0_37 = arith.constant 0 : index
    %c0_38 = arith.constant 0 : index
    %64 = vector.load %arg10[%c0_37, %c0_38] : memref<20x640xbf16, #tpu.memory_space<vmem>>, vector<20x128xbf16>
    tpu.vector_store %arg10[%c0_37, %c0_38], %63 {strides = array<i32>} : memref<20x640xbf16, #tpu.memory_space<vmem>>, vector<20x128xbf16>,
    %cst_39 = arith.constant 0.000000e+00 : bf16
    %65 = vector.broadcast %cst_39 : bf16 to vector<20x128xbf16>
    %c0_40 = arith.constant 0 : index
    %c512 = arith.constant 512 : index
    %66 = vector.load %arg10[%c0_40, %c512] : memref<20x640xbf16, #tpu.memory_space<vmem>>, vector<20x128xbf16>
    tpu.vector_store %arg10[%c0_40, %c512], %65 {strides = array<i32>} : memref<20x640xbf16, #tpu.memory_space<vmem>>, vector<20x128xbf16>,
    %cst_41 = arith.constant 0.000000e+00 : f32
    %67 = vector.shape_cast %21 : vector<1x384xi1> to vector<1x384xi1>
    %68 = vector.broadcast %67 : vector<1x384xi1> to vector<20x384xi1>
    %69 = vector.broadcast %cst_41 : f32 to vector<20x384xf32>
    %70 = arith.select %68, %62, %69 : vector<20x384xi1>, vector<20x384xf32>
    %71 = arith.truncf %70 : vector<20x384xf32> to vector<20x384xbf16>
    %c0_42 = arith.constant 0 : index
    %c128_43 = arith.constant 128 : index
    %72 = vector.load %arg10[%c0_42, %c128_43] : memref<20x640xbf16, #tpu.memory_space<vmem>>, vector<20x384xbf16>
    tpu.vector_store %arg10[%c0_42, %c128_43], %71 {strides = array<i32>} : memref<20x640xbf16, #tpu.memory_space<vmem>>, vector<20x384xbf16>,
    %c0_44 = arith.constant 0 : index
    %c86 = arith.constant 86 : index
    %73 = vector.load %arg10[%c0_44, %c86] : memref<20x640xbf16, #tpu.memory_space<vmem>>, vector<20x384xbf16>
    %c0_45 = arith.constant 0 : index
    %c0_46 = arith.constant 0 : index
    %74 = vector.load %arg9[%c0_45, %c0_46] : memref<500x384xbf16, #tpu.memory_space<vmem>>, vector<20x384xbf16>
    tpu.vector_store %arg9[%c0_45, %c0_46], %73 {strides = array<i32>} : memref<500x384xbf16, #tpu.memory_space<vmem>>, vector<20x384xbf16>,
    %c0_47 = arith.constant 0 : index
    %c87 = arith.constant 87 : index
    %75 = vector.load %arg10[%c0_47, %c87] : memref<20x640xbf16, #tpu.memory_space<vmem>>, vector<20x384xbf16>
    %c20_48 = arith.constant 20 : index
    %c0_49 = arith.constant 0 : index
    %76 = vector.load %arg9[%c20_48, %c0_49] : memref<500x384xbf16, #tpu.memory_space<vmem>>, vector<20x384xbf16>
    tpu.vector_store %arg9[%c20_48, %c0_49], %75 {strides = array<i32>} : memref<500x384xbf16, #tpu.memory_space<vmem>>, vector<20x384xbf16>,
    %c0_50 = arith.constant 0 : index
    %c88 = arith.constant 88 : index
    %77 = vector.load %arg10[%c0_50, %c88] : memref<20x640xbf16, #tpu.memory_space<vmem>>, vector<20x384xbf16>
    %c40 = arith.constant 40 : index
    %c0_51 = arith.constant 0 : index
    %78 = vector.load %arg9[%c40, %c0_51] : memref<500x384xbf16, #tpu.memory_space<vmem>>, vector<20x384xbf16>
    tpu.vector_store %arg9[%c40, %c0_51], %77 {strides = array<i32>} : memref<500x384xbf16, #tpu.memory_space<vmem>>, vector<20x384xbf16>,
    %c0_52 = arith.constant 0 : index
    %c89 = arith.constant 89 : index
    %79 = vector.load %arg10[%c0_52, %c89] : memref<20x640xbf16, #tpu.memory_space<vmem>>, vector<20x384xbf16>
    %c60 = arith.constant 60 : index
    %c0_53 = arith.constant 0 : index
    %80 = vector.load %arg9[%c60, %c0_53] : memref<500x384xbf16, #tpu.memory_space<vmem>>, vector<20x384xbf16>
    tpu.vector_store %arg9[%c60, %c0_53], %79 {strides = array<i32>} : memref<500x384xbf16, #tpu.memory_space<vmem>>, vector<20x384xbf16>,
    %c0_54 = arith.constant 0 : index
    %c90 = arith.constant 90 : index
    %81 = vector.load %arg10[%c0_54, %c90] : memref<20x640xbf16, #tpu.memory_space<vmem>>, vector<20x384xbf16>
    %c80 = arith.constant 80 : index
    %c0_55 = arith.constant 0 : index
    %82 = vector.load %arg9[%c80, %c0_55] : memref<500x384xbf16, #tpu.memory_space<vmem>>, vector<20x384xbf16>
    tpu.vector_store %arg9[%c80, %c0_55], %81 {strides = array<i32>} : memref<500x384xbf16, #tpu.memory_space<vmem>>, vector<20x384xbf16>,
    %c0_56 = arith.constant 0 : index
    %c106 = arith.constant 106 : index
    %83 = vector.load %arg10[%c0_56, %c106] : memref<20x640xbf16, #tpu.memory_space<vmem>>, vector<20x384xbf16>
    %c100 = arith.constant 100 : index
    %c0_57 = arith.constant 0 : index
    %84 = vector.load %arg9[%c100, %c0_57] : memref<500x384xbf16, #tpu.memory_space<vmem>>, vector<20x384xbf16>
    tpu.vector_store %arg9[%c100, %c0_57], %83 {strides = array<i32>} : memref<500x384xbf16, #tpu.memory_space<vmem>>, vector<20x384xbf16>,
    %c0_58 = arith.constant 0 : index
    %c107_59 = arith.constant 107 : index
    %85 = vector.load %arg10[%c0_58, %c107_59] : memref<20x640xbf16, #tpu.memory_space<vmem>>, vector<20x384xbf16>
    %c120 = arith.constant 120 : index
    %c0_60 = arith.constant 0 : index
    %86 = vector.load %arg9[%c120, %c0_60] : memref<500x384xbf16, #tpu.memory_space<vmem>>, vector<20x384xbf16>
    tpu.vector_store %arg9[%c120, %c0_60], %85 {strides = array<i32>} : memref<500x384xbf16, #tpu.memory_space<vmem>>, vector<20x384xbf16>,
    %c0_61 = arith.constant 0 : index
    %c108_62 = arith.constant 108 : index
    %87 = vector.load %arg10[%c0_61, %c108_62] : memref<20x640xbf16, #tpu.memory_space<vmem>>, vector<20x384xbf16>
    %c140 = arith.constant 140 : index
    %c0_63 = arith.constant 0 : index
    %88 = vector.load %arg9[%c140, %c0_63] : memref<500x384xbf16, #tpu.memory_space<vmem>>, vector<20x384xbf16>
    tpu.vector_store %arg9[%c140, %c0_63], %87 {strides = array<i32>} : memref<500x384xbf16, #tpu.memory_space<vmem>>, vector<20x384xbf16>,
    %c0_64 = arith.constant 0 : index
    %c109_65 = arith.constant 109 : index
    %89 = vector.load %arg10[%c0_64, %c109_65] : memref<20x640xbf16, #tpu.memory_space<vmem>>, vector<20x384xbf16>
    %c160 = arith.constant 160 : index
    %c0_66 = arith.constant 0 : index
    %90 = vector.load %arg9[%c160, %c0_66] : memref<500x384xbf16, #tpu.memory_space<vmem>>, vector<20x384xbf16>
    tpu.vector_store %arg9[%c160, %c0_66], %89 {strides = array<i32>} : memref<500x384xbf16, #tpu.memory_space<vmem>>, vector<20x384xbf16>,
    %c0_67 = arith.constant 0 : index
    %c110 = arith.constant 110 : index
    %91 = vector.load %arg10[%c0_67, %c110] : memref<20x640xbf16, #tpu.memory_space<vmem>>, vector<20x384xbf16>
    %c180 = arith.constant 180 : index
    %c0_68 = arith.constant 0 : index
    %92 = vector.load %arg9[%c180, %c0_68] : memref<500x384xbf16, #tpu.memory_space<vmem>>, vector<20x384xbf16>
    tpu.vector_store %arg9[%c180, %c0_68], %91 {strides = array<i32>} : memref<500x384xbf16, #tpu.memory_space<vmem>>, vector<20x384xbf16>,
    %c0_69 = arith.constant 0 : index
    %c126 = arith.constant 126 : index
    %93 = vector.load %arg10[%c0_69, %c126] : memref<20x640xbf16, #tpu.memory_space<vmem>>, vector<20x384xbf16>
    %c200 = arith.constant 200 : index
    %c0_70 = arith.constant 0 : index
    %94 = vector.load %arg9[%c200, %c0_70] : memref<500x384xbf16, #tpu.memory_space<vmem>>, vector<20x384xbf16>
    tpu.vector_store %arg9[%c200, %c0_70], %93 {strides = array<i32>} : memref<500x384xbf16, #tpu.memory_space<vmem>>, vector<20x384xbf16>,
    %c0_71 = arith.constant 0 : index
    %c127_72 = arith.constant 127 : index
    %95 = vector.load %arg10[%c0_71, %c127_72] : memref<20x640xbf16, #tpu.memory_space<vmem>>, vector<20x384xbf16>
    %c220 = arith.constant 220 : index
    %c0_73 = arith.constant 0 : index
    %96 = vector.load %arg9[%c220, %c0_73] : memref<500x384xbf16, #tpu.memory_space<vmem>>, vector<20x384xbf16>
    tpu.vector_store %arg9[%c220, %c0_73], %95 {strides = array<i32>} : memref<500x384xbf16, #tpu.memory_space<vmem>>, vector<20x384xbf16>,
    %c0_74 = arith.constant 0 : index
    %c128_75 = arith.constant 128 : index
    %97 = vector.load %arg10[%c0_74, %c128_75] : memref<20x640xbf16, #tpu.memory_space<vmem>>, vector<20x384xbf16>
    %c240 = arith.constant 240 : index
    %c0_76 = arith.constant 0 : index
    %98 = vector.load %arg9[%c240, %c0_76] : memref<500x384xbf16, #tpu.memory_space<vmem>>, vector<20x384xbf16>
    tpu.vector_store %arg9[%c240, %c0_76], %97 {strides = array<i32>} : memref<500x384xbf16, #tpu.memory_space<vmem>>, vector<20x384xbf16>,
    %c0_77 = arith.constant 0 : index
    %c129_78 = arith.constant 129 : index
    %99 = vector.load %arg10[%c0_77, %c129_78] : memref<20x640xbf16, #tpu.memory_space<vmem>>, vector<20x384xbf16>
    %c260 = arith.constant 260 : index
    %c0_79 = arith.constant 0 : index
    %100 = vector.load %arg9[%c260, %c0_79] : memref<500x384xbf16, #tpu.memory_space<vmem>>, vector<20x384xbf16>
    tpu.vector_store %arg9[%c260, %c0_79], %99 {strides = array<i32>} : memref<500x384xbf16, #tpu.memory_space<vmem>>, vector<20x384xbf16>,
    %c0_80 = arith.constant 0 : index
    %c130 = arith.constant 130 : index
    %101 = vector.load %arg10[%c0_80, %c130] : memref<20x640xbf16, #tpu.memory_space<vmem>>, vector<20x384xbf16>
    %c280 = arith.constant 280 : index
    %c0_81 = arith.constant 0 : index
    %102 = vector.load %arg9[%c280, %c0_81] : memref<500x384xbf16, #tpu.memory_space<vmem>>, vector<20x384xbf16>
    tpu.vector_store %arg9[%c280, %c0_81], %101 {strides = array<i32>} : memref<500x384xbf16, #tpu.memory_space<vmem>>, vector<20x384xbf16>,
    %c0_82 = arith.constant 0 : index
    %c146 = arith.constant 146 : index
    %103 = vector.load %arg10[%c0_82, %c146] : memref<20x640xbf16, #tpu.memory_space<vmem>>, vector<20x384xbf16>
    %c300 = arith.constant 300 : index
    %c0_83 = arith.constant 0 : index
    %104 = vector.load %arg9[%c300, %c0_83] : memref<500x384xbf16, #tpu.memory_space<vmem>>, vector<20x384xbf16>
    tpu.vector_store %arg9[%c300, %c0_83], %103 {strides = array<i32>} : memref<500x384xbf16, #tpu.memory_space<vmem>>, vector<20x384xbf16>,
    %c0_84 = arith.constant 0 : index
    %c147_85 = arith.constant 147 : index
    %105 = vector.load %arg10[%c0_84, %c147_85] : memref<20x640xbf16, #tpu.memory_space<vmem>>, vector<20x384xbf16>
    %c320 = arith.constant 320 : index
    %c0_86 = arith.constant 0 : index
    %106 = vector.load %arg9[%c320, %c0_86] : memref<500x384xbf16, #tpu.memory_space<vmem>>, vector<20x384xbf16>
    tpu.vector_store %arg9[%c320, %c0_86], %105 {strides = array<i32>} : memref<500x384xbf16, #tpu.memory_space<vmem>>, vector<20x384xbf16>,
    %c0_87 = arith.constant 0 : index
    %c148_88 = arith.constant 148 : index
    %107 = vector.load %arg10[%c0_87, %c148_88] : memref<20x640xbf16, #tpu.memory_space<vmem>>, vector<20x384xbf16>
    %c340 = arith.constant 340 : index
    %c0_89 = arith.constant 0 : index
    %108 = vector.load %arg9[%c340, %c0_89] : memref<500x384xbf16, #tpu.memory_space<vmem>>, vector<20x384xbf16>
    tpu.vector_store %arg9[%c340, %c0_89], %107 {strides = array<i32>} : memref<500x384xbf16, #tpu.memory_space<vmem>>, vector<20x384xbf16>,
    %c0_90 = arith.constant 0 : index
    %c149_91 = arith.constant 149 : index
    %109 = vector.load %arg10[%c0_90, %c149_91] : memref<20x640xbf16, #tpu.memory_space<vmem>>, vector<20x384xbf16>
    %c360 = arith.constant 360 : index
    %c0_92 = arith.constant 0 : index
    %110 = vector.load %arg9[%c360, %c0_92] : memref<500x384xbf16, #tpu.memory_space<vmem>>, vector<20x384xbf16>
    tpu.vector_store %arg9[%c360, %c0_92], %109 {strides = array<i32>} : memref<500x384xbf16, #tpu.memory_space<vmem>>, vector<20x384xbf16>,
    %c0_93 = arith.constant 0 : index
    %c150 = arith.constant 150 : index
    %111 = vector.load %arg10[%c0_93, %c150] : memref<20x640xbf16, #tpu.memory_space<vmem>>, vector<20x384xbf16>
    %c380 = arith.constant 380 : index
    %c0_94 = arith.constant 0 : index
    %112 = vector.load %arg9[%c380, %c0_94] : memref<500x384xbf16, #tpu.memory_space<vmem>>, vector<20x384xbf16>
    tpu.vector_store %arg9[%c380, %c0_94], %111 {strides = array<i32>} : memref<500x384xbf16, #tpu.memory_space<vmem>>, vector<20x384xbf16>,
    %c0_95 = arith.constant 0 : index
    %c166 = arith.constant 166 : index
    %113 = vector.load %arg10[%c0_95, %c166] : memref<20x640xbf16, #tpu.memory_space<vmem>>, vector<20x384xbf16>
    %c400 = arith.constant 400 : index
    %c0_96 = arith.constant 0 : index
    %114 = vector.load %arg9[%c400, %c0_96] : memref<500x384xbf16, #tpu.memory_space<vmem>>, vector<20x384xbf16>
    tpu.vector_store %arg9[%c400, %c0_96], %113 {strides = array<i32>} : memref<500x384xbf16, #tpu.memory_space<vmem>>, vector<20x384xbf16>,
    %c0_97 = arith.constant 0 : index
    %c167 = arith.constant 167 : index
    %115 = vector.load %arg10[%c0_97, %c167] : memref<20x640xbf16, #tpu.memory_space<vmem>>, vector<20x384xbf16>
    %c420 = arith.constant 420 : index
    %c0_98 = arith.constant 0 : index
    %116 = vector.load %arg9[%c420, %c0_98] : memref<500x384xbf16, #tpu.memory_space<vmem>>, vector<20x384xbf16>
    tpu.vector_store %arg9[%c420, %c0_98], %115 {strides = array<i32>} : memref<500x384xbf16, #tpu.memory_space<vmem>>, vector<20x384xbf16>,
    %c0_99 = arith.constant 0 : index
    %c168 = arith.constant 168 : index
    %117 = vector.load %arg10[%c0_99, %c168] : memref<20x640xbf16, #tpu.memory_space<vmem>>, vector<20x384xbf16>
    %c440 = arith.constant 440 : index
    %c0_100 = arith.constant 0 : index
    %118 = vector.load %arg9[%c440, %c0_100] : memref<500x384xbf16, #tpu.memory_space<vmem>>, vector<20x384xbf16>
    tpu.vector_store %arg9[%c440, %c0_100], %117 {strides = array<i32>} : memref<500x384xbf16, #tpu.memory_space<vmem>>, vector<20x384xbf16>,
    %c0_101 = arith.constant 0 : index
    %c169 = arith.constant 169 : index
    %119 = vector.load %arg10[%c0_101, %c169] : memref<20x640xbf16, #tpu.memory_space<vmem>>, vector<20x384xbf16>
    %c460 = arith.constant 460 : index
    %c0_102 = arith.constant 0 : index
    %120 = vector.load %arg9[%c460, %c0_102] : memref<500x384xbf16, #tpu.memory_space<vmem>>, vector<20x384xbf16>
    tpu.vector_store %arg9[%c460, %c0_102], %119 {strides = array<i32>} : memref<500x384xbf16, #tpu.memory_space<vmem>>, vector<20x384xbf16>,
    %c0_103 = arith.constant 0 : index
    %c170 = arith.constant 170 : index
    %121 = vector.load %arg10[%c0_103, %c170] : memref<20x640xbf16, #tpu.memory_space<vmem>>, vector<20x384xbf16>
    %c480 = arith.constant 480 : index
    %c0_104 = arith.constant 0 : index
    %122 = vector.load %arg9[%c480, %c0_104] : memref<500x384xbf16, #tpu.memory_space<vmem>>, vector<20x384xbf16>
    tpu.vector_store %arg9[%c480, %c0_104], %121 {strides = array<i32>} : memref<500x384xbf16, #tpu.memory_space<vmem>>, vector<20x384xbf16>,
    %c0_105 = arith.constant 0 : index
    %c0_106 = arith.constant 0 : index
    %123 = vector.load %arg4[%c0_105, %c0_106] : memref<4x500xbf16, #tpu.memory_space<vmem>>, vector<4x500xbf16>
    %c0_107 = arith.constant 0 : index
    %c0_108 = arith.constant 0 : index
    %124 = vector.load %arg9[%c0_107, %c0_108] : memref<500x384xbf16, #tpu.memory_space<vmem>>, vector<500x384xbf16>
    %cst_109 = arith.constant dense<0.000000e+00> : vector<4x384xf32>
    %125 = tpu.matmul %123, %124, %cst_109 {dimension_numbers = #tpu.dot_dimension_numbers<[1], [0], [0], [1], [0, 0, 1, 1], [], []>} : vector<4x500xbf16>, vector<500x384xbf16>, vector<4x384xf32> -> vector<4x384xf32>
    %c0_110 = arith.constant 0 : index
    %c0_111 = arith.constant 0 : index
    %126 = vector.load %arg5[%c0_110, %c0_111] : memref<4x1xf32, #tpu.memory_space<vmem>>, vector<4x1xf32>
    %127 = vector.broadcast %126 : vector<4x1xf32> to vector<4x384xf32>
    %128 = arith.addf %125, %127 : vector<4x384xf32>
    %cst_112 = arith.constant 5.000000e-01 : f32
    %129 = vector.broadcast %cst_112 : f32 to vector<4x384xf32>
    %130 = arith.mulf %129, %128 : vector<4x384xf32>
    %cst_113 = arith.constant 4.471500e-02 : f32
    %131 = vector.broadcast %cst_113 : f32 to vector<4x384xf32>
    %132 = arith.mulf %131, %128 : vector<4x384xf32>
    %133 = arith.mulf %132, %128 : vector<4x384xf32>
    %134 = arith.mulf %133, %128 : vector<4x384xf32>
    %135 = arith.addf %128, %134 : vector<4x384xf32>
    %cst_114 = arith.constant 0.797884583 : f32
    %136 = vector.broadcast %cst_114 : f32 to vector<4x384xf32>
    %137 = arith.mulf %136, %135 : vector<4x384xf32>
    %138 = math.tanh %137 : vector<4x384xf32>
    %cst_115 = arith.constant 1.000000e+00 : f32
    %139 = vector.broadcast %cst_115 : f32 to vector<4x384xf32>
    %140 = arith.addf %139, %138 : vector<4x384xf32>
    %141 = arith.mulf %130, %140 : vector<4x384xf32>
    %cst_116 = arith.constant 0.000000e+00 : f32
    %142 = vector.shape_cast %21 : vector<1x384xi1> to vector<1x384xi1>
    %143 = vector.broadcast %142 : vector<1x384xi1> to vector<4x384xi1>
    %144 = vector.broadcast %cst_116 : f32 to vector<4x384xf32>
    %145 = arith.select %143, %141, %144 : vector<4x384xi1>, vector<4x384xf32>
    %146 = arith.truncf %145 : vector<4x384xf32> to vector<4x384xbf16>
    %c0_117 = arith.constant 0 : index
    %c128_118 = arith.constant 128 : index
    %147 = vector.load %arg11[%c0_117, %c128_118] : memref<4x640xbf16, #tpu.memory_space<vmem>>, vector<4x384xbf16>
    tpu.vector_store %arg11[%c0_117, %c128_118], %146 {strides = array<i32>} : memref<4x640xbf16, #tpu.memory_space<vmem>>, vector<4x384xbf16>,
    %c0_119 = arith.constant 0 : index
    %c107_120 = arith.constant 107 : index
    %148 = vector.load %arg11[%c0_119, %c107_120] : memref<4x640xbf16, #tpu.memory_space<vmem>>, vector<4x384xbf16>
    %c0_121 = arith.constant 0 : index
    %c0_122 = arith.constant 0 : index
    %149 = vector.load %arg9[%c0_121, %c0_122] : memref<500x384xbf16, #tpu.memory_space<vmem>>, vector<4x384xbf16>
    tpu.vector_store %arg9[%c0_121, %c0_122], %148 {strides = array<i32>} : memref<500x384xbf16, #tpu.memory_space<vmem>>, vector<4x384xbf16>,
    %c0_123 = arith.constant 0 : index
    %c108_124 = arith.constant 108 : index
    %150 = vector.load %arg11[%c0_123, %c108_124] : memref<4x640xbf16, #tpu.memory_space<vmem>>, vector<4x384xbf16>
    %c4_125 = arith.constant 4 : index
    %c0_126 = arith.constant 0 : index
    %151 = vector.load %arg9[%c4_125, %c0_126] : memref<500x384xbf16, #tpu.memory_space<vmem>>, vector<4x384xbf16>
    tpu.vector_store %arg9[%c4_125, %c0_126], %150 {strides = array<i32>} : memref<500x384xbf16, #tpu.memory_space<vmem>>, vector<4x384xbf16>,
    %c0_127 = arith.constant 0 : index
    %c109_128 = arith.constant 109 : index
    %152 = vector.load %arg11[%c0_127, %c109_128] : memref<4x640xbf16, #tpu.memory_space<vmem>>, vector<4x384xbf16>
    %c8_129 = arith.constant 8 : index
    %c0_130 = arith.constant 0 : index
    %153 = vector.load %arg9[%c8_129, %c0_130] : memref<500x384xbf16, #tpu.memory_space<vmem>>, vector<4x384xbf16>
    tpu.vector_store %arg9[%c8_129, %c0_130], %152 {strides = array<i32>} : memref<500x384xbf16, #tpu.memory_space<vmem>>, vector<4x384xbf16>,
    %c0_131 = arith.constant 0 : index
    %c127_132 = arith.constant 127 : index
    %154 = vector.load %arg11[%c0_131, %c127_132] : memref<4x640xbf16, #tpu.memory_space<vmem>>, vector<4x384xbf16>
    %c12_133 = arith.constant 12 : index
    %c0_134 = arith.constant 0 : index
    %155 = vector.load %arg9[%c12_133, %c0_134] : memref<500x384xbf16, #tpu.memory_space<vmem>>, vector<4x384xbf16>
    tpu.vector_store %arg9[%c12_133, %c0_134], %154 {strides = array<i32>} : memref<500x384xbf16, #tpu.memory_space<vmem>>, vector<4x384xbf16>,
    %c0_135 = arith.constant 0 : index
    %c128_136 = arith.constant 128 : index
    %156 = vector.load %arg11[%c0_135, %c128_136] : memref<4x640xbf16, #tpu.memory_space<vmem>>, vector<4x384xbf16>
    %c16_137 = arith.constant 16 : index
    %c0_138 = arith.constant 0 : index
    %157 = vector.load %arg9[%c16_137, %c0_138] : memref<500x384xbf16, #tpu.memory_space<vmem>>, vector<4x384xbf16>
    tpu.vector_store %arg9[%c16_137, %c0_138], %156 {strides = array<i32>} : memref<500x384xbf16, #tpu.memory_space<vmem>>, vector<4x384xbf16>,
    %c0_139 = arith.constant 0 : index
    %c129_140 = arith.constant 129 : index
    %158 = vector.load %arg11[%c0_139, %c129_140] : memref<4x640xbf16, #tpu.memory_space<vmem>>, vector<4x384xbf16>
    %c20_141 = arith.constant 20 : index
    %c0_142 = arith.constant 0 : index
    %159 = vector.load %arg9[%c20_141, %c0_142] : memref<500x384xbf16, #tpu.memory_space<vmem>>, vector<4x384xbf16>
    tpu.vector_store %arg9[%c20_141, %c0_142], %158 {strides = array<i32>} : memref<500x384xbf16, #tpu.memory_space<vmem>>, vector<4x384xbf16>,
    %c0_143 = arith.constant 0 : index
    %c147_144 = arith.constant 147 : index
    %160 = vector.load %arg11[%c0_143, %c147_144] : memref<4x640xbf16, #tpu.memory_space<vmem>>, vector<4x384xbf16>
    %c24_145 = arith.constant 24 : index
    %c0_146 = arith.constant 0 : index
    %161 = vector.load %arg9[%c24_145, %c0_146] : memref<500x384xbf16, #tpu.memory_space<vmem>>, vector<4x384xbf16>
    tpu.vector_store %arg9[%c24_145, %c0_146], %160 {strides = array<i32>} : memref<500x384xbf16, #tpu.memory_space<vmem>>, vector<4x384xbf16>,
    %c0_147 = arith.constant 0 : index
    %c148_148 = arith.constant 148 : index
    %162 = vector.load %arg11[%c0_147, %c148_148] : memref<4x640xbf16, #tpu.memory_space<vmem>>, vector<4x384xbf16>
    %c28_149 = arith.constant 28 : index
    %c0_150 = arith.constant 0 : index
    %163 = vector.load %arg9[%c28_149, %c0_150] : memref<500x384xbf16, #tpu.memory_space<vmem>>, vector<4x384xbf16>
    tpu.vector_store %arg9[%c28_149, %c0_150], %162 {strides = array<i32>} : memref<500x384xbf16, #tpu.memory_space<vmem>>, vector<4x384xbf16>,
    %c0_151 = arith.constant 0 : index
    %c149_152 = arith.constant 149 : index
    %164 = vector.load %arg11[%c0_151, %c149_152] : memref<4x640xbf16, #tpu.memory_space<vmem>>, vector<4x384xbf16>
    %c32_153 = arith.constant 32 : index
    %c0_154 = arith.constant 0 : index
    %165 = vector.load %arg9[%c32_153, %c0_154] : memref<500x384xbf16, #tpu.memory_space<vmem>>, vector<4x384xbf16>
    tpu.vector_store %arg9[%c32_153, %c0_154], %164 {strides = array<i32>} : memref<500x384xbf16, #tpu.memory_space<vmem>>, vector<4x384xbf16>,
    %c0_155 = arith.constant 0 : index
    %c0_156 = arith.constant 0 : index
    %166 = vector.load %arg6[%c0_155, %c0_156] : memref<4x36xbf16, #tpu.memory_space<vmem>>, vector<4x36xbf16>
    %c0_157 = arith.constant 0 : index
    %c0_158 = arith.constant 0 : index
    %167 = vector.load %arg9[%c0_157, %c0_158] : memref<500x384xbf16, #tpu.memory_space<vmem>>, vector<36x384xbf16>
    %cst_159 = arith.constant dense<0.000000e+00> : vector<4x384xf32>
    %168 = tpu.matmul %166, %167, %cst_159 {dimension_numbers = #tpu.dot_dimension_numbers<[1], [0], [0], [1], [0, 0, 1, 1], [], []>} : vector<4x36xbf16>, vector<36x384xbf16>, vector<4x384xf32> -> vector<4x384xf32>
    %c0_160 = arith.constant 0 : index
    %c0_161 = arith.constant 0 : index
    %169 = vector.load %arg7[%c0_160, %c0_161] : memref<4x1xf32, #tpu.memory_space<vmem>>, vector<4x1xf32>
    %170 = vector.broadcast %169 : vector<4x1xf32> to vector<4x384xf32>
    %171 = arith.addf %168, %170 : vector<4x384xf32>
    %cst_162 = arith.constant 5.000000e-01 : f32
    %172 = vector.broadcast %cst_162 : f32 to vector<4x384xf32>
    %173 = arith.mulf %172, %171 : vector<4x384xf32>
    %cst_163 = arith.constant 4.471500e-02 : f32
    %174 = vector.broadcast %cst_163 : f32 to vector<4x384xf32>
    %175 = arith.mulf %174, %171 : vector<4x384xf32>
    %176 = arith.mulf %175, %171 : vector<4x384xf32>
    %177 = arith.mulf %176, %171 : vector<4x384xf32>
    %178 = arith.addf %171, %177 : vector<4x384xf32>
    %cst_164 = arith.constant 0.797884583 : f32
    %179 = vector.broadcast %cst_164 : f32 to vector<4x384xf32>
    %180 = arith.mulf %179, %178 : vector<4x384xf32>
    %181 = math.tanh %180 : vector<4x384xf32>
    %cst_165 = arith.constant 1.000000e+00 : f32
    %182 = vector.broadcast %cst_165 : f32 to vector<4x384xf32>
    %183 = arith.addf %182, %181 : vector<4x384xf32>
    %184 = arith.mulf %173, %183 : vector<4x384xf32>
    %c0_166 = arith.constant 0 : index
    %c0_167 = arith.constant 0 : index
    %c128_168 = arith.constant 128 : index
    %185 = vector.load %arg1[%c0_166, %c0_167, %c128_168] : memref<1x4x640xf32, #tpu.memory_space<vmem>>, vector<1x4x384xf32>
    %186 = vector.shape_cast %185 : vector<1x4x384xf32> to vector<4x384xf32>
    %cst_169 = arith.constant 5.000000e-02 : f32
    %187 = vector.broadcast %cst_169 : f32 to vector<4x384xf32>
    %188 = arith.mulf %187, %184 : vector<4x384xf32>
    %189 = arith.addf %186, %188 : vector<4x384xf32>
    %c0_170 = arith.constant 0 : index
    %c0_171 = arith.constant 0 : index
    %c0_172 = arith.constant 0 : index
    %190 = vector.load %arg8[%c0_170, %c0_171, %c0_172] : memref<1x4x384xf32, #tpu.memory_space<vmem>>, vector<1x4x384xf32>
    %191 = vector.shape_cast %190 : vector<1x4x384xf32> to vector<4x384xf32>
    %192 = vector.shape_cast %189 : vector<4x384xf32> to vector<1x4x384xf32>
    tpu.vector_store %arg8[%c0_170, %c0_171, %c0_172], %192 {strides = array<i32>} : memref<1x4x384xf32, #tpu.memory_space<vmem>>, vector<1x4x384xf32>,
    return
  }
  func.func @transform_0(%arg0: i32) -> (i32, i32, i32) {
    %c0_i32 = arith.constant 0 : i32
    %c0_i32_0 = arith.constant 0 : i32
    %c0_i32_1 = arith.constant 0 : i32
    return %arg0, %c0_i32, %c0_i32_0 : i32, i32, i32
  }
  func.func @transform_1(%arg0: i32) -> (i32, i32) {
    %c0_i32 = arith.constant 0 : i32
    %c0_i32_0 = arith.constant 0 : i32
    %c0_i32_1 = arith.constant 0 : i32
    return %c0_i32, %c0_i32_0 : i32, i32
  }
  func.func @transform_2(%arg0: i32) -> (i32, i32) {
    %c0_i32 = arith.constant 0 : i32
    %c0_i32_0 = arith.constant 0 : i32
    %c0_i32_1 = arith.constant 0 : i32
    return %c0_i32, %c0_i32_0 : i32, i32
  }
  func.func @transform_3(%arg0: i32) -> (i32, i32) {
    %c0_i32 = arith.constant 0 : i32
    %c0_i32_0 = arith.constant 0 : i32
    %c0_i32_1 = arith.constant 0 : i32
    return %c0_i32, %c0_i32_0 : i32, i32
  }
  func.func @transform_4(%arg0: i32) -> (i32, i32) {
    %c0_i32 = arith.constant 0 : i32
    %c0_i32_0 = arith.constant 0 : i32
    %c0_i32_1 = arith.constant 0 : i32
    return %c0_i32, %c0_i32_0 : i32, i32
  }
  func.func @transform_5(%arg0: i32) -> (i32, i32) {
    %c0_i32 = arith.constant 0 : i32
    %c0_i32_0 = arith.constant 0 : i32
    %c0_i32_1 = arith.constant 0 : i32
    return %c0_i32, %c0_i32_0 : i32, i32
  }
  func.func @transform_6(%arg0: i32) -> (i32, i32) {
    %c0_i32 = arith.constant 0 : i32
    %c0_i32_0 = arith.constant 0 : i32
    %c0_i32_1 = arith.constant 0 : i32
    return %c0_i32, %c0_i32_0 : i32, i32
  }
  func.func @transform_7(%arg0: i32) -> (i32, i32, i32) {
    %c0_i32 = arith.constant 0 : i32
    %c0_i32_0 = arith.constant 0 : i32
    %c0_i32_1 = arith.constant 0 : i32
    return %arg0, %c0_i32, %c0_i32_0 : i32, i32, i32
  }
}

</mosaic_0001>

<bundles_post_ra>
// kernel: conv_res_block.1
= control target key start
LH: loop header
LB: loop body
LE: loop exit
PB: predicated region body
PF: predicated region fallthrough
CT: control target
= control target key end

     0   :  { %s4240_s24 = smov 0   ;;  %s5532_s0 = inlined_call_operand.vmem [shape: f32[2,4,640], index: 0, kind: input, shape index: {}]   ;;  %s5533_s1 = inlined_call_operand.vmem [shape: bf16[20,36], index: 1, kind: input, shape index: {}]   ;;  %s5534_s2 = inlined_call_operand.vmem [shape: f32[20,1], index: 2, kind: input, shape index: {}]   ;;  %s5535_s3 = inlined_call_operand.vmem [shape: bf16[4,500], index: 3, kind: input, shape index: {}]   ;;  %s5536_s4 = inlined_call_operand.vmem [shape: f32[4,1], index: 4, kind: input, shape index: {}]   ;;  %s5537_s5 = inlined_call_operand.vmem [shape: bf16[4,36], index: 5, kind: input, shape index: {}]   ;;  %s5538_s6 = inlined_call_operand.vmem [shape: f32[4,1], index: 6, kind: input, shape index: {}]   ;;  %s5539_s7 = inlined_call_operand.vmem [shape: f32[2,4,384], index: 7, kind: output, shape index: {}]  }
   0x1 LB: > { %s3548_s25 = sadd.s32 4294967295, %s4173_s24   ;;  %p3552_p0 = scmp.ge.s32.totalorder %s4173_s24, 1  ;;  %s4173_s24 = sphi %s4240_s24, %s17_s24  }
   0x2   : > { %p237_p1 = scmp.lt.s32.totalorder %s4173_s24, 3 }
   0x4   : > { %p238_p2 = pnand %p3552_p0, %p237_p1 }
   0x6   : > { %241 = sbr.rel (%p238_p2) target bundleno = 1550 (0x60e), region = 48 }
   0xb   : > { %v638_v0 = vld [vmem:[%s5534_s2] sm:$0xff]  ;;  %v639_v1 = vld [vmem:[%s5534_s2 + $0x8] sm:$0xff]  ;;  %p269_p3 = scmp.lt.s32.totalorder %s3548_s25, 1  ;;  %v4175_v2 = vmov 0   ;;  %v640_v6 = vld [vmem:[%s5534_s2 + $0x10] sm:$0xf] }
   0xc   : > { %4136 = vset.pattern.permute.xlu0 %v4175_v2  ;;  %855 = vst [vmem:[#allocation3] sm:$0xf] %v4175_v2  ;;  %4134 = vset.pattern.permute.xlu1 %v4175_v2  ;;  %vm5563_vm0 = vcmask 1041408   ;;  %vm5559_vm1 = vcmask 1045508   ;;  %vm434_vm2 = vcmask 1043456   ;;  %s5550_s13 = smov 21  }
   0xd   : > { %856 = vst [vmem:[#allocation3 + $0x14] sm:$0xf] %v4175_v2  ;;  %643 = vperm.xlu0 %4136, %v638_v0   ;;  %648 = vperm.xlu1 %4134, %v639_v1   ;;  %s5702_s25 = smov (!%p269_p3, %s3548_s25), 1  ;;  %s5546_s14 = smov 20   ;;  %vm5562_vm3 = vcmask 171008   ;;  %vm5543_vm4 = vcmask 7168  }
   0xe   : > { %857 = vst [vmem:[#allocation3 + $0x28] sm:$0x3] %v4175_v2  ;;  %4135 = vset.pattern.permute.xlu2 %v4175_v2  ;;  %s4099_s30 = smul.u32 20, %s5702_s25  ;;  %s4178_s15 = smov 19   ;;  %vm5542_vm5 = vcmask 162816   ;;  %vm5577_vm6 = vcmask 154624  }
   0xf   : > { %858 = vst [vmem:[#allocation3 + $0x10] sm:$0xf] %v4175_v2  ;;  %653 = vperm.xlu2 %4135, %v640_v6   ;;  %s4179_s16 = smov 1   ;;  %s5544_s17 = smov 127   ;;  %vm5570_vm7 = vcmask 883712   ;;  %vm5541_vm8 = vcmask 1039360  }
  0x10   : > { %859 = vst [vmem:[#allocation3 + $0x24] sm:$0xf] %v4175_v2  ;;  %s4269_s10 = scalar_lea.vmem %s5532_s0, %s4099_s30  ;;  %s4181_s18 = smov 109   ;;  %vm5573_vm9 = vcmask 891904   ;;  %vm618_vm10 = vcmask 875520   ;;  %vm5540_vm11 = vcmask 293888  }
  0x11   : > { %860 = vst [vmem:[#allocation3 + $0x38] sm:$0x3] %v4175_v2  ;;  %v395_v3 = vld [vmem:[%s4269_s10] sm:$0xff]  ;;  %v396_v4 = vld [vmem:[%s4269_s10 + $0x8] sm:$0xff]  ;;  %v397_v5 = vld [vmem:[%s4269_s10 + $0x10] sm:$0xf] }
  0x12   : > { %401 = vst [vmem:[#allocation1] ss:$2 sm:$0xff] %v395_v3  ;;  %s4182_s19 = smov 108   ;;  %s5575_s20 = smov 107  }
  0x13   : > { %403 = vst [vmem:[#allocation1 + $0x10] ss:$2 sm:$0xff] %v396_v4  ;;  %s5568_s27 = smov 86   ;;  %s4185_s28 = smov 38  }
  0x14   : > { %405 = vst [vmem:[#allocation1 + $0x20] ss:$2 sm:$0xff] %v397_v5  ;;  %s4186_s29 = smov 90   ;;  %s4187_s30 = smov 40  }
  0x15   : > { %s4188_s8 = smov 39   ;;  %s4189_s9 = smov 2  }
  0x16   : > { %s4190_s11 = smov 88   ;;  %s4191_s12 = smov 87  }
  0x17   : > { %s4192_s21 = smov 41   ;;  %s5552_s22 = smov 42  }
  0x18   : > { %s5548_s23 = smov 89   ;;  %s5574_s26 = smov 18  }
  0x19   : > { %v406_v7 = vld.sshfl [vmem:[#allocation1] sm:$0xff pattern:$0x75316420]  ;;  %v407_v8 = vld.sshfl [vmem:[#allocation1 + $0x8] sm:$0xff pattern:$0x75316420] }
  0x1a   : > { %v408_v9 = vld.sshfl [vmem:[#allocation1 + $0x10] sm:$0xff pattern:$0x75316420]  ;;  %v409_v10 = vld.sshfl [vmem:[#allocation1 + $0x18] sm:$0xff pattern:$0x75316420]  ;;  %v416_v11 = vpack.c.bf16 %v407_v8, %v406_v7 }
  0x1b   : > { %v417_v12 = vpack.c.bf16 %v409_v10, %v408_v9  ;;  %v410_v14 = vld.sshfl [vmem:[#allocation1 + $0x20] sm:$0xff pattern:$0x75316420] }
  0x1c   : > { %v422_v13 = vrot.slane %v416_v11, 2  ;;  %v418_v17 = vpack.c.bf16 %v410_v14, %v410_v14 }
  0x1d   : > { %v423_v15 = vrot.slane %v417_v12, 4  ;;  %v424_v16 = vrot.slane %v417_v12, 6 }
  0x1e   : > { %v429_v18 = vsel %vm5563_vm0, %v416_v11, %v422_v13  ;;  %v425_v20 = vrot.slane %v418_v17, 2 }
  0x1f   : > { %v433_v19 = vsel %vm5559_vm1, %v423_v15, %v424_v16 }
  0x20   : > { %v435_v21 = vsel %vm434_vm2, %v429_v18, %v433_v19  ;;  %v438_v22 = vsel %vm5563_vm0, %v418_v17, %v425_v20 }
  0x21   : > { %441 = vst [vmem:[#allocation4] sm:$0xff] %v435_v21 }
  0x22   : > { %445 = vst [vmem:[#allocation1] ss:$2 sm:$0xff] %v435_v21 }
  0x23   : > { %442 = vst [vmem:[#allocation4 + $0x8] sm:$0x3] %v438_v22 }
  0x28   : > { %v530_v29 = vld [vmem:[#allocation4 + $0x2] sm:$0x3f] }
  0x29   : > { %v446_v23 = vld.sshfl [vmem:[#allocation1] sm:$0xff pattern:$0x75643120]  ;;  %v448_v24 = vld.sshfl [vmem:[#allocation1 + $0x8] sm:$0xff pattern:$0x75643120] }
  0x2a   : > { %450 = vrot.lane.b32.xlu0 %v446_v23, %s5550_s13  ;;  %468 = vst [vmem:[#allocation1 + $0x1] ss:$2 sm:$0xff] %v435_v21  ;;  %452 = vrot.lane.b32.xlu2 %v448_v24, %s5550_s13  ;;  %v539_v32 = vld [vmem:[#allocation4 + $0x2] sm:$0xff] }
  0x31   : > { %v471_v25 = vld.sshfl [vmem:[#allocation1 + $0x8] sm:$0xff pattern:$0x75643120]  ;;  %v469_v26 = vld.sshfl [vmem:[#allocation1] sm:$0xff pattern:$0x75643120] }
  0x32   : > { %475 = vrot.lane.b32.xlu0 %v471_v25, %s5546_s14  ;;  %473 = vrot.lane.b32.xlu1 %v469_v26, %s5546_s14  ;;  %489 = vst [vmem:[#allocation1] ss:$2 sm:$0xff] %v435_v21  ;;  %s4197_s14 = smov 22  }
  0x39   : > { %v492_v27 = vld.sshfl [vmem:[#allocation1 + $0x8] sm:$0xff pattern:$0x75643120]  ;;  %v490_v28 = vld.sshfl [vmem:[#allocation1] sm:$0xff pattern:$0x75643120] }
  0x3a   : > { %496 = vrot.lane.b32.xlu1 %v492_v27, %s4178_s15  ;;  %511 = vst [vmem:[#allocation1 + $0x1] ss:$2 sm:$0xff] %v435_v21  ;;  %494 = vrot.lane.b32.xlu2 %v490_v28, %s4178_s15 }
  0x41   : > { %v512_v30 = vld.sshfl [vmem:[#allocation1] sm:$0xff pattern:$0x75643120]  ;;  %v514_v31 = vld.sshfl [vmem:[#allocation1 + $0x8] sm:$0xff pattern:$0x75643120] }
  0x42   : > { %516 = vrot.lane.b32.xlu0 %v512_v30, %s4179_s16  ;;  %532 = vst [vmem:[#allocation1] ss:$2 sm:$0xff] %v530_v29  ;;  %518 = vrot.lane.b32.xlu2 %v514_v31, %s4179_s16 }
  0x49   : > { %v533_v33 = vld.sshfl [vmem:[#allocation1] sm:$0xff pattern:$0x75643120]  ;;  %v534_v34 = vld.sshfl [vmem:[#allocation1 + $0x8] sm:$0xff pattern:$0x75643120] }
  0x4a   : > { %542 = vst [vmem:[#allocation1 + $0x1] ss:$2 sm:$0xff] %v539_v32 }
  0x4b   : > { %537 = vst [vmem:[#allocation2 + $0x18] sm:$0x33] %v533_v33 }
  0x4c   : > { %538 = vst [vmem:[#allocation2 + $0x20] sm:$0x3] %v534_v34 }
  0x51   : > { %v545_v35 = vld.sshfl [vmem:[#allocation1 + $0x8] sm:$0xff pattern:$0x75643120]  ;;  %v543_v36 = vld.sshfl [vmem:[#allocation1] sm:$0xff pattern:$0x75643120] }
  0x52   : > { %549 = vrot.lane.b32.xlu1 %v545_v35, %s5544_s17  ;;  %563 = vst [vmem:[#allocation1] ss:$2 sm:$0xff] %v539_v32  ;;  %547 = vrot.lane.b32.xlu0 %v543_v36, %s5544_s17  ;;  %s4196_s17 = smov 126  }
  0x59   : > { %v566_v37 = vld.sshfl [vmem:[#allocation1 + $0x8] sm:$0xff pattern:$0x75643120]  ;;  %v564_v38 = vld.sshfl [vmem:[#allocation1] sm:$0xff pattern:$0x75643120] }
  0x5a   : > { %570 = vrot.lane.b32.xlu1 %v566_v37, %s4181_s18  ;;  %585 = vst [vmem:[#allocation1 + $0x1] ss:$2 sm:$0xff] %v539_v32 }
  0x61   : > { %v586_v39 = vld.sshfl [vmem:[#allocation1] sm:$0xff pattern:$0x75643120]  ;;  %v588_v40 = vld.sshfl [vmem:[#allocation1 + $0x8] sm:$0xff pattern:$0x75643120] }
  0x62   : > { %568 = vrot.lane.b32.xlu1 %v564_v38, %s4181_s18  ;;  %606 = vst [vmem:[#allocation1] ss:$2 sm:$0xff] %v539_v32  ;;  %592 = vrot.lane.b32.xlu2 %v588_v40, %s4182_s19 }
  0x69   : > { %v609_v41 = vld.sshfl [vmem:[#allocation1 + $0x8] sm:$0xff pattern:$0x75643120]  ;;  %v607_v42 = vld.sshfl [vmem:[#allocation1] sm:$0xff pattern:$0x75643120]  ;;  %v4297_v43 = vpop.permute.xlu2 %653 }
  0x6a   : > { %613 = vrot.lane.b32.xlu0 %v609_v41, %s5575_s20  ;;  %590 = vrot.lane.b32.xlu2 %v586_v39, %s4182_s19 }
  0x72   : > { %611 = vrot.lane.b32.xlu0 %v607_v42, %s5575_s20 }
  0x7f   : > { %v4300_v47 = vpop.permute.xlu0 %643  ;;  %v4302_v49 = vpop.permute.xlu1 %648 }
  0x84   : > { %v453_v44 = vpop.permute.xlu2 %452 }
  0x85   : > { %v455_v45 = vrot.slane %v453_v44, 4 }
  0x87   : > { %v460_v46 = vsel %vm5562_vm3, %v453_v44, %v455_v45 }
  0x88   : > { %464 = vst [vmem:[#allocation2 + $0x8] sm:$0x3] %v460_v46 }
  0x94   : > { %v495_v48 = vpop.permute.xlu2 %494 }
  0x95   : > { %v498_v0 = vrot.slane %v495_v48, 4 }
  0x9c   : > { %v451_v50 = vpop.permute.xlu0 %450  ;;  %v519_v51 = vpop.permute.xlu2 %518 }
  0x9d   : > { %v454_v52 = vrot.slane %v451_v50, 4  ;;  %v521_v53 = vrot.slane %v519_v51, 4 }
  0x9f   : > { %v457_v54 = vsel %vm434_vm2, %v454_v52, %v455_v45  ;;  %v525_v55 = vsel %vm5543_vm4, %v519_v51, %v521_v53 }
  0xa0   : > { %v459_v56 = vsel %vm5562_vm3, %v451_v50, %v457_v54  ;;  %529 = vst [vmem:[#allocation2 + $0x14] sm:$0xc] %v525_v55 }
  0xa1   : > { %463 = vst [vmem:[#allocation2] sm:$0x33] %v459_v56 }
  0xa4   : > { %v476_v57 = vpop.permute.xlu0 %475  ;;  %v474_v58 = vpop.permute.xlu1 %473 }
  0xa5   : > { %v478_v59 = vrot.slane %v476_v57, 4  ;;  %v477_v60 = vrot.slane %v474_v58, 4 }
  0xa7   : > { %v482_v61 = vsel %vm5542_vm5, %v476_v57, %v478_v59  ;;  %v479_v62 = vsel %vm434_vm2, %v477_v60, %v478_v59  ;;  %v3993_v57 = vld [vmem:[%s5533_s1] sm:$0xff] }
  0xa8   : > { %486 = vst [vmem:[#allocation2 + $0x8] sm:$0xc] %v482_v61  ;;  %v481_v63 = vsel %vm5542_vm5, %v474_v58, %v479_v62 }
  0xa9   : > { %485 = vst [vmem:[#allocation2] sm:$0xcc] %v481_v63 }
  0xac   : > { %v497_v1 = vpop.permute.xlu1 %496 }
  0xad   : > { %v499_v3 = vrot.slane %v497_v1, 4 }
  0xaf   : > { %v500_v4 = vsel %vm434_vm2, %v498_v0, %v499_v3  ;;  %v503_v5 = vsel %vm5577_vm6, %v497_v1, %v499_v3 }
  0xb0   : > { %v502_v6 = vsel %vm5577_vm6, %v495_v48, %v500_v4  ;;  %507 = vst [vmem:[#allocation2 + $0x14] sm:$0x3] %v503_v5  ;;  %v3569_v48 = vld [vmem:[#allocation2 + $0x8] sm:$0xf]  ;;  %v3561_v3 = vld [vmem:[#allocation2] sm:$0xf] }
  0xb1   : > { %506 = vst [vmem:[#allocation2 + $0xc] sm:$0x33] %v502_v6  ;;  %v3994_v5 = vld [vmem:[#allocation2 + $0x4] sm:$0xf] }
  0xb4   : > { %v517_v7 = vpop.permute.xlu0 %516 }
  0xb5   : > { %v520_v8 = vrot.slane %v517_v7, 4 }
  0xb7   : > { %v522_v9 = vsel %vm434_vm2, %v520_v8, %v521_v53  ;;  %v3996_v50 = vld [vmem:[#allocation2 + $0x10] sm:$0xf0] }
  0xb8   : > { %v524_v10 = vsel %vm5543_vm4, %v517_v7, %v522_v9  ;;  %v3570_v54 = vor.u32 %v3996_v50, %v3569_v48  ;;  %v627_v9 = vld [vmem:[%s5533_s1 + $0x8] sm:$0x3] }
  0xb9   : > { %528 = vst [vmem:[#allocation2 + $0xc] sm:$0xcc] %v524_v10  ;;  %v661_v10 = vunpack.c.l.b16 %v627_v9 }
  0xbc   : > { %v593_v11 = vpop.permute.xlu2 %592 }
  0xbd   : > { %v595_v12 = vrot.slane %v593_v11, 4 }
  0xbf   : > { %v599_v13 = vsel %vm5570_vm7, %v593_v11, %v595_v12  ;;  %v663_v11 = vpack.c.b16 %v661_v10, %v661_v10 }
  0xc0   : > { %603 = vst [vmem:[#allocation2 + $0x2c] sm:$0xc] %v599_v13  ;;  %v3995_v4 = vld [vmem:[#allocation2 + $0x8] sm:$0xf0]  ;;  %v3563_v6 = vld [vmem:[#allocation2 + $0xc] sm:$0xf0] }
  0xc1   : > { %v3562_v7 = vor.u32 %v3995_v4, %v3561_v3  ;;  %v3566_v8 = vor.u32 %v3994_v5, %v3563_v6 }
  0xc4   : > { %v550_v14 = vpop.permute.xlu1 %549  ;;  %v548_v15 = vpop.permute.xlu0 %547 }
  0xc5   : > { %v552_v16 = vrot.slane %v550_v14, 4  ;;  %v551_v17 = vrot.slane %v548_v15, 4  ;;  %v591_v18 = vpop.permute.xlu2 %590 }
  0xc6   : > { %v594_v19 = vrot.slane %v591_v18, 4 }
  0xc7   : > { %v556_v20 = vsel %vm5541_vm8, %v550_v14, %v552_v16  ;;  %v553_v21 = vsel %vm434_vm2, %v551_v17, %v552_v16 }
  0xc8   : > { %560 = vst [vmem:[#allocation2 + $0x20] sm:$0xc] %v556_v20  ;;  %v555_v22 = vsel %vm5541_vm8, %v548_v15, %v553_v21  ;;  %v596_v23 = vsel %vm434_vm2, %v594_v19, %v595_v12  ;;  %v280_v12 = vlaneseq }
  0xc9   : > { %559 = vst [vmem:[#allocation2 + $0x18] sm:$0xcc] %v555_v22  ;;  %v598_v24 = vsel %vm5570_vm7, %v591_v18, %v596_v23 }
  0xca   : > { %602 = vst [vmem:[#allocation2 + $0x24] sm:$0xcc] %v598_v24  ;;  %v4342_v13 = vand.u32 127, %v280_v12 }
  0xcc   : > { %v571_v25 = vpop.permute.xlu1 %570  ;;  %v4345_v14 = vadd.s32 256, %v4342_v13  ;;  %v4350_v18 = vadd.s32 128, %v4342_v13  ;;  %v287_v22 = vand.u32 65535, %v4342_v13  ;;  %v288_v24 = vshrl.u32 %v4342_v13, 16 }
  0xcd   : > { %v573_v26 = vrot.slane %v571_v25, 4 }
  0xce   : > { %v345_v15 = vand.u32 65535, %v4345_v14  ;;  %v346_v16 = vshrl.u32 %v4345_v14, 16  ;;  %v316_v23 = vand.u32 65535, %v4350_v18 }
  0xcf   : > { %v577_v27 = vsel %vm5573_vm9, %v571_v25, %v573_v26  ;;  %v3581_v44 = vld [vmem:[#allocation2 + $0x20] sm:$0xf]  ;;  %v291_v25 = vmul.u32 52428, %v287_v22 }
  0xd0   : > { %581 = vst [vmem:[#allocation2 + $0x2c] sm:$0x3] %v577_v27  ;;  %v3573_v62 = vld [vmem:[#allocation2 + $0x18] sm:$0xf]  ;;  %v3997_v63 = vld [vmem:[#allocation2 + $0x1c] sm:$0xf] }
  0xd1   : > { %v349_v17 = vmul.u32 52428, %v345_v15  ;;  %v348_v19 = vmul.u32 52429, %v345_v15  ;;  %v350_v20 = vmul.u32 52429, %v346_v16  ;;  %v320_v27 = vmul.u32 52428, %v316_v23 }
  0xd3   : > { %v352_v21 = vshll.u32 %v349_v17, 16 }
  0xd4   : > { %v569_v28 = vpop.permute.xlu1 %568 }
  0xd5   : > { %v572_v29 = vrot.slane %v569_v28, 4  ;;  %vm356_vm12 = vc.u32 %v348_v19, %v352_v21 }
  0xd7   : > { %v574_v30 = vsel %vm434_vm2, %v572_v29, %v573_v26  ;;  %v3999_v45 = vld [vmem:[#allocation2 + $0x28] sm:$0xf0]  ;;  %v317_v26 = vshrl.u32 %v4350_v18, 16  ;;  %v358_v29 = vadd.s32 %v352_v21, %v348_v19 }
  0xd8   : > { %v576_v31 = vsel %vm5573_vm9, %v569_v28, %v574_v30  ;;  %v3582_v46 = vor.u32 %v3999_v45, %v3581_v44  ;;  %v354_v28 = vshll.u32 %v350_v20, 16  ;;  %v290_v30 = vmul.u32 52429, %v287_v22 }
  0xd9   : > { %580 = vst [vmem:[#allocation2 + $0x24] sm:$0x33] %v576_v31  ;;  %v292_v31 = vmul.u32 52429, %v288_v24  ;;  %v322_v45 = vmul.u32 52428, %v317_v26 }
  0xda   : > { %vm360_vm15 = vc.u32 %v358_v29, %v354_v28 }
  0xdb   : > { %v361_v50 = vsel %vm360_vm15, 1, %v4175_v2 }
  0xdc   : > { %v614_v32 = vpop.permute.xlu0 %613 }
  0xdd   : > { %v616_v33 = vrot.slane %v614_v32, 4 }
  0xdf   : > { %v620_v34 = vsel %vm618_vm10, %v614_v32, %v616_v33  ;;  %v294_v32 = vshll.u32 %v291_v25, 16 }
  0xe0   : > { %624 = vst [vmem:[#allocation2 + $0x38] sm:$0x3] %v620_v34  ;;  %v3998_v60 = vld [vmem:[#allocation2 + $0x20] sm:$0xf0]  ;;  %v3575_v61 = vld [vmem:[#allocation2 + $0x24] sm:$0xf0] }
  0xe1   : > { %v3574_v0 = vor.u32 %v3998_v60, %v3573_v62  ;;  %v3578_v1 = vor.u32 %v3997_v63, %v3575_v61  ;;  %v321_v34 = vmul.u32 52429, %v317_v26  ;;  %vm298_vm13 = vc.u32 %v290_v30, %v294_v32 }
  0xe2   : > { %v299_v44 = vsel %vm298_vm13, 1, %v4175_v2  ;;  %v355_v61 = vshrl.u32 %v350_v20, 16  ;;  %v297_v63 = vshrl.u32 %v292_v31, 16 }
  0xe4   : > { %v612_v35 = vpop.permute.xlu0 %611 }
  0xe5   : > { %v615_v36 = vrot.slane %v612_v35, 4 }
  0xe7   : > { %v617_v37 = vsel %vm434_vm2, %v615_v36, %v616_v33  ;;  %v637_v38 = vld [vmem:[#allocation2 + $0x38] sm:$0x3]  ;;  %v319_v33 = vmul.u32 52429, %v316_v23  ;;  %v351_v36 = vmul.u32 52428, %v346_v16 }
  0xe8   : > { %v619_v39 = vsel %vm618_vm10, %v612_v35, %v617_v37  ;;  %v688_v40 = vunpack.c.l.b16 %v637_v38  ;;  %v323_v35 = vshll.u32 %v320_v27, 16  ;;  %v296_v37 = vshll.u32 %v292_v31, 16 }
  0xe9   : > { %623 = vst [vmem:[#allocation2 + $0x30] sm:$0x33] %v619_v39  ;;  %v300_v38 = vadd.s32 %v294_v32, %v290_v30  ;;  %v357_v39 = vsel %vm356_vm12, 1, %v4175_v2 }
  0xea   : > { %v697_v41 = vpack.c.b16 %v688_v40, %v688_v40  ;;  %v325_v40 = vshll.u32 %v321_v34, 16  ;;  %vm327_vm14 = vc.u32 %v319_v33, %v323_v35 }
  0xeb   : > { %v328_v48 = vsel %vm327_vm14, 1, %v4175_v2 }
  0xec   : > { %v718_v42 = vsel %vm5563_vm0, %v697_v41, 0  ;;  %v293_v41 = vmul.u32 52428, %v288_v24 }
  0xed   : > { %761 = vmatpush.bf16.msra.mxu2 %v718_v42  ;;  %v329_v42 = vadd.s32 %v323_v35, %v319_v33 }
  0xef   : > { %vm331_vm8 = vc.u32 %v329_v42, %v325_v40 }
  0xf0   : > { %v636_v51 = vld [vmem:[#allocation2 + $0x30] sm:$0x33] }
  0xf1   : > { %762 = vmatpush.bf16.msra.mxu2 %v3582_v46  ;;  %v686_v52 = vunpack.c.l.b16 %v636_v51  ;;  %v687_v53 = vunpack.c.h.b16 %v636_v51  ;;  %v359_v46 = vadd.s32 %v357_v39, %v351_v36  ;;  %v301_v51 = vadd.s32 %v299_v44, %v293_v41 }
  0xf3   : > { %v695_v55 = vpack.c.b16 %v686_v52, %v686_v52  ;;  %v696_v56 = vpack.c.b16 %v687_v53, %v687_v53  ;;  %v330_v53 = vadd.s32 %v328_v48, %v322_v45 }
  0xf5   : > { %763 = vmatpush.bf16.msra.mxu2 %v3570_v54  ;;  %v712_v58 = vsel %vm5563_vm0, %v695_v55, 0  ;;  %v715_v59 = vsel %vm5563_vm0, %v696_v56, 0  ;;  %v353_v54 = vshrl.u32 %v349_v17, 16  ;;  %v363_v55 = vadd.s32 %v361_v50, %v359_v46 }
  0xf6   : > { %725 = vmatpush.bf16.msra.mxu0 %v712_v58  ;;  %743 = vmatpush.bf16.msra.mxu1 %v715_v59  ;;  %v332_v56 = vsel %vm331_vm8, 1, %v4175_v2  ;;  %v324_v59 = vshrl.u32 %v320_v27, 16 }
  0xf7   : > { %v334_v60 = vadd.s32 %v332_v56, %v330_v53  ;;  %v364_v62 = vadd.s32 %v363_v55, %v353_v54 }
  0xf8   : > { %3587 = vmatmul.msk.bf16.vlgmr.msra.gmra.mxu2 %vm5540_vm11, %v3993_v57 }
  0xf9   : > { %v335_v3 = vadd.s32 %v334_v60, %v324_v59  ;;  %v365_v4 = vadd.s32 %v364_v62, %v355_v61 }
  0xfa   : > { %726 = vmatpush.bf16.msra.mxu0 %v3574_v0  ;;  %744 = vmatpush.bf16.msra.mxu1 %v3578_v1  ;;  %v326_v1 = vshrl.u32 %v321_v34, 16 }
  0xfc   : > { %v336_v6 = vadd.s32 %v335_v3, %v326_v1 }
  0xfe   : > { %727 = vmatpush.bf16.msra.mxu0 %v3562_v7  ;;  %745 = vmatpush.bf16.msra.mxu1 %v3566_v8  ;;  %v366_v7 = vshrl.u32 %v365_v4, 4  ;;  %v337_v9 = vshrl.u32 %v336_v6, 4 }
 0x100   : > { %v367_v10 = vmul.u32 20, %v366_v7  ;;  %v338_v15 = vmul.u32 20, %v337_v9 }
 0x101   : > { %3583 = vmatmul.msk.bf16.vlgmr.msra.gmra.mxu0 %vm5540_vm11, %v3993_v57  ;;  %3585 = vmatmul.msk.bf16.vlgmr.msra.gmra.mxu1 %vm5540_vm11, %v3993_v57  ;;  %v295_v57 = vshrl.u32 %v291_v25, 16 }
 0x102   : > { %v368_v16 = vsub.s32 %v4345_v14, %v367_v10  ;;  %v339_v26 = vsub.s32 %v4350_v18, %v338_v15 }
 0x104   : > { %vm373_vm8 = vcmp.ne.s32.totalorder %v368_v16, 0  ;;  %v382_v29 = vadd.s32 20, %v368_v16  ;;  %vm372_vm14 = vcmp.ne.s32.totalorder %v339_v26, 0  ;;  %vm375_vm15 = vcmp.lt.s32.totalorder %v339_v26, 0 }
 0x108   : > { %3588 = vmatmul.msk.bf16.gmra.mxu2 %vm5540_vm11, %v663_v11 }
 0x111   : > { %3584 = vmatmul.msk.bf16.gmra.mxu0 %vm5540_vm11, %v663_v11  ;;  %3586 = vmatmul.msk.bf16.gmra.mxu1 %vm5540_vm11, %v663_v11  ;;  %vm302_vm11 = vc.u32 %v300_v38, %v296_v37  ;;  %v381_v37 = vadd.s32 20, %v339_v26 }
 0x112   : > { %v303_v52 = vsel %vm302_vm11, 1, %v4175_v2  ;;  %vm376_vm11 = vcmp.lt.s32.totalorder %v368_v16, 0 }
 0x113   : > { %v305_v58 = vadd.s32 %v303_v52, %v301_v51  ;;  %vm4388_vm5 = vmand %vm376_vm11, %vm373_vm8 }
 0x114   : > { %vm4407_vm8 = vmand %vm375_vm15, %vm372_vm14  ;;  %v385_v51 = vsel %vm4388_vm5, %v382_v29, %v368_v16  ;;  %vm1040_vm15 = vcmask 326656  }
 0x115   : > { %v306_v0 = vadd.s32 %v305_v58, %v295_v57  ;;  %v384_v57 = vsel %vm4407_vm8, %v381_v37, %v339_v26  ;;  %vm4424_vm5 = vcmp.lt.s32.totalorder %v385_v51, 16  ;;  %vm4535_vm14 = vmor %vm5563_vm0, %vm5559_vm1  ;;  %vm1158_vm8 = vcmask 310272  }
 0x116   : > { %vm1509_vm1 = vcmask 15360   ;;  %vm5565_vm0 = vcmask 179200  }
 0x117   : > { %v307_v5 = vadd.s32 %v306_v0, %v297_v63 }
 0x119   : > { %v308_v8 = vshrl.u32 %v307_v5, 4 }
 0x11b   : > { %v309_v12 = vmul.u32 20, %v308_v8 }
 0x11d   : > { %v310_v24 = vsub.s32 %v4342_v13, %v309_v12  ;;  %v5593_v12 = vmov 0 }
 0x11f   : > { %vm371_vm12 = vcmp.ne.s32.totalorder %v310_v24, 0  ;;  %vm374_vm13 = vcmp.lt.s32.totalorder %v310_v24, 0  ;;  %v380_v36 = vadd.s32 20, %v310_v24 }
 0x120   : > { %vm4393_vm4 = vmand %vm374_vm13, %vm371_vm12  ;;  %vm4436_vm12 = vcmp.lt.s32.totalorder %v384_v57, 16 }
 0x121   : > { %v383_v54 = vsel %vm4393_vm4, %v380_v36, %v310_v24  ;;  %vm391_vm4 = vcmp.lt.s32.totalorder %v4345_v14, 316 }
 0x122   : > { %vm4429_vm11 = vcmp.lt.s32.totalorder %v383_v54, 16  ;;  %vm4449_vm13 = vmand %vm4424_vm5, %vm391_vm4  ;;  %vm2172_vm5 = vcmask 719872   ;;  %vm5567_vm4 = vcmask 343040  }
 0x123   : > { %v5594_v12 = vsel %vm4449_vm13, 4294967295, %v5593_v12 }
 0x124   : > { %5595 = vst [vmem:[#allocation5_spill] sm:$0xff] %v5594_v12 }
 0x17b   : > { %v765_v11 = vpop.f32.mrf.mxu2 }
 0x17c   : > { %v4363_v2 = vadd.f32 %v765_v11, %v4300_v47 }
 0x17e   : > { %v785_v17 = vmul.f32 0.044715, %v4363_v2  ;;  %v729_v19 = vpop.f32.mrf.mxu0  ;;  %v747_v20 = vpop.f32.mrf.mxu1  ;;  %v776_v14 = vmul.f32 0.5, %v4363_v2 }
 0x17f   : > { %v4368_v21 = vadd.f32 %v729_v19, %v4300_v47  ;;  %v4371_v22 = vadd.f32 %v747_v20, %v4300_v47 }
 0x180   : > { %v794_v23 = vmul.f32 %v785_v17, %v4363_v2 }
 0x181   : > { %v783_v25 = vmul.f32 0.044715, %v4368_v21  ;;  %v784_v27 = vmul.f32 0.044715, %v4371_v22  ;;  %v774_v20 = vmul.f32 0.5, %v4368_v21 }
 0x182   : > { %v803_v28 = vmul.f32 %v794_v23, %v4363_v2 }
 0x183   : > { %v792_v30 = vmul.f32 %v783_v25, %v4368_v21  ;;  %v793_v47 = vmul.f32 %v784_v27, %v4371_v22  ;;  %v767_v31 = vpop.f32.mrf.mxu2  ;;  %v775_v27 = vmul.f32 0.5, %v4371_v22 }
 0x184   : > { %v812_v32 = vadd.f32 %v803_v28, %v4363_v2  ;;  %v4383_v13 = vadd.f32 %v767_v31, %v4302_v49 }
 0x185   : > { %v801_v18 = vmul.f32 %v792_v30, %v4368_v21  ;;  %v802_v33 = vmul.f32 %v793_v47, %v4371_v22 }
 0x186   : > { %v821_v35 = vmul.f32 0.7978846, %v812_v32  ;;  %v788_v38 = vmul.f32 0.044715, %v4383_v13  ;;  %v731_v39 = vpop.f32.mrf.mxu0  ;;  %v749_v40 = vpop.f32.mrf.mxu1 }
 0x187   : > { %v810_v42 = vadd.f32 %v801_v18, %v4368_v21  ;;  %v811_v44 = vadd.f32 %v802_v33, %v4371_v22  ;;  %v4400_v45 = vadd.f32 %v731_v39, %v4302_v49  ;;  %v4403_v46 = vadd.f32 %v749_v40, %v4302_v49 }
 0x188   : > { %4137 = vtanh.f32 %v821_v35  ;;  %v797_v50 = vmul.f32 %v788_v38, %v4383_v13  ;;  %v779_v38 = vmul.f32 0.5, %v4383_v13 }
 0x189   : > { %v819_v52 = vmul.f32 0.7978846, %v810_v42  ;;  %v820_v53 = vmul.f32 0.7978846, %v811_v44  ;;  %v786_v55 = vmul.f32 0.044715, %v4400_v45 }
 0x18a   : > { %v806_v49 = vmul.f32 %v797_v50, %v4383_v13  ;;  %v787_v56 = vmul.f32 0.044715, %v4403_v46  ;;  %v777_v57 = vmul.f32 0.5, %v4400_v45 }
 0x18b   : > { %4139 = vtanh.f32 %v819_v52  ;;  %v770_v58 = vpop.f32.mrf.mxu2  ;;  %v795_v60 = vmul.f32 %v786_v55, %v4400_v45 }
 0x18c   : > { %4141 = vtanh.f32 %v820_v53  ;;  %v815_v59 = vadd.f32 %v806_v49, %v4383_v13  ;;  %v796_v61 = vmul.f32 %v787_v56, %v4403_v46  ;;  %v4434_v0 = vadd.f32 %v770_v58, %v4297_v43 }
 0x18d   : > { %v804_v5 = vmul.f32 %v795_v60, %v4400_v45  ;;  %v778_v60 = vmul.f32 0.5, %v4403_v46 }
 0x18e   : > { %v4138_v1 = vpop.eup %4137  ;;  %v824_v4 = vmul.f32 0.7978846, %v815_v59  ;;  %v805_v6 = vmul.f32 %v796_v61, %v4403_v46  ;;  %v734_v7 = vpop.f32.mrf.mxu0  ;;  %v791_v10 = vmul.f32 0.044715, %v4434_v0 }
 0x18f   : > { %v752_v8 = vpop.f32.mrf.mxu1  ;;  %v839_v9 = vadd.f32 1.0, %v4138_v1  ;;  %v4445_v11 = vadd.f32 %v734_v7, %v4297_v43  ;;  %v813_v15 = vadd.f32 %v804_v5, %v4400_v45 }
 0x190   : > { %4143 = vtanh.f32 %v824_v4  ;;  %v814_v16 = vadd.f32 %v805_v6, %v4403_v46  ;;  %v4456_v17 = vadd.f32 %v752_v8, %v4297_v43  ;;  %v800_v23 = vmul.f32 %v791_v10, %v4434_v0 }
 0x191   : > { %v4140_v2 = vpop.eup %4139  ;;  %v848_v19 = vmul.f32 %v839_v9, %v776_v14  ;;  %v789_v24 = vmul.f32 0.044715, %v4445_v11  ;;  %v822_v28 = vmul.f32 0.7978846, %v813_v15  ;;  %v782_v8 = vmul.f32 0.5, %v4434_v0 }
 0x192   : > { %v4142_v25 = vpop.eup %4141  ;;  %v837_v26 = vadd.f32 1.0, %v4140_v2  ;;  %v823_v29 = vmul.f32 0.7978846, %v814_v16  ;;  %v809_v43 = vmul.f32 %v800_v23, %v4434_v0  ;;  %v790_v33 = vmul.f32 0.044715, %v4456_v17 }
 0x193   : > { %v869_v30 = vsel %vm4449_vm13, %v848_v19, 0.0  ;;  %v838_v47 = vadd.f32 1.0, %v4142_v25  ;;  %v798_v31 = vmul.f32 %v789_v24, %v4445_v11  ;;  %v772_v32 = vpop.f32.mrf.mxu2  ;;  %4145 = vtanh.f32 %v822_v28 }
 0x194   : > { %v877_v21 = vpack.c.bf16 %v869_v30, %v869_v30  ;;  %v846_v18 = vmul.f32 %v837_v26, %v774_v20  ;;  %4147 = vtanh.f32 %v823_v29  ;;  %v818_v22 = vadd.f32 %v809_v43, %v4434_v0 }
 0x195   : > { %v847_v34 = vmul.f32 %v838_v47, %v775_v27  ;;  %v807_v35 = vmul.f32 %v798_v31, %v4445_v11  ;;  %v799_v39 = vmul.f32 %v790_v33, %v4456_v17  ;;  %v780_v16 = vmul.f32 0.5, %v4445_v11 }
 0x196   : > { %v4144_v36 = vpop.eup %4143  ;;  %883 = vst [vmem:[#allocation3 + $0xc] sm:$0xf] %v877_v21  ;;  %v867_v37 = vsel %vm4429_vm11, %v846_v18, 0.0  ;;  %v736_v40 = vpop.f32.mrf.mxu0  ;;  %v827_v48 = vmul.f32 0.7978846, %v818_v22  ;;  %v781_v23 = vmul.f32 0.5, %v4456_v17 }
 0x197   : > { %v754_v41 = vpop.f32.mrf.mxu1  ;;  %v868_v42 = vsel %vm4436_vm12, %v847_v34, 0.0  ;;  %v842_v44 = vadd.f32 1.0, %v4144_v36  ;;  %v816_v50 = vadd.f32 %v807_v35, %v4445_v11  ;;  %v808_v52 = vmul.f32 %v799_v39, %v4456_v17 }
 0x198   : > { %v4476_v51 = vpack.c.bf16 %v868_v42, %v867_v37  ;;  %4149 = vtanh.f32 %v827_v48 }
 0x199   : > { %v851_v53 = vmul.f32 %v842_v44, %v779_v38  ;;  %v825_v54 = vmul.f32 0.7978846, %v816_v50  ;;  %v4146_v49 = vpop.eup %4145  ;;  %v817_v13 = vadd.f32 %v808_v52, %v4456_v17 }
 0x19a   : > { %882 = vst [vmem:[#allocation3 + $0x4] sm:$0xff] %v4476_v51  ;;  %2271 = vrot.lane.b32.xlu0 %v4476_v51, %s5568_s27  ;;  %v4148_v55 = vpop.eup %4147  ;;  %v840_v58 = vadd.f32 1.0, %v4146_v49 }
 0x19b   : > { %v872_v56 = vsel %vm4449_vm13, %v851_v53, 0.0  ;;  %4151 = vtanh.f32 %v825_v54  ;;  %1601 = vst [vmem:[#allocation2 + $0x168] sm:$0xff] %v4476_v51  ;;  %v841_v61 = vadd.f32 1.0, %v4148_v55  ;;  %v826_v62 = vmul.f32 0.7978846, %v817_v13 }
 0x19c   : > { %v879_v59 = vpack.c.bf16 %v872_v56, %v872_v56  ;;  %v849_v1 = vmul.f32 %v840_v58, %v777_v57  ;;  %v4574_v58 = vrot.slane %v4476_v51, 6 }
 0x19d   : > { %v1596_v4 = vld [vmem:[#allocation3 + $0xc] sm:$0xf]  ;;  %v850_v5 = vmul.f32 %v841_v61, %v778_v60  ;;  %4153 = vtanh.f32 %v826_v62 }
 0x19e   : > { %885 = vst [vmem:[#allocation3 + $0x20] sm:$0xf] %v879_v59  ;;  %v4150_v6 = vpop.eup %4149  ;;  %v870_v7 = vsel %vm4429_vm11, %v849_v1, 0.0 }
 0x19f   : > { %1602 = vst [vmem:[#allocation2 + $0x170] sm:$0xf] %v1596_v4  ;;  %v871_v45 = vsel %vm4436_vm12, %v850_v5, 0.0  ;;  %v845_v14 = vadd.f32 1.0, %v4150_v6 }
 0x1a0   : > { %v4493_v46 = vpack.c.bf16 %v871_v45, %v870_v7 }
 0x1a1   : > { %v4152_v9 = vpop.eup %4151  ;;  %v4495_v10 = vld [vmem:[#allocation3] sm:$0xff]  ;;  %v854_v15 = vmul.f32 %v845_v14, %v782_v8 }
 0x1a2   : > { %v843_v2 = vadd.f32 1.0, %v4152_v9  ;;  %1257 = vrot.lane.b32.xlu1 %v4495_v10, %s5550_s13  ;;  %1139 = vrot.lane.b32.xlu2 %v4495_v10, %s4185_s28  ;;  %884 = vst [vmem:[#allocation3 + $0x18] sm:$0xff] %v4493_v46  ;;  %v4509_v26 = vld [vmem:[#allocation3 + $0x4] sm:$0xff]  ;;  %v4516_v30 = vrot.slane %v4495_v10, 6  ;;  %v3771_v32 = vld [vmem:[#allocation2 + $0x168] sm:$0xf] }
 0x1a3   : > { %2035 = vrot.lane.b32.xlu0 %v4476_v51, %s4186_s29  ;;  %v4154_v0 = vpop.eup %4153  ;;  %v875_v19 = vsel %vm4449_vm13, %v854_v15, 0.0  ;;  %1603 = vst [vmem:[#allocation2 + $0x174] sm:$0xff] %v4493_v46  ;;  %v5554_v47 = vrot.slane %v4509_v26, 6  ;;  %v1856_v48 = vrot.slane %v4493_v46, 6 }
 0x1a4   : > { %v852_v20 = vmul.f32 %v843_v2, %v780_v16  ;;  %v881_v11 = vpack.c.bf16 %v875_v19, %v875_v19  ;;  %v844_v24 = vadd.f32 1.0, %v4154_v0 }
 0x1a5   : > { %v1598_v25 = vld [vmem:[#allocation3 + $0x20] sm:$0xf]  ;;  %v1621_v22 = vrot.slane %v5554_v47, 4  ;;  %v4579_v60 = vrot.slane %v1856_v48, 4 }
 0x1a6   : > { %1604 = vst [vmem:[#allocation2 + $0x17c] sm:$0xf] %v1598_v25  ;;  %v873_v27 = vsel %vm4429_vm11, %v852_v20, 0.0  ;;  %v853_v28 = vmul.f32 %v844_v24, %v781_v23  ;;  %v4523_v17 = vld [vmem:[#allocation3 + $0x20] sm:$0xff] }
 0x1a7   : > { %887 = vst [vmem:[#allocation3 + $0x34] sm:$0x3] %v881_v11  ;;  %v5556_v34 = vrot.slane %v4523_v17, 6 }
 0x1a8   : > { %v874_v29 = vsel %vm4436_vm12, %v853_v28, 0.0 }
 0x1a9   : > { %v880_v43 = vpack.c.bf16 %v874_v29, %v873_v27  ;;  %v4525_v31 = vld [vmem:[#allocation3 + $0x18] sm:$0xff]  ;;  %v4549_v39 = vrot.slane %v5556_v34, 4 }
 0x1aa   : > { %1918 = vrot.lane.b32.xlu2 %v4476_v51, %s5575_s20  ;;  %1021 = vrot.lane.b32.xlu1 %v4495_v10, %s4187_s30  ;;  %v4046_v21 = vld [vmem:[#allocation2 + $0x170] sm:$0xf0]  ;;  %v5555_v18 = vrot.slane %v4525_v31, 6  ;;  %v4539_v36 = vld [vmem:[#allocation3 + $0x14] sm:$0xff] }
 0x1ab   : > { %1087 = vrot.lane.b32.xlu0 %v4516_v30, %s4188_s8  ;;  %886 = vst [vmem:[#allocation3 + $0x2c] sm:$0x33] %v880_v43  ;;  %v3772_v33 = vor.u32 %v4046_v21, %v3771_v32  ;;  %v1194_v41 = vrot.slane %v4539_v36, 6  ;;  %v4559_v52 = vld [vmem:[#allocation3 + $0x1c] sm:$0xff] }
 0x1ac   : > { %v4545_v37 = vsel %vm4535_vm14, %v1621_v22, %v5555_v18  ;;  %v5557_v59 = vrot.slane %v4559_v52, 6 }
 0x1ad   : > { %2982 = vmatpush.bf16.msrb.mxu0 %v3772_v33  ;;  %v1081_v13 = vrot.slane %v1194_v41, 4 }
 0x1ae   : > { %v2080_v38 = vld [vmem:[#allocation3 + $0x34] sm:$0x33]  ;;  %v1084_v32 = vrot.slane %v5557_v59, 4 }
 0x1af   : > { %v1729_v40 = vld [vmem:[#allocation3 + $0x34] sm:$0x33]  ;;  %v2099_v42 = vrot.slane %v2080_v38, 6 }
 0x1b0   : > { %v1748_v44 = vrot.slane %v1729_v40, 6  ;;  %v1846_v50 = vld [vmem:[#allocation3 + $0x34] sm:$0x33] }
 0x1b1   : > { %v4564_v53 = vsel %vm4535_vm14, %v4549_v39, %v2099_v42  ;;  %v1865_v57 = vrot.slane %v1846_v50, 6 }
 0x1b2   : > { %1490 = vrot.lane.b32.xlu2 %v4495_v10, %s4189_s9  ;;  %1802 = vrot.lane.b32.xlu1 %v4476_v51, %s4181_s18  ;;  %v4569_v54 = vsel %vm4535_vm14, %v4549_v39, %v1748_v44  ;;  %v1065_v49 = vld [vmem:[#allocation3 + $0x28] sm:$0x33]  ;;  %v1066_v38 = vld [vmem:[#allocation3 + $0x30] sm:$0x33] }
 0x1b3   : > { %1556 = vrot.lane.b32.xlu0 %v4516_v30, %s4179_s16  ;;  %v1082_v55 = vrot.slane %v1065_v49, 6  ;;  %v1845_v56 = vld [vmem:[#allocation3 + $0x2c] sm:$0x33]  ;;  %v4588_v6 = vsel %vm4535_vm14, %v4549_v39, %v1865_v57  ;;  %v1085_v44 = vrot.slane %v1066_v38, 6  ;;  %v2198_v57 = vld [vmem:[#allocation3 + $0x34] sm:$0x33] }
 0x1b4   : > { %v1862_v61 = vrot.slane %v1845_v56, 6  ;;  %v2197_v62 = vld [vmem:[#allocation3 + $0x2c] sm:$0x33] }
 0x1b5   : > { %v4583_v1 = vsel %vm4535_vm14, %v1081_v13, %v1082_v55  ;;  %v2214_v4 = vrot.slane %v2197_v62, 6  ;;  %v1416_v5 = vld [vmem:[#allocation3 + $0x28] sm:$0x33]  ;;  %v945_v40 = vld [vmem:[#allocation3 + $0x30] sm:$0x33] }
 0x1b6   : > { %v4593_v7 = vsel %vm4535_vm14, %v4579_v60, %v1862_v61  ;;  %v1433_v45 = vrot.slane %v1416_v5, 6  ;;  %v1300_v8 = vld [vmem:[#allocation3 + $0x28] sm:$0x33]  ;;  %v1184_v42 = vld [vmem:[#allocation3 + $0x30] sm:$0x33]  ;;  %v967_v50 = vrot.slane %v945_v40, 6 }
 0x1b7   : > { %v944_v14 = vld [vmem:[#allocation3 + $0x28] sm:$0x33]  ;;  %v4602_v9 = vsel %vm4535_vm14, %v4579_v60, %v2214_v4  ;;  %v1317_v15 = vrot.slane %v1300_v8, 6  ;;  %v1203_v49 = vrot.slane %v1184_v42, 6  ;;  %v1535_v55 = vld [vmem:[#allocation3 + $0x30] sm:$0x33] }
 0x1b8   : > { %v964_v16 = vrot.slane %v944_v14, 6  ;;  %v2079_v2 = vld [vmem:[#allocation3 + $0x2c] sm:$0x33]  ;;  %v4608_v0 = vsel %vm4535_vm14, %v1081_v13, %v1433_v45  ;;  %v4648_v61 = vsel %vm4535_vm14, %v1084_v32, %v967_v50  ;;  %v1554_v4 = vrot.slane %v1535_v55, 6  ;;  %v1962_v5 = vld [vmem:[#allocation3 + $0x34] sm:$0x33] }
 0x1b9   : > { %v2096_v19 = vrot.slane %v2079_v2, 6  ;;  %v1183_v20 = vld [vmem:[#allocation3 + $0x28] sm:$0x33]  ;;  %v4612_v23 = vsel %vm4535_vm14, %v1081_v13, %v1317_v15  ;;  %v4652_v62 = vsel %vm4535_vm14, %v1084_v32, %v1203_v49  ;;  %v1417_v45 = vld [vmem:[#allocation3 + $0x30] sm:$0x33]  ;;  %v2217_v8 = vrot.slane %v2198_v57, 6 }
 0x1ba   : > { %1373 = vrot.lane.b32.xlu2 %v4495_v10, %s4178_s15  ;;  %2153 = vrot.lane.b32.xlu1 %v4476_v51, %s4190_s11  ;;  %v1728_v11 = vld [vmem:[#allocation3 + $0x2c] sm:$0x33]  ;;  %v4616_v24 = vsel %vm4535_vm14, %v1081_v13, %v964_v16  ;;  %v1200_v25 = vrot.slane %v1183_v20, 6  ;;  %v1981_v14 = vrot.slane %v1962_v5, 6  ;;  %v1436_v15 = vrot.slane %v1417_v45, 6 }
 0x1bb   : > { %2219 = vrot.lane.b32.xlu0 %v4574_v58, %s4191_s12  ;;  %v1745_v27 = vrot.slane %v1728_v11, 6  ;;  %v1534_v28 = vld [vmem:[#allocation3 + $0x28] sm:$0x33]  ;;  %v4621_v29 = vsel %vm4535_vm14, %v4579_v60, %v2096_v19  ;;  %v1301_v16 = vld [vmem:[#allocation3 + $0x30] sm:$0x33]  ;;  %v4658_v2 = vsel %vm4535_vm14, %v1084_v32, %v1554_v4  ;;  %v1075_v57 = vrot.slane %v4516_v30, 4 }
 0x1bc   : > { %v1551_v43 = vrot.slane %v1534_v28, 6  ;;  %v4627_v21 = vsel %vm4535_vm14, %v1081_v13, %v1200_v25  ;;  %v1961_v56 = vld [vmem:[#allocation3 + $0x2c] sm:$0x33]  ;;  %v1320_v19 = vrot.slane %v1301_v16, 6  ;;  %v1600_v11 = vld [vmem:[#allocation3 + $0x34] sm:$0x3]  ;;  %v4673_v28 = vsel %vm4535_vm14, %v4549_v39, %v1981_v14 }
 0x1bd   : > { %v4632_v33 = vsel %vm4535_vm14, %v4579_v60, %v1745_v27  ;;  %v1599_v20 = vld [vmem:[#allocation3 + $0x2c] sm:$0x33]  ;;  %v4668_v27 = vsel %vm4535_vm14, %v4549_v39, %v2217_v8  ;;  %1606 = vst [vmem:[#allocation2 + $0x188] sm:$0x3] %v1600_v11  ;;  %v4756_v4 = vsel %vm4535_vm14, %v1075_v57, %v1194_v41  ;;  %v2207_v8 = vrot.slane %v4574_v58, 4 }
 0x1be   : > { %v4636_v22 = vsel %vm4535_vm14, %v1081_v13, %v1551_v43  ;;  %v4644_v13 = vsel %vm4535_vm14, %v1084_v32, %v1085_v44  ;;  %v4677_v43 = vsel %vm4535_vm14, %v1084_v32, %v1436_v15  ;;  %1605 = vst [vmem:[#allocation2 + $0x180] sm:$0x33] %v1599_v20  ;;  %v4681_v38 = vsel %vm4535_vm14, %v1084_v32, %v1320_v19  ;;  %v1128_v39 = vld [vmem:[#allocation3 + $0x8] sm:$0xff] }
 0x1bf   : > { %v4773_v41 = vsel %vm4535_vm14, %v2207_v8, %v1856_v48 }
 0x1c2   : > { %969 = vrot.lane.b32.xlu2 %v4516_v30, %s4192_s21  ;;  %900 = vrot.lane.b32.xlu1 %v4495_v10, %s5552_s22  ;;  %v1978_v10 = vrot.slane %v1961_v56, 6 }
 0x1c3   : > { %2101 = vrot.lane.b32.xlu0 %v4574_v58, %s5548_s23  ;;  %s5560_s23 = smov 106  }
 0x1c4   : > { %v4663_v25 = vsel %vm4535_vm14, %v4579_v60, %v1978_v10  ;;  %v1907_v60 = vld [vmem:[#allocation3 + $0xc] sm:$0xff] }
 0x1c5   : > { %v4725_v42 = vrot.slane %v1907_v60, 6 }
 0x1ca   : > { %1438 = vrot.lane.b32.xlu2 %v4516_v30, %s5574_s26  ;;  %1684 = vrot.lane.b32.xlu1 %v4476_v51, %s4196_s17  ;;  %v4700_v51 = vrot.slane %v1128_v39, 6 }
 0x1cb   : > { %1141 = vrot.lane.b32.xlu0 %v1128_v39, %s4185_s28 }
 0x1d2   : > { %1259 = vrot.lane.b32.xlu2 %v1128_v39, %s5550_s13  ;;  %1205 = vrot.lane.b32.xlu1 %v4516_v30, %s4197_s14  ;;  %s4199_s13 = smov 110  }
 0x1d3   : > { %1920 = vrot.lane.b32.xlu0 %v1907_v60, %s5575_s20 }
 0x1da   : > { %1023 = vrot.lane.b32.xlu2 %v1128_v39, %s4187_s30  ;;  %1983 = vrot.lane.b32.xlu1 %v4574_v58, %s5560_s23 }
 0x1db   : > { %1492 = vrot.lane.b32.xlu0 %v1128_v39, %s4189_s9 }
 0x1e2   : > { %1804 = vrot.lane.b32.xlu2 %v1907_v60, %s4181_s18  ;;  %1867 = vrot.lane.b32.xlu1 %v4574_v58, %s4182_s19 }
 0x1e3   : > { %1375 = vrot.lane.b32.xlu0 %v1128_v39, %s4178_s15 }
 0x1ea   : > { %2155 = vrot.lane.b32.xlu2 %v1907_v60, %s4190_s11  ;;  %1750 = vrot.lane.b32.xlu1 %v4574_v58, %s4199_s13 }
 0x1eb   : > { %971 = vrot.lane.b32.xlu0 %v4700_v51, %s4192_s21 }
 0x1f2   : > { %902 = vrot.lane.b32.xlu2 %v1128_v39, %s5552_s22  ;;  %2273 = vrot.lane.b32.xlu1 %v1907_v60, %s5568_s27 }
 0x1f3   : > { %1440 = vrot.lane.b32.xlu0 %v4700_v51, %s5574_s26 }
 0x1fa   : > { %1686 = vrot.lane.b32.xlu2 %v1907_v60, %s4196_s17  ;;  %2037 = vrot.lane.b32.xlu1 %v1907_v60, %s4186_s29 }
 0x1fb   : > { %1922 = vrot.lane.b32.xlu0 %v4493_v46, %s5575_s20 }
 0x1fc   : > { %v4715_v32 = vpop.permute.xlu2 %1139 }
 0x202   : > { %1207 = vrot.lane.b32.xlu2 %v4700_v51, %s4197_s14  ;;  %1089 = vrot.lane.b32.xlu1 %v4700_v51, %s4188_s8 }
 0x203   : > { %1806 = vrot.lane.b32.xlu0 %v4493_v46, %s4181_s18 }
 0x204   : > { %v4723_v40 = vpop.permute.xlu2 %1918 }
 0x20a   : > { %1985 = vrot.lane.b32.xlu2 %v4725_v42, %s5560_s23  ;;  %1558 = vrot.lane.b32.xlu1 %v4700_v51, %s4179_s16 }
 0x20b   : > { %904 = vrot.lane.b32.xlu0 %v4539_v36, %s5552_s22  ;;  %s5598_s22 = smov 89  }
 0x20c   : > { %v4733_v44 = vpop.permute.xlu2 %1490  ;;  %v4735_v50 = vpop.permute.xlu0 %2271 }
 0x212   : > { %1869 = vrot.lane.b32.xlu2 %v4725_v42, %s4182_s19  ;;  %2221 = vrot.lane.b32.xlu1 %v4725_v42, %s4191_s12 }
 0x213   : > { %1688 = vrot.lane.b32.xlu0 %v4493_v46, %s4196_s17 }
 0x214   : > { %v1258_v49 = vpop.permute.xlu1 %1257  ;;  %v4743_v55 = vpop.permute.xlu2 %1373 }
 0x215   : > { %v4745_v56 = vpop.permute.xlu0 %2035  ;;  %v1269_v19 = vrot.slane %v1258_v49, 4 }
 0x21a   : > { %1752 = vrot.lane.b32.xlu2 %v4725_v42, %s4199_s13  ;;  %2103 = vrot.lane.b32.xlu1 %v4725_v42, %s5598_s22 }
 0x21b   : > { %1209 = vrot.lane.b32.xlu0 %v4756_v4, %s4197_s14 }
 0x21c   : > { %v1022_v5 = vpop.permute.xlu1 %1021  ;;  %v4760_v45 = vpop.permute.xlu2 %969 }
 0x21d   : > { %v4762_v10 = vpop.permute.xlu0 %1087 }
 0x222   : > { %2275 = vrot.lane.b32.xlu2 %v4493_v46, %s5568_s27  ;;  %1143 = vrot.lane.b32.xlu1 %v4539_v36, %s4185_s28 }
 0x223   : > { %1871 = vrot.lane.b32.xlu0 %v4773_v41, %s4182_s19 }
 0x224   : > { %v1803_v14 = vpop.permute.xlu1 %1802  ;;  %v4777_v15 = vpop.permute.xlu2 %1438 }
 0x225   : > { %v4779_v16 = vpop.permute.xlu0 %1556 }
 0x22a   : > { %1025 = vrot.lane.b32.xlu2 %v4539_v36, %s4187_s30  ;;  %1377 = vrot.lane.b32.xlu1 %v4539_v36, %s4178_s15 }
 0x22b   : > { %1754 = vrot.lane.b32.xlu0 %v4773_v41, %s4199_s13 }
 0x22c   : > { %v2154_v58 = vpop.permute.xlu1 %2153  ;;  %v1260_v48 = vpop.permute.xlu2 %1259 }
 0x22d   : > { %v1270_v20 = vrot.slane %v1260_v48, 4  ;;  %v4787_v11 = vpop.permute.xlu0 %2219 }
 0x22f   : > { %v1275_v39 = vsel %vm434_vm2, %v1269_v19, %v1270_v20  ;;  %v1277_v60 = vsel %vm5562_vm3, %v1260_v48, %v1270_v20  ;;  %v1033_v19 = vrot.slane %v1022_v5, 4 }
 0x230   : > { %v1276_v57 = vsel %vm5562_vm3, %v1258_v49, %v1275_v39  ;;  %1291 = vst [vmem:[#allocation2 + $0xbc] sm:$0xf] %v1277_v60  ;;  %vm5564_vm3 = vcmask 1031168  }
 0x231   : > { %1290 = vst [vmem:[#allocation2 + $0xb4] sm:$0xff] %v1276_v57  ;;  %v1814_v57 = vrot.slane %v1803_v14, 4 }
 0x232   : > { %1494 = vrot.lane.b32.xlu2 %v4539_v36, %s4189_s9  ;;  %1091 = vrot.lane.b32.xlu1 %v4756_v4, %s4188_s8 }
 0x233   : > { %1987 = vrot.lane.b32.xlu0 %v4773_v41, %s5560_s23  ;;  %s5599_s23 = smov 20  }
 0x234   : > { %v1024_v8 = vpop.permute.xlu2 %1023  ;;  %v4798_v47 = vpop.permute.xlu1 %900 }
 0x235   : > { %v1034_v18 = vrot.slane %v1024_v8, 4  ;;  %v4800_v48 = vpop.permute.xlu0 %2101 }
 0x237   : > { %v1039_v49 = vsel %vm434_vm2, %v1033_v19, %v1034_v18  ;;  %v1042_v20 = vsel %vm1040_vm15, %v1024_v8, %v1034_v18 }
 0x238   : > { %v1041_v36 = vsel %vm1040_vm15, %v1022_v5, %v1039_v49  ;;  %1056 = vst [vmem:[#allocation2 + $0x44] sm:$0xf] %v1042_v20  ;;  %v1151_v5 = vrot.slane %v4715_v32, 4 }
 0x239   : > { %1055 = vst [vmem:[#allocation2 + $0x3c] sm:$0xff] %v1041_v36 }
 0x23a   : > { %2157 = vrot.lane.b32.xlu2 %v4493_v46, %s4190_s11  ;;  %2223 = vrot.lane.b32.xlu1 %v4773_v41, %s4191_s12 }
 0x23b   : > { %2277 = vrot.lane.b32.xlu0 %v4523_v17, %s5568_s27 }
 0x23c   : > { %v1805_v39 = vpop.permute.xlu2 %1804  ;;  %v4811_v60 = vpop.permute.xlu1 %1684 }
 0x23d   : > { %v1815_v19 = vrot.slane %v1805_v39, 4  ;;  %v1142_v18 = vpop.permute.xlu0 %1141 }
 0x23e   : > { %v1152_v8 = vrot.slane %v1142_v18, 4 }
 0x23f   : > { %v1820_v49 = vsel %vm434_vm2, %v1814_v57, %v1815_v19  ;;  %v1822_v20 = vsel %vm5573_vm9, %v1805_v39, %v1815_v19  ;;  %v2165_v57 = vrot.slane %v2154_v58, 4 }
 0x240   : > { %v1821_v36 = vsel %vm5573_vm9, %v1803_v14, %v1820_v49  ;;  %1836 = vst [vmem:[#allocation2 + $0x1e8] sm:$0xf] %v1822_v20  ;;  %v1157_v34 = vsel %vm434_vm2, %v1151_v5, %v1152_v8  ;;  %v1160_v59 = vsel %vm1158_vm8, %v1142_v18, %v1152_v8 }
 0x241   : > { %1835 = vst [vmem:[#allocation2 + $0x1e0] sm:$0xff] %v1821_v36  ;;  %v1159_v12 = vsel %vm1158_vm8, %v4715_v32, %v1157_v34  ;;  %v1930_v34 = vrot.slane %v4723_v40, 4  ;;  %v912_v36 = vrot.slane %v4798_v47, 4 }
 0x242   : > { %2039 = vrot.lane.b32.xlu2 %v4493_v46, %s4186_s29  ;;  %973 = vrot.lane.b32.xlu1 %v4756_v4, %s4192_s21  ;;  %1173 = vst [vmem:[#allocation2 + $0x78] sm:$0xff] %v1159_v12 }
 0x243   : > { %1174 = vst [vmem:[#allocation2 + $0x80] sm:$0xf] %v1160_v59  ;;  %1027 = vrot.lane.b32.xlu0 %v4559_v52, %s4187_s30 }
 0x244   : > { %v2156_v14 = vpop.permute.xlu2 %2155  ;;  %v4827_v39 = vpop.permute.xlu1 %1205 }
 0x245   : > { %v2166_v19 = vrot.slane %v2156_v14, 4  ;;  %v1921_v18 = vpop.permute.xlu0 %1920 }
 0x246   : > { %v1931_v32 = vrot.slane %v1921_v18, 4 }
 0x247   : > { %v2171_v46 = vsel %vm434_vm2, %v2165_v57, %v2166_v19  ;;  %v2174_v5 = vsel %vm2172_vm5, %v2156_v14, %v2166_v19  ;;  %v1502_v57 = vrot.slane %v4733_v44, 4 }
 0x248   : > { %v2173_v12 = vsel %vm2172_vm5, %v2154_v58, %v2171_v46  ;;  %2188 = vst [vmem:[#allocation2 + $0x29c] sm:$0xf] %v2174_v5  ;;  %v1936_v59 = vsel %vm434_vm2, %v1930_v34, %v1931_v32  ;;  %v1938_v8 = vsel %vm618_vm10, %v1921_v18, %v1931_v32 }
 0x249   : > { %2187 = vst [vmem:[#allocation2 + $0x294] sm:$0xff] %v2173_v12  ;;  %v1937_v49 = vsel %vm618_vm10, %v4723_v40, %v1936_v59 }
 0x24a   : > { %1560 = vrot.lane.b32.xlu2 %v4756_v4, %s4179_s16  ;;  %1442 = vrot.lane.b32.xlu1 %v4756_v4, %s5574_s26  ;;  %1951 = vst [vmem:[#allocation2 + $0x21c] sm:$0xff] %v1937_v49 }
 0x24b   : > { %1952 = vst [vmem:[#allocation2 + $0x224] sm:$0xf] %v1938_v8  ;;  %1496 = vrot.lane.b32.xlu0 %v4559_v52, %s4189_s9  ;;  %v1696_v8 = vrot.slane %v4811_v60, 4 }
 0x24c   : > { %v903_v58 = vpop.permute.xlu2 %902  ;;  %v4843_v20 = vpop.permute.xlu1 %1983 }
 0x24d   : > { %v913_v14 = vrot.slane %v903_v58, 4  ;;  %v1493_v40 = vpop.permute.xlu0 %1492 }
 0x24e   : > { %v1503_v19 = vrot.slane %v1493_v40, 4 }
 0x24f   : > { %v918_v18 = vsel %vm434_vm2, %v912_v36, %v913_v14  ;;  %v921_v34 = vsel %vm5567_vm4, %v903_v58, %v913_v14 }
 0x250   : > { %v920_v32 = vsel %vm5567_vm4, %v4798_v47, %v918_v18  ;;  %935 = vst [vmem:[#allocation2 + $0x8] sm:$0xf] %v921_v34  ;;  %v1508_v46 = vsel %vm434_vm2, %v1502_v57, %v1503_v19  ;;  %v1511_v5 = vsel %vm1509_vm1, %v1493_v40, %v1503_v19  ;;  %v1217_v34 = vrot.slane %v4827_v39, 4 }
 0x251   : > { %934 = vst [vmem:[#allocation2] sm:$0xff] %v920_v32  ;;  %v1510_v12 = vsel %vm1509_vm1, %v4733_v44, %v1508_v46  ;;  %v1385_v44 = vrot.slane %v4743_v55, 4  ;;  %v981_v46 = vrot.slane %v4760_v45, 4  ;;  %vm5571_vm4 = vcmask 146432  }
 0x252   : > { %2105 = vrot.lane.b32.xlu2 %v4773_v41, %s5598_s22  ;;  %1326 = vrot.lane.b32.xlu1 %v4756_v4, %s5599_s23  ;;  %1524 = vst [vmem:[#allocation2 + $0x12c] sm:$0xff] %v1510_v12 }
 0x253   : > { %1525 = vst [vmem:[#allocation2 + $0x134] sm:$0xf] %v1511_v5  ;;  %2159 = vrot.lane.b32.xlu0 %v4523_v17, %s4190_s11 }
 0x254   : > { %v1687_v47 = vpop.permute.xlu2 %1686  ;;  %v4861_v59 = vpop.permute.xlu1 %1867 }
 0x255   : > { %v1697_v49 = vrot.slane %v1687_v47, 4  ;;  %v1376_v58 = vpop.permute.xlu0 %1375 }
 0x256   : > { %v1386_v36 = vrot.slane %v1376_v58, 4 }
 0x257   : > { %v1702_v41 = vsel %vm434_vm2, %v1696_v8, %v1697_v49  ;;  %v1705_v4 = vsel %vm5564_vm3, %v1687_v47, %v1697_v49 }
 0x258   : > { %v1704_v14 = vsel %vm5564_vm3, %v4811_v60, %v1702_v41  ;;  %1719 = vst [vmem:[#allocation2 + $0x1ac] sm:$0xf] %v1705_v4  ;;  %v1391_v40 = vsel %vm434_vm2, %v1385_v44, %v1386_v36  ;;  %v1393_v57 = vsel %vm5577_vm6, %v1376_v58, %v1386_v36  ;;  %vm5566_vm3 = vcmask 334848   ;;  %v2263_v36 = vld [vmem:[#allocation3 + $0x2c] sm:$0x33] }
 0x259   : > { %1718 = vst [vmem:[#allocation2 + $0x1a4] sm:$0xff] %v1704_v14  ;;  %v1392_v19 = vsel %vm5577_vm6, %v4743_v55, %v1391_v40  ;;  %v1995_v14 = vrot.slane %v4843_v20, 4 }
 0x25a   : > { %1145 = vrot.lane.b32.xlu2 %v4559_v52, %s4185_s28  ;;  %1924 = vrot.lane.b32.xlu1 %v4523_v17, %s5575_s20  ;;  %1406 = vst [vmem:[#allocation2 + $0xf0] sm:$0xff] %v1392_v19  ;;  %v1450_v19 = vrot.slane %v4777_v15, 4 }
 0x25b   : > { %1407 = vst [vmem:[#allocation2 + $0xf8] sm:$0xf] %v1393_v57  ;;  %2041 = vrot.lane.b32.xlu0 %v4523_v17, %s4186_s29 }
 0x25c   : > { %v1208_v60 = vpop.permute.xlu2 %1207  ;;  %v4879_v18 = vpop.permute.xlu1 %1750 }
 0x25d   : > { %v1218_v32 = vrot.slane %v1208_v60, 4  ;;  %v972_v55 = vpop.permute.xlu0 %971 }
 0x25e   : > { %v982_v5 = vrot.slane %v972_v55, 4 }
 0x25f   : > { %v1223_v12 = vsel %vm434_vm2, %v1217_v34, %v1218_v32  ;;  %v1226_v47 = vsel %vm5565_vm0, %v1208_v60, %v1218_v32  ;;  %v960_v34 = vrot.slane %v4700_v51, 4 }
 0x260   : > { %v1225_v8 = vsel %vm5565_vm0, %v4827_v39, %v1223_v12  ;;  %1240 = vst [vmem:[#allocation2 + $0x98] sm:$0xc] %v1226_v47  ;;  %v987_v49 = vsel %vm434_vm2, %v981_v46, %v982_v5  ;;  %v990_v58 = vsel %vm5566_vm3, %v972_v55, %v982_v5  ;;  %v2283_v39 = vrot.slane %v4735_v50, 4 }
 0x261   : > { %1239 = vst [vmem:[#allocation2 + $0x90] sm:$0xcc] %v1225_v8  ;;  %v989_v44 = vsel %vm5566_vm3, %v4760_v45, %v987_v49  ;;  %vm5569_vm0 = vcmask 867328   ;;  %vm2290_vm3 = vcmask 703488   ;;  %v1131_v49 = vld [vmem:[#allocation3 + $0x28] sm:$0x33] }
 0x262   : > { %1379 = vrot.lane.b32.xlu2 %v4559_v52, %s4178_s15  ;;  %1808 = vrot.lane.b32.xlu1 %v4523_v17, %s4181_s18  ;;  %1003 = vst [vmem:[#allocation2 + $0x18] sm:$0xcc] %v989_v44  ;;  %v5601_v44 = vrot.slane %v4559_v52, 6 }
 0x263   : > { %1004 = vst [vmem:[#allocation2 + $0x20] sm:$0xc] %v990_v58  ;;  %2279 = vrot.lane.b32.xlu0 %v2263_v36, %s5568_s27  ;;  %s5600_s27 = smov 42  }
 0x264   : > { %v1986_v41 = vpop.permute.xlu2 %1985  ;;  %v2274_v4 = vpop.permute.xlu1 %2273 }
 0x265   : > { %v1996_v40 = vrot.slane %v1986_v41, 4  ;;  %v2284_v45 = vrot.slane %v2274_v4, 4  ;;  %v1441_v57 = vpop.permute.xlu0 %1440 }
 0x266   : > { %v1451_v60 = vrot.slane %v1441_v57, 4 }
 0x267   : > { %v2001_v32 = vsel %vm434_vm2, %v1995_v14, %v1996_v40  ;;  %v2004_v55 = vsel %vm5569_vm0, %v1986_v41, %v1996_v40  ;;  %v2289_v46 = vsel %vm434_vm2, %v2283_v39, %v2284_v45  ;;  %v2292_v47 = vsel %vm2290_vm3, %v2274_v4, %v2284_v45 }
 0x268   : > { %v2003_v5 = vsel %vm5569_vm0, %v4843_v20, %v2001_v32  ;;  %2018 = vst [vmem:[#allocation2 + $0x23c] sm:$0xc] %v2004_v55  ;;  %v2291_v12 = vsel %vm2290_vm3, %v4735_v50, %v2289_v46  ;;  %v1456_v8 = vsel %vm434_vm2, %v1450_v19, %v1451_v60  ;;  %v1459_v20 = vsel %vm5571_vm4, %v1441_v57, %v1451_v60  ;;  %v1910_v32 = vld [vmem:[#allocation3 + $0x2c] sm:$0x33] }
 0x269   : > { %2017 = vst [vmem:[#allocation2 + $0x234] sm:$0xcc] %v2003_v5  ;;  %v1458_v58 = vsel %vm5571_vm4, %v4777_v15, %v1456_v8  ;;  %v4919_v50 = vsel %vm4535_vm14, %v960_v34, %v5601_v44  ;;  %v2047_v15 = vrot.slane %v4745_v56, 4  ;;  %v1879_v41 = vrot.slane %v4861_v59, 4  ;;  %v892_v55 = vld [vmem:[#allocation3 + $0x28] sm:$0x33] }
 0x26a   : > { %2305 = vst [vmem:[#allocation2 + $0x2d0] sm:$0xff] %v2291_v12  ;;  %1147 = vrot.lane.b32.xlu2 %v1131_v49, %s4185_s28  ;;  %906 = vrot.lane.b32.xlu1 %v4559_v52, %s5600_s27  ;;  %vm5578_vm0 = vcmask 736256   ;;  %vm5579_vm4 = vcmask 318464  }
 0x26b   : > { %2306 = vst [vmem:[#allocation2 + $0x2d8] sm:$0xf] %v2292_v47  ;;  %1562 = vrot.lane.b32.xlu0 %v4919_v50, %s4179_s16 }
 0x26c   : > { %1472 = vst [vmem:[#allocation2 + $0x108] sm:$0xcc] %v1458_v58  ;;  %v1870_v36 = vpop.permute.xlu2 %1869  ;;  %v2038_v39 = vpop.permute.xlu1 %2037 }
 0x26d   : > { %1473 = vst [vmem:[#allocation2 + $0x110] sm:$0xc] %v1459_v20  ;;  %v1880_v4 = vrot.slane %v1870_v36, 4  ;;  %v2048_v14 = vrot.slane %v2038_v39, 4  ;;  %v4925_v52 = vpop.permute.xlu0 %1922 }
 0x26f   : > { %v1885_v40 = vsel %vm434_vm2, %v1879_v41, %v1880_v4  ;;  %v1887_v45 = vsel %vm5570_vm7, %v1870_v36, %v1880_v4  ;;  %v2053_v57 = vsel %vm434_vm2, %v2047_v15, %v2048_v14  ;;  %v2056_v34 = vsel %vm5578_vm0, %v2038_v39, %v2048_v14  ;;  %v1365_v39 = vld [vmem:[#allocation3 + $0x28] sm:$0x33] }
 0x270   : > { %v1886_v19 = vsel %vm5570_vm7, %v4861_v59, %v1885_v40  ;;  %1901 = vst [vmem:[#allocation2 + $0x200] sm:$0xc] %v1887_v45  ;;  %v2055_v60 = vsel %vm5578_vm0, %v4745_v56, %v2053_v57  ;;  %v1099_v59 = vrot.slane %v4762_v10, 4  ;;  %vm5572_vm7 = vcmask 900096  }
 0x271   : > { %1900 = vst [vmem:[#allocation2 + $0x1f8] sm:$0xcc] %v1886_v19  ;;  %v1762_v56 = vrot.slane %v4879_v18, 4  ;;  %v1568_v4 = vrot.slane %v4779_v16, 4  ;;  %v1974_v40 = vrot.slane %v4725_v42, 4 }
 0x272   : > { %2069 = vst [vmem:[#allocation2 + $0x258] sm:$0xff] %v2055_v60  ;;  %1926 = vrot.lane.b32.xlu2 %v1910_v32, %s5575_s20  ;;  %1690 = vrot.lane.b32.xlu1 %v4523_v17, %s4196_s17  ;;  %v5604_v60 = vrot.slane %v4523_v17, 6  ;;  %v1013_v32 = vld [vmem:[#allocation3 + $0x28] sm:$0x33] }
 0x273   : > { %2070 = vst [vmem:[#allocation2 + $0x260] sm:$0xf] %v2056_v34  ;;  %908 = vrot.lane.b32.xlu0 %v892_v55, %s5600_s27  ;;  %v2231_v55 = vrot.slane %v4787_v11, 4 }
 0x274   : > { %v1753_v46 = vpop.permute.xlu2 %1752  ;;  %v1090_v5 = vpop.permute.xlu1 %1089  ;;  %v4970_v34 = vsel %vm4535_vm14, %v1974_v40, %v5604_v60 }
 0x275   : > { %v1763_v12 = vrot.slane %v1753_v46, 4  ;;  %v1100_v47 = vrot.slane %v1090_v5, 4  ;;  %v4941_v8 = vpop.permute.xlu0 %1806 }
 0x277   : > { %v1768_v49 = vsel %vm434_vm2, %v1762_v56, %v1763_v12  ;;  %v1771_v58 = vsel %vm5572_vm7, %v1753_v46, %v1763_v12  ;;  %v1105_v20 = vsel %vm434_vm2, %v1099_v59, %v1100_v47  ;;  %v1108_v36 = vsel %vm5579_vm4, %v1090_v5, %v1100_v47  ;;  %v1794_v12 = vld [vmem:[#allocation3 + $0x2c] sm:$0x33] }
 0x278   : > { %v1770_v44 = vsel %vm5572_vm7, %v4879_v18, %v1768_v49  ;;  %1785 = vst [vmem:[#allocation2 + $0x1c4] sm:$0xc] %v1771_v58  ;;  %v1107_v15 = vsel %vm5579_vm4, %v4762_v10, %v1105_v20  ;;  %vm5602_vm7 = vcmask 7168   ;;  %v1482_v47 = vld [vmem:[#allocation3 + $0x28] sm:$0x33]  ;;  %v2113_v20 = vrot.slane %v4800_v48, 4 }
 0x279   : > { %1784 = vst [vmem:[#allocation2 + $0x1bc] sm:$0xcc] %v1770_v44  ;;  %vm5603_vm9 = vmmov %vm5602_vm7 }
 0x27a   : > { %1121 = vst [vmem:[#allocation2 + $0x54] sm:$0xcc] %v1107_v15  ;;  %1093 = vrot.lane.b32.xlu2 %v4919_v50, %s4188_s8  ;;  %1211 = vrot.lane.b32.xlu1 %v4919_v50, %s4197_s14 }
 0x27b   : > { %1122 = vst [vmem:[#allocation2 + $0x5c] sm:$0xc] %v1108_v36  ;;  %1381 = vrot.lane.b32.xlu0 %v1365_v39, %s4178_s15 }
 0x27c   : > { %v4956_v41 = vpop.permute.xlu2 %2275  ;;  %v1559_v18 = vpop.permute.xlu1 %1558 }
 0x27d   : > { %v1569_v10 = vrot.slane %v1559_v18, 4  ;;  %v4959_v14 = vpop.permute.xlu0 %904 }
 0x27f   : > { %v1574_v45 = vsel %vm434_vm2, %v1568_v4, %v1569_v10  ;;  %v1576_v57 = vsel %vm5602_vm7, %v1559_v18, %v1569_v10  ;;  %vm5580_vm7 = vcmask 711680   ;;  %v2145_v10 = vld [vmem:[#allocation3 + $0x2c] sm:$0x33] }
 0x280   : > { %v1575_v19 = vsel %vm5603_vm9, %v4779_v16, %v1574_v45  ;;  %1590 = vst [vmem:[#allocation2 + $0x14c] sm:$0xc] %v1576_v57  ;;  %vm2120_vm9 = vcmask 728064  }
 0x281   : > { %1589 = vst [vmem:[#allocation2 + $0x144] sm:$0xcc] %v1575_v19 }
 0x282   : > { %2225 = vrot.lane.b32.xlu2 %v4970_v34, %s4191_s12  ;;  %1029 = vrot.lane.b32.xlu1 %v1013_v32, %s4187_s30 }
 0x283   : > { %2107 = vrot.lane.b32.xlu0 %v4970_v34, %s5598_s22 }
 0x284   : > { %v4977_v42 = vpop.permute.xlu2 %1025  ;;  %v2222_v16 = vpop.permute.xlu1 %2221 }
 0x285   : > { %v2232_v17 = vrot.slane %v2222_v16, 4  ;;  %v4980_v59 = vpop.permute.xlu0 %1688 }
 0x287   : > { %v2237_v46 = vsel %vm434_vm2, %v2231_v55, %v2232_v17  ;;  %v2240_v5 = vsel %vm5580_vm7, %v2222_v16, %v2232_v17  ;;  %v2285_v55 = vrot.slane %v4956_v41, 4 }
 0x288   : > { %v2239_v56 = vsel %vm5580_vm7, %v4787_v11, %v2237_v46  ;;  %2254 = vst [vmem:[#allocation2 + $0x2b4] sm:$0xc] %v2240_v5 }
 0x289   : > { %2253 = vst [vmem:[#allocation2 + $0x2ac] sm:$0xcc] %v2239_v56 }
 0x28a   : > { %1810 = vrot.lane.b32.xlu2 %v1794_v12, %s4181_s18  ;;  %1498 = vrot.lane.b32.xlu1 %v1482_v47, %s4189_s9 }
 0x28b   : > { %1095 = vrot.lane.b32.xlu0 %v4583_v1, %s4188_s8 }
 0x28c   : > { %v4990_v49 = vpop.permute.xlu2 %1494  ;;  %v2104_v58 = vpop.permute.xlu1 %2103 }
 0x28d   : > { %v2114_v44 = vrot.slane %v2104_v58, 4  ;;  %v4993_v15 = vpop.permute.xlu0 %1209 }
 0x28f   : > { %v2119_v11 = vsel %vm434_vm2, %v2113_v20, %v2114_v44  ;;  %v2122_v36 = vsel %vm2120_vm9, %v2104_v58, %v2114_v44  ;;  %v1035_v44 = vrot.slane %v4977_v42, 4 }
 0x290   : > { %v2121_v39 = vsel %vm2120_vm9, %v4800_v48, %v2119_v11  ;;  %2136 = vst [vmem:[#allocation2 + $0x278] sm:$0xc] %v2122_v36 }
 0x291   : > { %2135 = vst [vmem:[#allocation2 + $0x270] sm:$0xcc] %v2121_v39 }
 0x292   : > { %975 = vrot.lane.b32.xlu2 %v4919_v50, %s4192_s21  ;;  %1873 = vrot.lane.b32.xlu1 %v4970_v34, %s4182_s19 }
 0x293   : > { %1875 = vrot.lane.b32.xlu0 %v4593_v7, %s4182_s19  ;;  %v1676_v7 = vld [vmem:[#allocation3 + $0x2c] sm:$0x33] }
 0x294   : > { %v5005_v1 = vpop.permute.xlu2 %2157  ;;  %v1144_v18 = vpop.permute.xlu1 %1143 }
 0x295   : > { %v5007_v4 = vpop.permute.xlu0 %1871  ;;  %v1153_v47 = vrot.slane %v1144_v18, 4 }
 0x29a   : > { %1444 = vrot.lane.b32.xlu2 %v4919_v50, %s5574_s26  ;;  %2161 = vrot.lane.b32.xlu1 %v2145_v10, %s4190_s11 }
 0x29b   : > { %2227 = vrot.lane.b32.xlu0 %v4602_v9, %s4191_s12  ;;  %v2027_v9 = vld [vmem:[#allocation3 + $0x2c] sm:$0x33] }
 0x29c   : > { %v5014_v48 = vpop.permute.xlu2 %2039  ;;  %v1378_v40 = vpop.permute.xlu1 %1377 }
 0x29d   : > { %v5016_v45 = vpop.permute.xlu0 %1754 }
 0x2a2   : > { %1692 = vrot.lane.b32.xlu2 %v1676_v7, %s4196_s17  ;;  %1756 = vrot.lane.b32.xlu1 %v4970_v34, %s4199_s13  ;;  %v1911_v7 = vld [vmem:[#allocation3 + $0x34] sm:$0x33] }
 0x2a3   : > { %1446 = vrot.lane.b32.xlu0 %v4608_v0, %s5574_s26  ;;  %s5605_s26 = smov 106  }
 0x2a4   : > { %v5023_v57 = vpop.permute.xlu2 %1560  ;;  %v5025_v19 = vpop.permute.xlu1 %1091 }
 0x2a5   : > { %v5027_v60 = vpop.permute.xlu0 %1987 }
 0x2aa   : > { %1328 = vrot.lane.b32.xlu2 %v4919_v50, %s5599_s23  ;;  %2043 = vrot.lane.b32.xlu1 %v2027_v9, %s4186_s29 }
 0x2ab   : > { %1330 = vrot.lane.b32.xlu0 %v4612_v23, %s5599_s23  ;;  %v1132_v23 = vld [vmem:[#allocation3 + $0x30] sm:$0x33] }
 0x2ac   : > { %v5034_v32 = vpop.permute.xlu2 %2105  ;;  %v5036_v16 = vpop.permute.xlu1 %2223 }
 0x2ad   : > { %v2278_v0 = vpop.permute.xlu0 %2277 }
 0x2ae   : > { %v2286_v17 = vrot.slane %v2278_v0, 4 }
 0x2b0   : > { %v2293_v46 = vsel %vm434_vm2, %v2285_v55, %v2286_v17  ;;  %v2295_v5 = vsel %vm2290_vm3, %v2278_v0, %v2286_v17  ;;  %v1387_v0 = vrot.slane %v1378_v40, 4 }
 0x2b1   : > { %v2294_v50 = vsel %vm2290_vm3, %v4956_v41, %v2293_v46  ;;  %2308 = vst [vmem:[#allocation2 + $0x2e4] sm:$0xf] %v2295_v5  ;;  %v1504_v46 = vrot.slane %v4990_v49, 4 }
 0x2b2   : > { %977 = vrot.lane.b32.xlu2 %v4616_v24, %s4192_s21  ;;  %1989 = vrot.lane.b32.xlu1 %v4970_v34, %s5605_s26  ;;  %2307 = vst [vmem:[#allocation2 + $0x2dc] sm:$0xff] %v2294_v50 }
 0x2b3   : > { %1149 = vrot.lane.b32.xlu0 %v1132_v23, %s4185_s28  ;;  %s5607_s28 = smov 127  }
 0x2b4   : > { %v1146_v56 = vpop.permute.xlu2 %1145  ;;  %v5048_v12 = vpop.permute.xlu1 %973 }
 0x2b5   : > { %v1154_v58 = vrot.slane %v1146_v56, 4  ;;  %v1028_v20 = vpop.permute.xlu0 %1027 }
 0x2b6   : > { %v1036_v41 = vrot.slane %v1028_v20, 4 }
 0x2b7   : > { %v1161_v11 = vsel %vm434_vm2, %v1153_v47, %v1154_v58  ;;  %v1163_v24 = vsel %vm1158_vm8, %v1146_v56, %v1154_v58  ;;  %v1795_v47 = vld [vmem:[#allocation3 + $0x34] sm:$0x33]  ;;  %v1611_v58 = vld [vmem:[#allocation3 + $0x2c] sm:$0x33] }
 0x2b8   : > { %v1162_v36 = vsel %vm1158_vm8, %v1144_v18, %v1161_v11  ;;  %1176 = vst [vmem:[#allocation2 + $0x8c] sm:$0xf] %v1163_v24  ;;  %v1043_v34 = vsel %vm434_vm2, %v1035_v44, %v1036_v41  ;;  %v1045_v39 = vsel %vm1040_vm15, %v1028_v20, %v1036_v41  ;;  %v1628_v44 = vrot.slane %v1611_v58, 6  ;;  %v1249_v58 = vld [vmem:[#allocation3 + $0x28] sm:$0x33] }
 0x2b9   : > { %1175 = vst [vmem:[#allocation2 + $0x84] sm:$0xff] %v1162_v36  ;;  %v1044_v10 = vsel %vm1040_vm15, %v4977_v42, %v1043_v34 }
 0x2ba   : > { %2109 = vrot.lane.b32.xlu2 %v4621_v29, %s5598_s22  ;;  %1213 = vrot.lane.b32.xlu1 %v4627_v21, %s4197_s14  ;;  %1057 = vst [vmem:[#allocation2 + $0x48] sm:$0xff] %v1044_v10 }
 0x2bb   : > { %1058 = vst [vmem:[#allocation2 + $0x50] sm:$0xf] %v1045_v39  ;;  %1928 = vrot.lane.b32.xlu0 %v1911_v7, %s5575_s20  ;;  %v2264_v39 = vld [vmem:[#allocation3 + $0x34] sm:$0x33]  ;;  %s5608_s20 = smov 86  }
 0x2bc   : > { %v1380_v18 = vpop.permute.xlu2 %1379  ;;  %v5063_v9 = vpop.permute.xlu1 %1442  ;;  %v1677_v7 = vld [vmem:[#allocation3 + $0x34] sm:$0x33] }
 0x2bd   : > { %v1388_v55 = vrot.slane %v1380_v18, 4  ;;  %v1497_v17 = vpop.permute.xlu0 %1496 }
 0x2be   : > { %v1505_v42 = vrot.slane %v1497_v17, 4 }
 0x2bf   : > { %v1394_v5 = vsel %vm434_vm2, %v1387_v0, %v1388_v55  ;;  %v1396_v29 = vsel %vm5577_vm6, %v1380_v18, %v1388_v55  ;;  %v1932_v0 = vrot.slane %v4925_v52, 4 }
 0x2c0   : > { %v1395_v21 = vsel %vm5577_vm6, %v1378_v40, %v1394_v5  ;;  %1409 = vst [vmem:[#allocation2 + $0x104] sm:$0xf] %v1396_v29  ;;  %v1512_v50 = vsel %vm434_vm2, %v1504_v46, %v1505_v42  ;;  %v1514_v23 = vsel %vm1509_vm1, %v1497_v17, %v1505_v42  ;;  %v2049_v46 = vrot.slane %v5014_v48, 4 }
 0x2c1   : > { %1408 = vst [vmem:[#allocation2 + $0xfc] sm:$0xff] %v1395_v21  ;;  %v1513_v56 = vsel %vm1509_vm1, %v4990_v49, %v1512_v50  ;;  %v2167_v49 = vrot.slane %v5005_v1, 4  ;;  %vm5610_vm6 = vcmask 891904  }
 0x2c2   : > { %1758 = vrot.lane.b32.xlu2 %v4632_v33, %s4199_s13  ;;  %1564 = vrot.lane.b32.xlu1 %v4636_v22, %s4179_s16  ;;  %1526 = vst [vmem:[#allocation2 + $0x138] sm:$0xff] %v1513_v56  ;;  %v5606_v33 = vrot.slane %v4525_v31, 6  ;;  %v893_v56 = vld [vmem:[#allocation3 + $0x30] sm:$0x33] }
 0x2c3   : > { %1527 = vst [vmem:[#allocation2 + $0x140] sm:$0xf] %v1514_v23  ;;  %1812 = vrot.lane.b32.xlu0 %v1795_v47, %s4181_s18  ;;  %v1014_v23 = vld [vmem:[#allocation3 + $0x30] sm:$0x33] }
 0x2c4   : > { %v5078_v40 = vpop.permute.xlu2 %1147  ;;  %v5080_v20 = vpop.permute.xlu1 %1326  ;;  %v1627_v24 = vrot.slane %v5606_v33, 4 }
 0x2c5   : > { %v2160_v41 = vpop.permute.xlu0 %2159 }
 0x2c6   : > { %v2168_v11 = vrot.slane %v2160_v41, 4  ;;  %v1629_v34 = vsel %vm4535_vm14, %v1627_v24, %v1628_v44 }
 0x2c8   : > { %v2175_v22 = vsel %vm434_vm2, %v2167_v49, %v2168_v11  ;;  %v2177_v36 = vsel %vm2172_vm5, %v2160_v41, %v2168_v11  ;;  %v1816_v41 = vrot.slane %v4941_v8, 4  ;;  %v1101_v49 = vrot.slane %v5025_v19, 4 }
 0x2c9   : > { %v2176_v10 = vsel %vm2172_vm5, %v5005_v1, %v2175_v22  ;;  %2190 = vst [vmem:[#allocation2 + $0x2a8] sm:$0xf] %v2177_v36 }
 0x2ca   : > { %1641 = vrot.lane.b32.xlu2 %v1629_v34, %s5607_s28  ;;  %2281 = vrot.lane.b32.xlu1 %v2264_v39, %s5608_s20  ;;  %2189 = vst [vmem:[#allocation2 + $0x2a0] sm:$0xff] %v2176_v10 }
 0x2cb   : > { %1694 = vrot.lane.b32.xlu0 %v1677_v7, %s4196_s17  ;;  %s5609_s17 = smov 21   ;;  %v1483_v7 = vld [vmem:[#allocation3 + $0x30] sm:$0x33] }
 0x2cc   : > { %v5094_v31 = vpop.permute.xlu2 %1926  ;;  %v1925_v18 = vpop.permute.xlu1 %1924 }
 0x2cd   : > { %v1933_v55 = vrot.slane %v1925_v18, 4  ;;  %v2042_v17 = vpop.permute.xlu0 %2041 }
 0x2ce   : > { %v2050_v42 = vrot.slane %v2042_v17, 4 }
 0x2cf   : > { %v1939_v1 = vsel %vm434_vm2, %v1932_v0, %v1933_v55  ;;  %v1941_v5 = vsel %vm618_vm10, %v1925_v18, %v1933_v55  ;;  %v1366_v18 = vld [vmem:[#allocation3 + $0x30] sm:$0x33]  ;;  %v914_v55 = vrot.slane %v4959_v14, 4 }
 0x2d0   : > { %v1940_v29 = vsel %vm618_vm10, %v4925_v52, %v1939_v1  ;;  %1954 = vst [vmem:[#allocation2 + $0x230] sm:$0xf] %v1941_v5  ;;  %v2057_v21 = vsel %vm434_vm2, %v2049_v46, %v2050_v42  ;;  %v2059_v50 = vsel %vm5578_vm0, %v2042_v17, %v2050_v42  ;;  %v1570_v1 = vrot.slane %v5023_v57, 4 }
 0x2d1   : > { %1953 = vst [vmem:[#allocation2 + $0x228] sm:$0xff] %v1940_v29  ;;  %v2058_v47 = vsel %vm5578_vm0, %v5014_v48, %v2057_v21  ;;  %vm5611_vm0 = vmmov %vm5610_vm6 }
 0x2d2   : > { %1031 = vrot.lane.b32.xlu2 %v1014_v23, %s4187_s30  ;;  %910 = vrot.lane.b32.xlu1 %v893_v56, %s5600_s27  ;;  %2071 = vst [vmem:[#allocation2 + $0x264] sm:$0xff] %v2058_v47  ;;  %s5682_s30 = smov 107  }
 0x2d3   : > { %2072 = vst [vmem:[#allocation2 + $0x26c] sm:$0xf] %v2059_v50  ;;  %1265 = vrot.lane.b32.xlu0 %v1249_v58, %s5609_s17  ;;  %v2146_v58 = vld [vmem:[#allocation3 + $0x34] sm:$0x33] }
 0x2d4   : > { %v1094_v52 = vpop.permute.xlu2 %1093  ;;  %v1809_v44 = vpop.permute.xlu1 %1808 }
 0x2d5   : > { %v1102_v11 = vrot.slane %v1094_v52, 4  ;;  %v1817_v33 = vrot.slane %v1809_v44, 4  ;;  %v5111_v24 = vpop.permute.xlu0 %2279 }
 0x2d7   : > { %v1109_v48 = vsel %vm434_vm2, %v1101_v49, %v1102_v11  ;;  %v1111_v22 = vsel %vm5579_vm4, %v1094_v52, %v1102_v11  ;;  %v1823_v36 = vsel %vm434_vm2, %v1816_v41, %v1817_v33  ;;  %v1825_v10 = vsel %vm5611_vm0, %v1809_v44, %v1817_v33 }
 0x2d8   : > { %v1110_v34 = vsel %vm5579_vm4, %v5025_v19, %v1109_v48  ;;  %1124 = vst [vmem:[#allocation2 + $0x68] sm:$0xf] %v1111_v22  ;;  %v1824_v39 = vsel %vm5610_vm6, %v4941_v8, %v1823_v36  ;;  %v2233_v8 = vrot.slane %v5036_v16, 4  ;;  %vm5612_vm0 = vcmask 343040   ;;  %v1247_v48 = vld [vmem:[#allocation3 + $0x14] sm:$0xff] }
 0x2d9   : > { %1123 = vst [vmem:[#allocation2 + $0x60] sm:$0xff] %v1110_v34  ;;  %vm5613_vm6 = vmmov %vm5612_vm0  ;;  %vm5614_vm4 = vcmask 7168   ;;  %v1698_v41 = vrot.slane %v4980_v59, 4  ;;  %v1219_v34 = vrot.slane %v4993_v15, 4 }
 0x2da   : > { %1837 = vst [vmem:[#allocation2 + $0x1ec] sm:$0xff] %v1824_v39  ;;  %1500 = vrot.lane.b32.xlu2 %v1483_v7, %s4189_s9  ;;  %1383 = vrot.lane.b32.xlu1 %v1366_v18, %s4178_s15  ;;  %v983_v39 = vrot.slane %v5048_v12, 4 }
 0x2db   : > { %1838 = vst [vmem:[#allocation2 + $0x1f4] sm:$0xf] %v1825_v10  ;;  %1324 = vrot.lane.b32.xlu0 %v4700_v51, %s5599_s23 }
 0x2dc   : > { %v2226_v0 = vpop.permute.xlu2 %2225  ;;  %v907_v19 = vpop.permute.xlu1 %906 }
 0x2dd   : > { %v2234_v17 = vrot.slane %v2226_v0, 4  ;;  %v915_v46 = vrot.slane %v907_v19, 4  ;;  %v1563_v42 = vpop.permute.xlu0 %1562 }
 0x2de   : > { %v1571_v5 = vrot.slane %v1563_v42, 4 }
 0x2df   : > { %v2241_v29 = vsel %vm434_vm2, %v2233_v8, %v2234_v17  ;;  %v2243_v21 = vsel %vm5580_vm7, %v2226_v0, %v2234_v17  ;;  %v922_v50 = vsel %vm434_vm2, %v914_v55, %v915_v46  ;;  %v924_v56 = vsel %vm5613_vm6, %v907_v19, %v915_v46  ;;  %v1250_v17 = vld [vmem:[#allocation3 + $0x30] sm:$0x33]  ;;  %v5170_v46 = vld [vmem:[#allocation3 + $0x20] sm:$0xff] }
 0x2e0   : > { %v2242_v51 = vsel %vm5580_vm7, %v5036_v16, %v2241_v29  ;;  %2256 = vst [vmem:[#allocation2 + $0x2c0] sm:$0xf] %v2243_v21  ;;  %v923_v23 = vsel %vm5612_vm0, %v4959_v14, %v922_v50  ;;  %v1577_v47 = vsel %vm434_vm2, %v1570_v1, %v1571_v5  ;;  %vm5615_vm7 = vmmov %vm5614_vm4  ;;  %vm5618_vm0 = vcmask 334848  }
 0x2e1   : > { %2255 = vst [vmem:[#allocation2 + $0x2b8] sm:$0xff] %v2242_v51  ;;  %v1578_v52 = vsel %vm5614_vm4, %v5023_v57, %v1577_v47  ;;  %v1579_v16 = vsel %vm5615_vm7, %v1563_v42, %v1571_v5  ;;  %vm5616_vm4 = vcmask 1031168   ;;  %vm5619_vm6 = vmmov %vm5618_vm0  ;;  %v1452_v5 = vrot.slane %v5063_v9, 4 }
 0x2e2   : > { %936 = vst [vmem:[#allocation2 + $0xc] sm:$0xff] %v923_v23  ;;  %2163 = vrot.lane.b32.xlu2 %v2146_v58, %s4190_s11  ;;  %1097 = vrot.lane.b32.xlu1 %v4644_v13, %s4188_s8  ;;  %vm5617_vm7 = vmmov %vm5616_vm4  ;;  %v2115_v50 = vrot.slane %v5034_v32, 4 }
 0x2e3   : > { %937 = vst [vmem:[#allocation2 + $0x14] sm:$0xf] %v924_v56  ;;  %979 = vrot.lane.b32.xlu0 %v4648_v61, %s4192_s21  ;;  %v2028_v61 = vld [vmem:[#allocation3 + $0x34] sm:$0x33] }
 0x2e4   : > { %1591 = vst [vmem:[#allocation2 + $0x150] sm:$0xff] %v1578_v52  ;;  %v5145_v14 = vpop.permute.xlu2 %1810  ;;  %v1691_v44 = vpop.permute.xlu1 %1690 }
 0x2e5   : > { %1592 = vst [vmem:[#allocation2 + $0x158] sm:$0xf] %v1579_v16  ;;  %v1699_v57 = vrot.slane %v1691_v44, 4  ;;  %v5148_v49 = vpop.permute.xlu0 %908 }
 0x2e7   : > { %v1706_v11 = vsel %vm434_vm2, %v1698_v41, %v1699_v57  ;;  %v1708_v13 = vsel %vm5616_vm4, %v1691_v44, %v1699_v57  ;;  %vm5620_vm4 = vcmask 179200  }
 0x2e8   : > { %v1707_v33 = vsel %vm5617_vm7, %v4980_v59, %v1706_v11  ;;  %1721 = vst [vmem:[#allocation2 + $0x1b8] sm:$0xf] %v1708_v13  ;;  %vm5621_vm7 = vmmov %vm5620_vm4  ;;  %v1336_v11 = vrot.slane %v5080_v20, 4 }
 0x2e9   : > { %1720 = vst [vmem:[#allocation2 + $0x1b0] sm:$0xff] %v1707_v33 }
 0x2ea   : > { %2045 = vrot.lane.b32.xlu2 %v2028_v61, %s4186_s29  ;;  %1261 = vrot.lane.b32.xlu1 %v1247_v48, %s5609_s17 }
 0x2eb   : > { %2111 = vrot.lane.b32.xlu0 %v4564_v53, %s5598_s22 }
 0x2ec   : > { %v976_v22 = vpop.permute.xlu2 %975  ;;  %v1212_v36 = vpop.permute.xlu1 %1211 }
 0x2ed   : > { %v984_v10 = vrot.slane %v976_v22, 4  ;;  %v1220_v7 = vrot.slane %v1212_v36, 4  ;;  %v5160_v59 = vpop.permute.xlu0 %1381 }
 0x2ef   : > { %v991_v18 = vsel %vm434_vm2, %v983_v39, %v984_v10  ;;  %v993_v0 = vsel %vm5618_vm0, %v976_v22, %v984_v10  ;;  %v1227_v19 = vsel %vm434_vm2, %v1219_v34, %v1220_v7  ;;  %v1229_v8 = vsel %vm5621_vm7, %v1212_v36, %v1220_v7  ;;  %v1248_v34 = vld [vmem:[#allocation3 + $0x1c] sm:$0xff] }
 0x2f0   : > { %v992_v55 = vsel %vm5619_vm6, %v5048_v12, %v991_v18  ;;  %1006 = vst [vmem:[#allocation2 + $0x2c] sm:$0xf] %v993_v0  ;;  %v1228_v53 = vsel %vm5620_vm4, %v4993_v15, %v1227_v19  ;;  %v1612_v12 = vld [vmem:[#allocation3 + $0x34] sm:$0x33]  ;;  %v1625_v15 = vrot.slane %v5170_v46, 6  ;;  %vm5622_vm0 = vcmask 146432  }
 0x2f1   : > { %1005 = vst [vmem:[#allocation2 + $0x24] sm:$0xff] %v992_v55  ;;  %vm5623_vm6 = vmmov %vm5622_vm0  ;;  %vm5624_vm4 = vcmask 162816   ;;  %v1764_v18 = vrot.slane %v5016_v45, 4 }
 0x2f2   : > { %1241 = vst [vmem:[#allocation2 + $0x9c] sm:$0xff] %v1228_v53  ;;  %1215 = vrot.lane.b32.xlu2 %v4652_v62, %s4197_s14  ;;  %1267 = vrot.lane.b32.xlu1 %v1250_v17, %s5609_s17  ;;  %v1631_v62 = vrot.slane %v1612_v12, 6  ;;  %v1630_v52 = vrot.slane %v1625_v15, 4  ;;  %vm5625_vm7 = vmmov %vm5624_vm4 }
 0x2f3   : > { %1242 = vst [vmem:[#allocation2 + $0xa4] sm:$0xf] %v1229_v8  ;;  %1760 = vrot.lane.b32.xlu0 %v4569_v54, %s4199_s13  ;;  %s5628_s13 = smov 18  }
 0x2f4   : > { %v1445_v42 = vpop.permute.xlu2 %1444  ;;  %v5177_v1 = vpop.permute.xlu1 %1029 }
 0x2f5   : > { %v1453_v29 = vrot.slane %v1445_v42, 4  ;;  %v2108_v21 = vpop.permute.xlu0 %2107 }
 0x2f6   : > { %v2116_v51 = vrot.slane %v2108_v21, 4 }
 0x2f7   : > { %v1460_v23 = vsel %vm434_vm2, %v1452_v5, %v1453_v29  ;;  %v1462_v56 = vsel %vm5622_vm0, %v1445_v42, %v1453_v29  ;;  %vm5626_vm0 = vcmask 883712   ;;  %v2438_v42 = vld [vmem:[%s5536_s4] sm:$0xf] }
 0x2f8   : > { %v1461_v54 = vsel %vm5623_vm6, %v5063_v9, %v1460_v23  ;;  %1475 = vst [vmem:[#allocation2 + $0x11c] sm:$0xf] %v1462_v56  ;;  %v2123_v47 = vsel %vm434_vm2, %v2115_v50, %v2116_v51  ;;  %v2125_v58 = vsel %vm2120_vm9, %v2108_v21, %v2116_v51  ;;  %v1632_v9 = vsel %vm4535_vm14, %v1630_v52, %v1631_v62  ;;  %vm5627_vm6 = vmmov %vm5626_vm0 }
 0x2f9   : > { %1474 = vst [vmem:[#allocation2 + $0x114] sm:$0xff] %v1461_v54  ;;  %v2124_v16 = vsel %vm2120_vm9, %v5034_v32, %v2123_v47  ;;  %v1881_v32 = vrot.slane %v5007_v4, 4  ;;  %v1997_v21 = vrot.slane %v5027_v60, 4  ;;  %v1155_v62 = vrot.slane %v5078_v40, 4 }
 0x2fa   : > { %1566 = vrot.lane.b32.xlu2 %v4658_v2, %s4179_s16  ;;  %1877 = vrot.lane.b32.xlu1 %v4588_v6, %s4182_s19  ;;  %2137 = vst [vmem:[#allocation2 + $0x27c] sm:$0xff] %v2124_v16  ;;  %v1037_v16 = vrot.slane %v5177_v1, 4 }
 0x2fb   : > { %2138 = vst [vmem:[#allocation2 + $0x284] sm:$0xf] %v2125_v58  ;;  %1643 = vrot.lane.b32.xlu0 %v1632_v9, %s5607_s28 }
 0x2fc   : > { %v5199_v44 = vpop.permute.xlu2 %1692  ;;  %v5201_v41 = vpop.permute.xlu1 %1498 }
 0x2fd   : > { %v5203_v57 = vpop.permute.xlu0 %1095 }
 0x302   : > { %1991 = vrot.lane.b32.xlu2 %v4663_v25, %s5605_s26  ;;  %2229 = vrot.lane.b32.xlu1 %v4668_v27, %s4191_s12 }
 0x303   : > { %1993 = vrot.lane.b32.xlu0 %v4673_v28, %s5605_s26 }
 0x304   : > { %v1329_v6 = vpop.permute.xlu2 %1328  ;;  %v1874_v2 = vpop.permute.xlu1 %1873 }
 0x305   : > { %v1337_v13 = vrot.slane %v1329_v6, 4  ;;  %v1882_v33 = vrot.slane %v1874_v2, 4  ;;  %v5213_v61 = vpop.permute.xlu0 %1875 }
 0x307   : > { %v1343_v48 = vsel %vm434_vm2, %v1336_v11, %v1337_v13  ;;  %v1345_v25 = vsel %vm5624_vm4, %v1329_v6, %v1337_v13  ;;  %v1888_v22 = vsel %vm434_vm2, %v1881_v32, %v1882_v33  ;;  %v1890_v36 = vsel %vm5627_vm6, %v1874_v2, %v1882_v33 }
 0x308   : > { %v1344_v27 = vsel %vm5625_vm7, %v5080_v20, %v1343_v48  ;;  %1358 = vst [vmem:[#allocation2 + $0xe0] sm:$0xf] %v1345_v25  ;;  %v1889_v28 = vsel %vm5626_vm0, %v5007_v4, %v1888_v22  ;;  %v5629_v4 = vrot.slane %v4509_v26, 6  ;;  %vm5630_vm4 = vcmask 900096  }
 0x309   : > { %1357 = vst [vmem:[#allocation2 + $0xd8] sm:$0xff] %v1344_v27  ;;  %vm5631_vm7 = vmmov %vm5630_vm4  ;;  %vm5632_vm0 = vcmask 867328   ;;  %v1506_v27 = vrot.slane %v5201_v41, 4 }
 0x30a   : > { %1902 = vst [vmem:[#allocation2 + $0x204] sm:$0xff] %v1889_v28  ;;  %1263 = vrot.lane.b32.xlu2 %v1248_v34, %s5609_s17  ;;  %1448 = vrot.lane.b32.xlu1 %v4677_v43, %s5628_s13  ;;  %vm5633_vm6 = vmmov %vm5632_vm0 }
 0x30b   : > { %1903 = vst [vmem:[#allocation2 + $0x20c] sm:$0xf] %v1890_v36  ;;  %1637 = vrot.lane.b32.xlu0 %v4545_v37, %s5607_s28  ;;  %v1608_v37 = vld [vmem:[#allocation3 + $0xc] sm:$0xff] }
 0x30c   : > { %v5228_v39 = vpop.permute.xlu2 %977  ;;  %v5230_v20 = vpop.permute.xlu1 %2161  ;;  %v1620_v8 = vrot.slane %v1608_v37, 6 }
 0x30d   : > { %v5232_v10 = vpop.permute.xlu0 %2227 }
 0x30e   : > { %v1624_v5 = vrot.slane %v1620_v8, 4 }
 0x312   : > { %1322 = vrot.lane.b32.xlu2 %v4516_v30, %s5599_s23  ;;  %1633 = vrot.lane.b32.xlu1 %v5629_v4, %s5607_s28 }
 0x314   : > { %v5239_v7 = vpop.permute.xlu2 %2109  ;;  %v1757_v43 = vpop.permute.xlu1 %1756 }
 0x315   : > { %v1765_v0 = vrot.slane %v1757_v43, 4  ;;  %v5242_v19 = vpop.permute.xlu0 %1446 }
 0x317   : > { %v1772_v55 = vsel %vm434_vm2, %v1764_v18, %v1765_v0  ;;  %v1774_v53 = vsel %vm5630_vm4, %v1757_v43, %v1765_v0  ;;  %vm5640_vm4 = vcmask 343040  }
 0x318   : > { %v1773_v30 = vsel %vm5631_vm7, %v5016_v45, %v1772_v55  ;;  %1787 = vst [vmem:[#allocation2 + $0x1d0] sm:$0xf] %v1774_v53  ;;  %v1626_v45 = vsel %vm4535_vm14, %v1624_v5, %v1625_v15  ;;  %vm5634_vm14 = vcmask 891904   ;;  %v3867_v55 = vld [vmem:[#allocation2 + $0x228] sm:$0xf]  ;;  %v2287_v5 = vrot.slane %v5111_v24, 4  ;;  %vm5641_vm7 = vmmov %vm5640_vm4 }
 0x319   : > { %1786 = vst [vmem:[#allocation2 + $0x1c8] sm:$0xff] %v1773_v30 }
 0x31a   : > { %1635 = vrot.lane.b32.xlu2 %v1620_v8, %s5607_s28  ;;  %1332 = vrot.lane.b32.xlu1 %v4681_v38, %s5599_s23 }
 0x31c   : > { %v5251_v26 = vpop.permute.xlu2 %1758  ;;  %v5253_v17 = vpop.permute.xlu1 %2043 }
 0x31d   : > { %v5255_v12 = vpop.permute.xlu0 %1330 }
 0x322   : > { %2441 = vperm.xlu2 %4135, %v2438_v42   ;;  %1639 = vrot.lane.b32.xlu1 %v1626_v45, %s5607_s28 }
 0x324   : > { %v5265_v38 = vpop.permute.xlu2 %1641  ;;  %v1990_v29 = vpop.permute.xlu1 %1989 }
 0x325   : > { %v1998_v50 = vrot.slane %v1990_v29, 4  ;;  %v1150_v51 = vpop.permute.xlu0 %1149 }
 0x326   : > { %v1156_v23 = vrot.slane %v1150_v51, 4 }
 0x327   : > { %v2005_v56 = vsel %vm434_vm2, %v1997_v21, %v1998_v50  ;;  %v2007_v46 = vsel %vm5632_vm0, %v1990_v29, %v1998_v50  ;;  %v1700_v50 = vrot.slane %v5199_v44, 4  ;;  %vm5642_vm0 = vcmask 1041408  }
 0x328   : > { %v2006_v35 = vsel %vm5633_vm6, %v5027_v60, %v2005_v56  ;;  %2020 = vst [vmem:[#allocation2 + $0x248] sm:$0xf] %v2007_v46  ;;  %v1164_v15 = vsel %vm434_vm2, %v1155_v62, %v1156_v23  ;;  %v1166_v54 = vsel %vm1158_vm8, %v1150_v51, %v1156_v23  ;;  %v1934_v60 = vrot.slane %v5094_v31, 4 }
 0x329   : > { %2019 = vst [vmem:[#allocation2 + $0x240] sm:$0xff] %v2006_v35  ;;  %v1165_v47 = vsel %vm1158_vm8, %v5078_v40, %v1164_v15  ;;  %vm5643_vm6 = vcmask 179200  }
 0x32a   : > { %1177 = vst [vmem:[#allocation2 + $0x90] sm:$0x33] %v1165_v47 }
 0x32b   : > { %1178 = vst [vmem:[#allocation2 + $0x98] sm:$0x3] %v1166_v54 }
 0x32c   : > { %v1032_v58 = vpop.permute.xlu2 %1031  ;;  %v5277_v52 = vpop.permute.xlu1 %1213 }
 0x32d   : > { %v1038_v9 = vrot.slane %v1032_v58, 4  ;;  %v1929_v6 = vpop.permute.xlu0 %1928 }
 0x32e   : > { %v1935_v2 = vrot.slane %v1929_v6, 4 }
 0x32f   : > { %v1046_v32 = vsel %vm434_vm2, %v1037_v16, %v1038_v9  ;;  %v1048_v11 = vsel %vm1040_vm15, %v1032_v58, %v1038_v9  ;;  %v2051_v9 = vrot.slane %v5253_v17, 4 }
 0x330   : > { %v1047_v13 = vsel %vm1040_vm15, %v5177_v1, %v1046_v32  ;;  %1060 = vst [vmem:[#allocation2 + $0x5c] sm:$0x3] %v1048_v11  ;;  %v1942_v40 = vsel %vm434_vm2, %v1934_v60, %v1935_v2  ;;  %v1944_v33 = vsel %vm618_vm10, %v1929_v6, %v1935_v2  ;;  %v1818_v1 = vrot.slane %v5145_v14, 4  ;;  %vm5635_vm15 = vmmov %vm5634_vm14 }
 0x331   : > { %1059 = vst [vmem:[#allocation2 + $0x54] sm:$0x33] %v1047_v13  ;;  %v1943_v48 = vsel %vm618_vm10, %v5094_v31, %v1942_v40 }
 0x332   : > { %1955 = vst [vmem:[#allocation2 + $0x234] sm:$0x33] %v1943_v48 }
 0x333   : > { %1956 = vst [vmem:[#allocation2 + $0x23c] sm:$0x3] %v1944_v33 }
 0x334   : > { %v1501_v25 = vpop.permute.xlu2 %1500  ;;  %v5289_v22 = vpop.permute.xlu1 %1564 }
 0x335   : > { %v1507_v28 = vrot.slane %v1501_v25, 4  ;;  %v1813_v36 = vpop.permute.xlu0 %1812 }
 0x336   : > { %v1819_v34 = vrot.slane %v1813_v36, 4 }
 0x337   : > { %v1515_v4 = vsel %vm434_vm2, %v1506_v27, %v1507_v28  ;;  %v1517_v43 = vsel %vm1509_vm1, %v1501_v25, %v1507_v28 }
 0x338   : > { %v1516_v18 = vsel %vm1509_vm1, %v5201_v41, %v1515_v4  ;;  %1529 = vst [vmem:[#allocation2 + $0x14c] sm:$0x3] %v1517_v43  ;;  %v1826_v31 = vsel %vm434_vm2, %v1818_v1, %v1819_v34  ;;  %v1828_v0 = vsel %vm5634_vm14, %v1813_v36, %v1819_v34  ;;  %v2169_v41 = vrot.slane %v5230_v20, 4  ;;  %v4091_v43 = vld [vmem:[#allocation2 + $0x2d8] sm:$0xf0]  ;;  %vm5644_vm14 = vmmov %vm5643_vm6 }
 0x339   : > { %1528 = vst [vmem:[#allocation2 + $0x144] sm:$0x33] %v1516_v18  ;;  %v1827_v37 = vsel %vm5635_vm15, %v5145_v14, %v1826_v31  ;;  %v4070_v53 = vld [vmem:[#allocation2 + $0x230] sm:$0xf0]  ;;  %vm5636_vm1 = vcmask 1031168   ;;  %v1389_v36 = vrot.slane %v5160_v59, 4 }
 0x33a   : > { %1839 = vst [vmem:[#allocation2 + $0x1f8] sm:$0x33] %v1827_v37  ;;  %v3868_v30 = vor.u32 %v4070_v53, %v3867_v55  ;;  %vm5637_vm8 = vmmov %vm5636_vm1  ;;  %vm5645_vm15 = vcmask 154624  }
 0x33b   : > { %1840 = vst [vmem:[#allocation2 + $0x200] sm:$0x3] %v1828_v0 }
 0x33c   : > { %v2164_v8 = vpop.permute.xlu2 %2163  ;;  %v2282_v42 = vpop.permute.xlu1 %2281  ;;  %2995 = vmatpush.bf16.msrb.mxu1 %v3868_v30 }
 0x33d   : > { %v2170_v45 = vrot.slane %v2164_v8, 4  ;;  %v2288_v29 = vrot.slane %v2282_v42, 4  ;;  %v1695_v21 = vpop.permute.xlu0 %1694 }
 0x33e   : > { %v1701_v51 = vrot.slane %v1695_v21, 4 }
 0x33f   : > { %v2178_v14 = vsel %vm434_vm2, %v2169_v41, %v2170_v45  ;;  %v2180_v62 = vsel %vm2172_vm5, %v2164_v8, %v2170_v45  ;;  %v2296_v23 = vsel %vm434_vm2, %v2287_v5, %v2288_v29  ;;  %v2298_v35 = vsel %vm2290_vm3, %v2282_v42, %v2288_v29  ;;  %v3951_v8 = vld [vmem:[#allocation2 + $0x2d0] sm:$0xf] }
 0x340   : > { %v2179_v56 = vsel %vm2172_vm5, %v5230_v20, %v2178_v14  ;;  %2192 = vst [vmem:[#allocation2 + $0x2b4] sm:$0x3] %v2180_v62  ;;  %v2297_v46 = vsel %vm2290_vm3, %v5111_v24, %v2296_v23  ;;  %v1709_v15 = vsel %vm434_vm2, %v1700_v50, %v1701_v51  ;;  %v1711_v47 = vsel %vm5637_vm8, %v1695_v21, %v1701_v51 }
 0x341   : > { %2191 = vst [vmem:[#allocation2 + $0x2ac] sm:$0x33] %v2179_v56  ;;  %v1710_v54 = vsel %vm5636_vm1, %v5199_v44, %v1709_v15  ;;  %v916_v20 = vrot.slane %v5148_v49, 4  ;;  %vm5638_vm3 = vcmask 736256   ;;  %vm5646_vm1 = vmmov %vm5645_vm15  ;;  %v3952_v42 = vor.u32 %v4091_v43, %v3951_v8 }
 0x342   : > { %2309 = vst [vmem:[#allocation2 + $0x2e8] sm:$0x33] %v2297_v46  ;;  %vm5639_vm5 = vmmov %vm5638_vm3  ;;  %vm5647_vm8 = vcmask 162816   ;;  %v1103_v45 = vrot.slane %v5203_v57, 4  ;;  %v985_v51 = vrot.slane %v5228_v39, 4 }
 0x343   : > { %2310 = vst [vmem:[#allocation2 + $0x2f0] sm:$0x3] %v2298_v35 }
 0x344   : > { %1722 = vst [vmem:[#allocation2 + $0x1bc] sm:$0x33] %v1710_v54  ;;  %v2046_v58 = vpop.permute.xlu2 %2045  ;;  %v911_v16 = vpop.permute.xlu1 %910 }
 0x345   : > { %1723 = vst [vmem:[#allocation2 + $0x1c4] sm:$0x3] %v1711_v47  ;;  %v2052_v24 = vrot.slane %v2046_v58, 4  ;;  %v917_v6 = vrot.slane %v911_v16, 4  ;;  %v5318_v60 = vpop.permute.xlu0 %1265  ;;  %v4022_v47 = vld [vmem:[#allocation2 + $0xb0] sm:$0xf0] }
 0x346   : > { %v1273_v43 = vrot.slane %v5318_v60, 4 }
 0x347   : > { %v2060_v2 = vsel %vm434_vm2, %v2051_v9, %v2052_v24  ;;  %v2062_v44 = vsel %vm5638_vm3, %v2046_v58, %v2052_v24  ;;  %v925_v32 = vsel %vm434_vm2, %v916_v20, %v917_v6  ;;  %v927_v40 = vsel %vm5641_vm7, %v911_v16, %v917_v6  ;;  %v3663_v24 = vld [vmem:[#allocation2 + $0x90] sm:$0xf] }
 0x348   : > { %v2061_v11 = vsel %vm5639_vm5, %v5253_v17, %v2060_v2  ;;  %2074 = vst [vmem:[#allocation2 + $0x278] sm:$0x3] %v2062_v44  ;;  %v926_v13 = vsel %vm5640_vm4, %v5148_v49, %v925_v32  ;;  %v1221_v17 = vrot.slane %v5277_v52, 4  ;;  %vm5648_vm3 = vcmask 7168   ;;  %v4019_v2 = vld [vmem:[#allocation2 + $0x98] sm:$0xf0] }
 0x349   : > { %2073 = vst [vmem:[#allocation2 + $0x270] sm:$0x33] %v2061_v11  ;;  %v5328_v33 = vld [vmem:[#allocation2 + $0x2e8] sm:$0x33]  ;;  %vm5649_vm5 = vmmov %vm5648_vm3  ;;  %vm5650_vm4 = vcmask 318464   ;;  %v3664_v44 = vor.u32 %v4019_v2, %v3663_v24 }
 0x34a   : > { %938 = vst [vmem:[#allocation2 + $0x18] sm:$0x33] %v926_v13  ;;  %v2765_v48 = vunpack.c.l.b16 %v5328_v33  ;;  %vm5651_vm7 = vmmov %vm5650_vm4  ;;  %v4016_v11 = vld [vmem:[#allocation2 + $0x80] sm:$0xf0] }
 0x34b   : > { %939 = vst [vmem:[#allocation2 + $0x20] sm:$0x3] %v927_v40  ;;  %v3651_v40 = vld [vmem:[#allocation2 + $0x78] sm:$0xf] }
 0x34c   : > { %v1216_v25 = vpop.permute.xlu2 %1215  ;;  %v1384_v27 = vpop.permute.xlu1 %1383  ;;  %v2861_v28 = vpack.c.b16 %v2765_v48, %v2765_v48  ;;  %v3759_v48 = vld [vmem:[#allocation2 + $0x150] sm:$0xf] }
 0x34d   : > { %v1222_v1 = vrot.slane %v1216_v25, 4  ;;  %v1390_v34 = vrot.slane %v1384_v27, 4  ;;  %v5333_v4 = vpop.permute.xlu0 %1324 }
 0x34e   : > { %v2961_v49 = vsel %vm5642_vm0, %v2861_v28, 0  ;;  %v1335_v18 = vrot.slane %v5333_v4, 4  ;;  %vm5652_vm0 = vcmask 334848  }
 0x34f   : > { %v1230_v31 = vsel %vm434_vm2, %v1221_v17, %v1222_v1  ;;  %v1232_v0 = vsel %vm5643_vm6, %v1216_v25, %v1222_v1  ;;  %v1397_v37 = vsel %vm434_vm2, %v1389_v36, %v1390_v34  ;;  %3008 = vmatpush.bf16.msrb.mxu2 %v2961_v49  ;;  %v1399_v30 = vsel %vm5646_vm1, %v1384_v27, %v1390_v34  ;;  %vm5653_vm6 = vmmov %vm5652_vm0  ;;  %v4040_v49 = vld [vmem:[#allocation2 + $0x140] sm:$0xf0] }
 0x350   : > { %v1231_v55 = vsel %vm5644_vm14, %v5277_v52, %v1230_v31  ;;  %1244 = vst [vmem:[#allocation2 + $0xb0] sm:$0xf] %v1232_v0  ;;  %v1398_v53 = vsel %vm5645_vm15, %v5160_v59, %v1397_v37  ;;  %v1342_v5 = vsel %vm5647_vm8, %v5333_v4, %v1335_v18  ;;  %v1572_v59 = vrot.slane %v5289_v22, 4  ;;  %v3639_v37 = vld [vmem:[#allocation2 + $0x60] sm:$0xf] }
 0x351   : > { %1243 = vst [vmem:[#allocation2 + $0xa8] sm:$0xff] %v1231_v55  ;;  %v3652_v36 = vor.u32 %v4016_v11, %v3651_v40  ;;  %vm5658_vm8 = vcmask 900096  }
 0x352   : > { %1410 = vst [vmem:[#allocation2 + $0x108] sm:$0x33] %v1398_v53 }
 0x353   : > { %1411 = vst [vmem:[#allocation2 + $0x110] sm:$0x3] %v1399_v30  ;;  %3009 = vmatpush.bf16.msrb.mxu2 %v3952_v42  ;;  %v3747_v42 = vld [vmem:[#allocation2 + $0x138] sm:$0xf] }
 0x354   : > { %1356 = vst [vmem:[#allocation2 + $0xd4] sm:$0xc] %v1342_v5  ;;  %v1567_v41 = vpop.permute.xlu2 %1566  ;;  %v1098_v52 = vpop.permute.xlu1 %1097 }
 0x355   : > { %v1573_v29 = vrot.slane %v1567_v41, 4  ;;  %v1104_v21 = vrot.slane %v1098_v52, 4  ;;  %v980_v50 = vpop.permute.xlu0 %979 }
 0x356   : > { %v986_v14 = vrot.slane %v980_v50, 4 }
 0x357   : > { %v1580_v62 = vsel %vm434_vm2, %v1572_v59, %v1573_v29  ;;  %v1582_v23 = vsel %vm5648_vm3, %v1567_v41, %v1573_v29  ;;  %v1112_v56 = vsel %vm434_vm2, %v1103_v45, %v1104_v21  ;;  %v1114_v15 = vsel %vm5651_vm7, %v1098_v52, %v1104_v21  ;;  %v4010_v52 = vld [vmem:[#allocation2 + $0x50] sm:$0xf0]  ;;  %vm5659_vm3 = vmmov %vm5658_vm8 }
 0x358   : > { %v1581_v46 = vsel %vm5649_vm5, %v5289_v22, %v1580_v62  ;;  %1594 = vst [vmem:[#allocation2 + $0x164] sm:$0xf] %v1582_v23  ;;  %v1113_v35 = vsel %vm5650_vm4, %v5203_v57, %v1112_v56  ;;  %v3675_v54 = vld [vmem:[#allocation2 + $0xa8] sm:$0xf]  ;;  %v994_v58 = vsel %vm434_vm2, %v985_v51, %v986_v14  ;;  %v996_v9 = vsel %vm5653_vm6, %v980_v50, %v986_v14  ;;  %v2311_v57 = vld [vmem:[%s5535_s3] sm:$0xff] }
 0x359   : > { %1593 = vst [vmem:[#allocation2 + $0x15c] sm:$0xff] %v1581_v46  ;;  %v3676_v16 = vor.u32 %v4022_v47, %v3675_v54  ;;  %v995_v20 = vsel %vm5652_vm0, %v5228_v39, %v994_v58  ;;  %v2117_v39 = vrot.slane %v5239_v7, 4  ;;  %v1766_v41 = vrot.slane %v5251_v26, 4  ;;  %v3627_v62 = vld [vmem:[#allocation2 + $0x48] sm:$0xf] }
 0x35a   : > { %1125 = vst [vmem:[#allocation2 + $0x6c] sm:$0xff] %v1113_v35  ;;  %v3628_v56 = vor.u32 %v4010_v52, %v3627_v62  ;;  %v4007_v58 = vld [vmem:[#allocation2 + $0x38] sm:$0xf0]  ;;  %vm5660_vm5 = vcmask 883712   ;;  %vm5661_vm4 = vcmask 162816   ;;  %vm5663_vm0 = vcmask 1039360  }
 0x35b   : > { %1126 = vst [vmem:[#allocation2 + $0x74] sm:$0xf] %v1114_v15  ;;  %2969 = vmatpush.bf16.msra.mxu3 %v3676_v16  ;;  %vm5662_vm7 = vmmov %vm5660_vm5  ;;  %v1454_v62 = vrot.slane %v5242_v19, 4 }
 0x35c   : > { %1007 = vst [vmem:[#allocation2 + $0x30] sm:$0xff] %v995_v20  ;;  %v5367_v22 = vpop.permute.xlu2 %1991  ;;  %v1262_v6 = vpop.permute.xlu1 %1261  ;;  %vm5664_vm6 = vmmov %vm5663_vm0 }
 0x35d   : > { %1008 = vst [vmem:[#allocation2 + $0x38] sm:$0xf] %v996_v9  ;;  %v2112_v32 = vpop.permute.xlu0 %2111  ;;  %v1271_v55 = vrot.slane %v1262_v6, 4 }
 0x35e   : > { %v2118_v13 = vrot.slane %v2112_v32, 4  ;;  %2445 = vst [vmem:[#allocation1] ss:$4 sm:$0xff] %v2311_v57  ;;  %v1649_v57 = vrot.slane %v5265_v38, 4 }
 0x35f   : > { %2970 = vmatpush.bf16.msra.mxu3 %v3664_v44 }
 0x360   : > { %v4043_v25 = vld [vmem:[#allocation2 + $0x158] sm:$0xf0]  ;;  %v2126_v27 = vsel %vm434_vm2, %v2117_v39, %v2118_v13  ;;  %v2128_v28 = vsel %vm2120_vm9, %v2112_v32, %v2118_v13  ;;  %v4004_v13 = vld [vmem:[#allocation2 + $0x20] sm:$0xf0] }
 0x361   : > { %v3760_v17 = vor.u32 %v4043_v25, %v3759_v48  ;;  %v2127_v1 = vsel %vm2120_vm9, %v5239_v7, %v2126_v27  ;;  %2140 = vst [vmem:[#allocation2 + $0x290] sm:$0xf] %v2128_v28  ;;  %v4013_v34 = vld [vmem:[#allocation2 + $0x68] sm:$0xf0]  ;;  %v3748_v7 = vor.u32 %v4040_v49, %v3747_v42  ;;  %vm5654_vm9 = vcmask 171008  }
 0x362   : > { %2139 = vst [vmem:[#allocation2 + $0x288] sm:$0xff] %v2127_v1  ;;  %v3640_v8 = vor.u32 %v4013_v34, %v3639_v37  ;;  %vm5655_vm14 = vmmov %vm5654_vm9  ;;  %v4001_v25 = vld [vmem:[#allocation2 + $0x8] sm:$0xf0]  ;;  %v4018_v42 = vld [vmem:[#allocation2 + $0x94] sm:$0xf] }
 0x363   : > { %2971 = vmatpush.bf16.msra.mxu3 %v3652_v36  ;;  %2983 = vmatpush.bf16.msrb.mxu0 %v3760_v17  ;;  %vm5656_vm15 = vmmov %vm5654_vm9  ;;  %v3615_v15 = vld [vmem:[#allocation2 + $0x30] sm:$0xf]  ;;  %v4021_v27 = vld [vmem:[#allocation2 + $0xac] sm:$0xf]  ;;  %v2235_v17 = vrot.slane %v5232_v10, 4 }
 0x364   : > { %v1264_v31 = vpop.permute.xlu2 %1263  ;;  %v1268_v0 = vpop.permute.xlu1 %1267  ;;  %vm5657_vm1 = vmmov %vm5654_vm9  ;;  %v3616_v9 = vor.u32 %v4007_v58, %v3615_v15  ;;  %v3591_v36 = vld [vmem:[#allocation2] sm:$0xf]  ;;  %v3641_v58 = vld [vmem:[#allocation2 + $0x6c] sm:$0xf0] }
 0x365   : > { %v1272_v53 = vrot.slane %v1264_v31, 4  ;;  %v1274_v30 = vrot.slane %v1268_v0, 4  ;;  %v1761_v5 = vpop.permute.xlu0 %1760  ;;  %v3592_v49 = vor.u32 %v4001_v25, %v3591_v36  ;;  %v4006_v36 = vld [vmem:[#allocation2 + $0x34] sm:$0xf] }
 0x366   : > { %v1767_v45 = vrot.slane %v1761_v5, 4 }
 0x367   : > { %v1278_v59 = vsel %vm434_vm2, %v1271_v55, %v1272_v53  ;;  %v1280_v29 = vsel %vm5654_vm9, %v1264_v31, %v1272_v53  ;;  %v1281_v21 = vsel %vm434_vm2, %v1273_v43, %v1274_v30  ;;  %v1283_v50 = vsel %vm5655_vm14, %v1268_v0, %v1274_v30  ;;  %2972 = vmatpush.bf16.msra.mxu3 %v3640_v8  ;;  %v3677_v43 = vld [vmem:[#allocation2 + $0xb4] sm:$0xf0]  ;;  %vm5665_vm9 = vmmov %vm5663_vm0 }
 0x368   : > { %v1279_v51 = vsel %vm5656_vm15, %v1262_v6, %v1278_v59  ;;  %1293 = vst [vmem:[#allocation2 + $0xc8] sm:$0xf] %v1280_v29  ;;  %v1282_v14 = vsel %vm5657_vm1, %v5318_v60, %v1281_v21  ;;  %2984 = vmatpush.bf16.msrb.mxu0 %v3748_v7  ;;  %v1775_v23 = vsel %vm434_vm2, %v1766_v41, %v1767_v45  ;;  %v1883_v60 = vrot.slane %v5213_v61, 4  ;;  %v5412_v8 = vld.sshfl [vmem:[#allocation1] sm:$0xff pattern:$0x73625140] }
 0x369   : > { %1292 = vst [vmem:[#allocation2 + $0xc0] sm:$0xff] %v1279_v51  ;;  %v1776_v46 = vsel %vm5658_vm8, %v5251_v26, %v1775_v23  ;;  %v1777_v35 = vsel %vm5659_vm3, %v1761_v5, %v1767_v45  ;;  %v3603_v26 = vld [vmem:[#allocation2 + $0x18] sm:$0xf]  ;;  %v1999_v31 = vrot.slane %v5367_v22, 4  ;;  %v3680_v0 = vor.u32 %v4021_v27, %v3677_v43  ;;  %v4067_v41 = vld [vmem:[#allocation2 + $0x218] sm:$0xf0] }
 0x36a   : > { %1294 = vst [vmem:[#allocation2 + $0xcc] sm:$0x33] %v1282_v14  ;;  %v3604_v48 = vor.u32 %v4004_v13, %v3603_v26  ;;  %vm5666_vm14 = vcmask 711680   ;;  %vm5668_vm1 = vcmask 867328   ;;  %v3665_v29 = vld [vmem:[#allocation2 + $0x9c] sm:$0xf0] }
 0x36b   : > { %1295 = vst [vmem:[#allocation2 + $0xd4] sm:$0x3] %v1283_v50  ;;  %2973 = vmatpush.bf16.msra.mxu3 %v3628_v56  ;;  %vm5667_vm15 = vmmov %vm5666_vm14  ;;  %v3668_v50 = vor.u32 %v4018_v42, %v3665_v29  ;;  %v3843_v51 = vld [vmem:[#allocation2 + $0x1f8] sm:$0xf]  ;;  %v4064_v56 = vld [vmem:[#allocation2 + $0x200] sm:$0xf0] }
 0x36c   : > { %1788 = vst [vmem:[#allocation2 + $0x1d4] sm:$0xff] %v1776_v46  ;;  %v1323_v54 = vpop.permute.xlu2 %1322  ;;  %v1878_v47 = vpop.permute.xlu1 %1877  ;;  %vm5669_vm8 = vmmov %vm5668_vm1  ;;  %v3844_v46 = vor.u32 %v4064_v56, %v3843_v51  ;;  %vm5670_vm3 = vcmask 146432   ;;  %v3819_v13 = vld [vmem:[#allocation2 + $0x1c8] sm:$0xf]  ;;  %v4082_v43 = vld [vmem:[#allocation2 + $0x290] sm:$0xf0] }
 0x36d   : > { %1789 = vst [vmem:[#allocation2 + $0x1dc] sm:$0xf] %v1777_v35  ;;  %v1334_v16 = vrot.slane %v1323_v54, 4  ;;  %v1884_v20 = vrot.slane %v1878_v47, 4  ;;  %v1644_v24 = vpop.permute.xlu0 %1643  ;;  %v3915_v25 = vld [vmem:[#allocation2 + $0x288] sm:$0xf] }
 0x36e   : > { %v1650_v6 = vrot.slane %v1644_v24, 4  ;;  %v4003_v42 = vld [vmem:[#allocation2 + $0x1c] sm:$0xf]  ;;  %v4052_v29 = vld [vmem:[#allocation2 + $0x1a0] sm:$0xf0] }
 0x36f   : > { %v1340_v2 = vsel %vm434_vm2, %v1334_v16, %v1335_v18  ;;  %v1891_v44 = vsel %vm434_vm2, %v1883_v60, %v1884_v20  ;;  %v1893_v32 = vsel %vm5660_vm5, %v1878_v47, %v1884_v20  ;;  %2974 = vmatpush.bf16.msra.mxu3 %v3616_v9  ;;  %v4061_v47 = vld [vmem:[#allocation2 + $0x1e8] sm:$0xf0]  ;;  %vm5671_vm5 = vmmov %vm5670_vm3  ;;  %v3939_v16 = vld [vmem:[#allocation2 + $0x2b8] sm:$0xf] }
 0x370   : > { %v1341_v39 = vsel %vm5661_vm4, %v1323_v54, %v1340_v2  ;;  %v1892_v11 = vsel %vm5662_vm7, %v5213_v61, %v1891_v44  ;;  %1905 = vst [vmem:[#allocation2 + $0x218] sm:$0xf] %v1893_v32  ;;  %v1657_v40 = vsel %vm434_vm2, %v1649_v57, %v1650_v6  ;;  %v1659_v18 = vsel %vm5664_vm6, %v1644_v24, %v1650_v6  ;;  %v3831_v9 = vld [vmem:[#allocation2 + $0x1e0] sm:$0xf]  ;;  %v4012_v57 = vld [vmem:[#allocation2 + $0x64] sm:$0xf]  ;;  %vm5672_vm4 = vmmov %vm5663_vm0 }
 0x371   : > { %1355 = vst [vmem:[#allocation2 + $0xcc] sm:$0xcc] %v1341_v39  ;;  %v1658_v4 = vsel %vm5663_vm0, %v5265_v38, %v1657_v40  ;;  %v3832_v26 = vor.u32 %v4061_v47, %v3831_v9  ;;  %v3644_v6 = vor.u32 %v4012_v57, %v3641_v58  ;;  %v4085_v2 = vld [vmem:[#allocation2 + $0x2a8] sm:$0xf0]  ;;  %v3629_v32 = vld [vmem:[#allocation2 + $0x54] sm:$0xf0]  ;;  %vm5675_vm6 = vmmov %vm5672_vm4 }
 0x372   : > { %1904 = vst [vmem:[#allocation2 + $0x210] sm:$0xff] %v1892_v11  ;;  %v3927_v11 = vld [vmem:[#allocation2 + $0x2a0] sm:$0xf]  ;;  %vm5673_vm7 = vcmask 162816   ;;  %v3683_v47 = vld [vmem:[#allocation2 + $0xb0] sm:$0xf] }
 0x373   : > { %2975 = vmatpush.bf16.msra.mxu3 %v3604_v48  ;;  %1670 = vst [vmem:[#allocation2 + $0x198] sm:$0xff] %v1658_v4  ;;  %v4058_v44 = vld [vmem:[#allocation2 + $0x1d0] sm:$0xf0]  ;;  %v3928_v40 = vor.u32 %v4085_v2, %v3927_v11  ;;  %v4009_v48 = vld [vmem:[#allocation2 + $0x4c] sm:$0xf]  ;;  %vm5674_vm0 = vmmov %vm5673_vm7 }
 0x374   : > { %1671 = vst [vmem:[#allocation2 + $0x1a0] sm:$0xf] %v1659_v18  ;;  %v5401_v28 = vpop.permute.xlu2 %1635  ;;  %v2230_v61 = vpop.permute.xlu1 %2229  ;;  %v3820_v4 = vor.u32 %v4058_v44, %v3819_v13  ;;  %v3632_v18 = vor.u32 %v4009_v48, %v3629_v32  ;;  %v4023_v9 = vld [vmem:[#allocation2 + $0xb8] sm:$0xf0]  ;;  %v3879_v2 = vld [vmem:[#allocation2 + $0x240] sm:$0xf] }
 0x375   : > { %v1646_v1 = vrot.slane %v5401_v28, 4  ;;  %v2236_v34 = vrot.slane %v2230_v61, 4  ;;  %v1994_v38 = vpop.permute.xlu0 %1993  ;;  %v3684_v57 = vor.u32 %v4023_v9, %v3683_v47  ;;  %v4020_v11 = vld [vmem:[#allocation2 + $0xa0] sm:$0xf0]  ;;  %v3953_v13 = vld [vmem:[#allocation2 + $0x2dc] sm:$0xf0] }
 0x376   : > { %v2000_v37 = vrot.slane %v1994_v38, 4  ;;  %v5448_v47 = vld.sshfl [vmem:[#allocation1 + $0x10] sm:$0xff pattern:$0x73625140] }
 0x377   : > { %v1653_v55 = vsel %vm5665_vm9, %v5401_v28, %v1646_v1  ;;  %v2244_v53 = vsel %vm434_vm2, %v2235_v17, %v2236_v34  ;;  %v2246_v30 = vsel %vm5666_vm14, %v2230_v61, %v2236_v34  ;;  %2976 = vmatpush.bf16.msra.mxu3 %v3592_v49  ;;  %v4055_v61 = vld [vmem:[#allocation2 + $0x1b8] sm:$0xf0]  ;;  %v4037_v49 = vld [vmem:[#allocation2 + $0x128] sm:$0xf0]  ;;  %v3723_v28 = vld [vmem:[#allocation2 + $0x108] sm:$0xf] }
 0x378   : > { %1667 = vst [vmem:[#allocation2 + $0x188] sm:$0xc] %v1653_v55  ;;  %v2245_v5 = vsel %vm5667_vm15, %v5232_v10, %v2244_v53  ;;  %v2008_v7 = vsel %vm434_vm2, %v1999_v31, %v2000_v37  ;;  %v2010_v59 = vsel %vm5669_vm8, %v1994_v38, %v2000_v37  ;;  %v3653_v10 = vld [vmem:[#allocation2 + $0x84] sm:$0xf0]  ;;  %v3807_v31 = vld [vmem:[#allocation2 + $0x1b0] sm:$0xf]  ;;  %vm5677_vm15 = vmmov %vm5672_vm4 }
 0x379   : > { %2257 = vst [vmem:[#allocation2 + $0x2c4] sm:$0xff] %v2245_v5  ;;  %v3855_v52 = vld [vmem:[#allocation2 + $0x210] sm:$0xf]  ;;  %v2009_v45 = vsel %vm5668_vm1, %v5367_v22, %v2008_v7  ;;  %v4015_v22 = vld [vmem:[#allocation2 + $0x7c] sm:$0xf]  ;;  %v3808_v55 = vor.u32 %v4055_v61, %v3807_v31  ;;  %vm5676_vm9 = vcmask 1041408  }
 0x37a   : > { %2258 = vst [vmem:[#allocation2 + $0x2cc] sm:$0xf] %v2246_v30  ;;  %2977 = vmatmul.bf16.vlgmr.msra.gmra.mxu3 %v5412_v8  ;;  %v3856_v21 = vor.u32 %v4067_v41, %v3855_v52  ;;  %v3656_v35 = vor.u32 %v4015_v22, %v3653_v10  ;;  %v3617_v37 = vld [vmem:[#allocation2 + $0x3c] sm:$0xf0]  ;;  %v3903_v30 = vld [vmem:[#allocation2 + $0x270] sm:$0xf]  ;;  %vm5678_vm1 = vmmov %vm5676_vm9 }
 0x37b   : > { %3021 = vmatpush.bf16.msrb.mxu3 %v3680_v0  ;;  %2021 = vst [vmem:[#allocation2 + $0x24c] sm:$0xff] %v2009_v45  ;;  %v3916_v0 = vor.u32 %v4082_v43, %v3915_v25  ;;  %v3620_v53 = vor.u32 %v4006_v36, %v3617_v37  ;;  %v4034_v41 = vld [vmem:[#allocation2 + $0x110] sm:$0xf0]  ;;  %v4079_v7 = vld [vmem:[#allocation2 + $0x278] sm:$0xf0]  ;;  %v1338_v52 = vrot.slane %v5255_v12, 4 }
 0x37c   : > { %2996 = vmatpush.bf16.msrb.mxu1 %v3856_v21  ;;  %2022 = vst [vmem:[#allocation2 + $0x254] sm:$0xf] %v2010_v59  ;;  %v1449_v14 = vpop.permute.xlu1 %1448  ;;  %v3724_v59 = vor.u32 %v4034_v41, %v3723_v28  ;;  %v3904_v21 = vor.u32 %v4079_v7, %v3903_v30  ;;  %v5440_v25 = vld.sshfl [vmem:[#allocation1 + $0x18] sm:$0xff pattern:$0x73625140]  ;;  %vm2957_vm14 = vcmask 949248  }
 0x37d   : > { %v1455_v23 = vrot.slane %v1449_v14, 4  ;;  %v3699_v61 = vld [vmem:[#allocation2 + $0xd8] sm:$0xf]  ;;  %v3659_v43 = vld [vmem:[#allocation2 + $0x80] sm:$0xf] }
 0x37e   : > { %v4045_v30 = vld [vmem:[#allocation2 + $0x16c] sm:$0xf]  ;;  %v3647_v41 = vld [vmem:[#allocation2 + $0x68] sm:$0xf]  ;;  %v3869_v7 = vld [vmem:[#allocation2 + $0x234] sm:$0xf0] }
 0x37f   : > { %3022 = vmatpush.bf16.msrb.mxu3 %v3668_v50  ;;  %v1463_v15 = vsel %vm434_vm2, %v1454_v62, %v1455_v23  ;;  %v1465_v54 = vsel %vm5670_vm3, %v1449_v14, %v1455_v23  ;;  %v3605_v50 = vld [vmem:[#allocation2 + $0x24] sm:$0xf0]  ;;  %v4031_v14 = vld [vmem:[#allocation2 + $0xf8] sm:$0xf0]  ;;  %v4076_v62 = vld [vmem:[#allocation2 + $0x260] sm:$0xf0]  ;;  %v2766_v23 = vunpack.c.h.b16 %v5328_v33 }
 0x380   : > { %v1464_v60 = vsel %vm5671_vm5, %v5242_v19, %v1463_v15  ;;  %1477 = vst [vmem:[#allocation2 + $0x128] sm:$0xf] %v1465_v54  ;;  %2997 = vmatpush.bf16.msrb.mxu1 %v3844_v46  ;;  %v4088_v20 = vld [vmem:[#allocation2 + $0x2c0] sm:$0xf0]  ;;  %v3608_v10 = vor.u32 %v4003_v42, %v3605_v50  ;;  %v3711_v46 = vld [vmem:[#allocation2 + $0xf0] sm:$0xf]  ;;  %vm5686_vm5 = vmmov %vm5674_vm0 }
 0x381   : > { %1476 = vst [vmem:[#allocation2 + $0x120] sm:$0xff] %v1464_v60  ;;  %v3940_v24 = vor.u32 %v4088_v20, %v3939_v16  ;;  %v3891_v54 = vld [vmem:[#allocation2 + $0x258] sm:$0xf]  ;;  %v3712_v58 = vor.u32 %v4031_v14, %v3711_v46  ;;  %v4000_v33 = vld [vmem:[#allocation2 + $0x4] sm:$0xf]  ;;  %v1638_v16 = vpop.permute.xlu0 %1637  ;;  %vm5685_vm3 = vcmask 891904  }
 0x382   : > { %v3892_v60 = vor.u32 %v4076_v62, %v3891_v54  ;;  %v1647_v44 = vrot.slane %v1638_v16, 4  ;;  %v3941_v37 = vld [vmem:[#allocation2 + $0x2c4] sm:$0xf0]  ;;  %v4042_v14 = vld [vmem:[#allocation2 + $0x154] sm:$0xf] }
 0x383   : > { %3023 = vmatpush.bf16.msrb.mxu3 %v3656_v35  ;;  %3010 = vmatpush.bf16.msrb.mxu2 %v3940_v24  ;;  %v3593_v35 = vld [vmem:[#allocation2 + $0xc] sm:$0xf0]  ;;  %v4073_v24 = vld [vmem:[#allocation2 + $0x248] sm:$0xf0] }
 0x384   : > { %2998 = vmatpush.bf16.msrb.mxu1 %v3832_v26  ;;  %v1634_v39 = vpop.permute.xlu1 %1633  ;;  %v3596_v20 = vor.u32 %v4000_v33, %v3593_v35  ;;  %v2862_v26 = vpack.c.b16 %v2766_v23, %v2766_v23  ;;  %v4069_v62 = vld [vmem:[#allocation2 + $0x22c] sm:$0xf]  ;;  %v3635_v46 = vld [vmem:[#allocation2 + $0x50] sm:$0xf]  ;;  %v3749_v35 = vld [vmem:[#allocation2 + $0x144] sm:$0xf0] }
 0x385   : > { %v1645_v19 = vrot.slane %v1634_v39, 4  ;;  %v3623_v33 = vld [vmem:[#allocation2 + $0x38] sm:$0xf] }
 0x387   : > { %3024 = vmatpush.bf16.msrb.mxu3 %v3644_v6  ;;  %v1651_v27 = vsel %vm434_vm2, %v1645_v19, %v1646_v1  ;;  %3011 = vmatpush.bf16.msrb.mxu2 %v3928_v40  ;;  %v3795_v1 = vld [vmem:[#allocation2 + $0x198] sm:$0xf]  ;;  %v4017_v40 = vld [vmem:[#allocation2 + $0x88] sm:$0xf0] }
 0x388   : > { %v1652_v17 = vsel %vm5672_vm4, %v1634_v39, %v1651_v27  ;;  %2999 = vmatpush.bf16.msrb.mxu1 %v3820_v4  ;;  %v3735_v34 = vld [vmem:[#allocation2 + $0x120] sm:$0xf]  ;;  %v3796_v51 = vor.u32 %v4052_v29, %v3795_v1  ;;  %v3671_v6 = vld [vmem:[#allocation2 + $0x98] sm:$0xf]  ;;  %v3880_v39 = vor.u32 %v4073_v24, %v3879_v2  ;;  %v3660_v31 = vor.u32 %v4017_v40, %v3659_v43  ;;  %v4087_v1 = vld [vmem:[#allocation2 + $0x2bc] sm:$0xf] }
 0x389   : > { %1666 = vst [vmem:[#allocation2 + $0x180] sm:$0xcc] %v1652_v17  ;;  %v3736_v38 = vor.u32 %v4037_v49, %v3735_v34  ;;  %v3672_v19 = vor.u32 %v4020_v11, %v3671_v6  ;;  %v4090_v34 = vld [vmem:[#allocation2 + $0x2d4] sm:$0xf]  ;;  %v3761_v29 = vld [vmem:[#allocation2 + $0x15c] sm:$0xf0] }
 0x38a   : > { %v3956_v49 = vor.u32 %v4090_v34, %v3953_v13  ;;  %v3764_v23 = vor.u32 %v4042_v14, %v3761_v29  ;;  %v4036_v2 = vld [vmem:[#allocation2 + $0x124] sm:$0xf]  ;;  %v3737_v11 = vld [vmem:[#allocation2 + $0x12c] sm:$0xf0]  ;;  %v3893_v34 = vld [vmem:[#allocation2 + $0x264] sm:$0xf0] }
 0x38b   : > { %3025 = vmatpush.bf16.msrb.mxu3 %v3632_v18  ;;  %2985 = vmatpush.bf16.msrb.mxu0 %v3736_v38  ;;  %v2964_v18 = vsel %vm5676_vm9, %v2862_v26, 0  ;;  %v4025_v38 = vld [vmem:[#allocation2 + $0xc8] sm:$0xf0]  ;;  %v4008_v26 = vld [vmem:[#allocation2 + $0x40] sm:$0xf0]  ;;  %v3740_v13 = vor.u32 %v4036_v2, %v3737_v11 }
 0x38c   : > { %3012 = vmatpush.bf16.msrb.mxu2 %v3916_v0  ;;  %3000 = vmatpush.bf16.msrb.mxu1 %v3808_v55  ;;  %v1333_v5 = vpop.permute.xlu1 %1332  ;;  %v3773_v0 = vld [vmem:[#allocation2 + $0x174] sm:$0xf0]  ;;  %v3687_v55 = vld [vmem:[#allocation2 + $0xc0] sm:$0xf]  ;;  %v4092_v14 = vld [vmem:[#allocation2 + $0x2e0] sm:$0xf0] }
 0x38d   : > { %v1339_v45 = vrot.slane %v1333_v5, 4  ;;  %v3688_v28 = vor.u32 %v4025_v38, %v3687_v55  ;;  %v3776_v42 = vor.u32 %v4045_v30, %v3773_v0  ;;  %v3725_v43 = vld [vmem:[#allocation2 + $0x114] sm:$0xf0]  ;;  %v4060_v38 = vld [vmem:[#allocation2 + $0x1e4] sm:$0xf] }
 0x38e   : > { %v4075_v55 = vld [vmem:[#allocation2 + $0x25c] sm:$0xf]  ;;  %v4044_v2 = vld [vmem:[#allocation2 + $0x160] sm:$0xf0] }
 0x38f   : > { %3026 = vmatpush.bf16.msrb.mxu3 %v3620_v53  ;;  %v1346_v56 = vsel %vm434_vm2, %v1338_v52, %v1339_v45  ;;  %v1348_v22 = vsel %vm5673_vm7, %v1333_v5, %v1339_v45  ;;  %2986 = vmatpush.bf16.msrb.mxu0 %v3724_v59  ;;  %v4014_v53 = vld [vmem:[#allocation2 + $0x70] sm:$0xf0]  ;;  %v3944_v5 = vor.u32 %v4087_v1, %v3941_v37  ;;  %v4011_v52 = vld [vmem:[#allocation2 + $0x58] sm:$0xf0]  ;;  %v3713_v1 = vld [vmem:[#allocation2 + $0xfc] sm:$0xf0] }
 0x390   : > { %3013 = vmatpush.bf16.msrb.mxu2 %v3904_v21  ;;  %v1347_v15 = vsel %vm5674_vm0, %v5255_v12, %v1346_v56  ;;  %1360 = vst [vmem:[#allocation2 + $0xec] sm:$0xf] %v1348_v22  ;;  %3001 = vmatpush.bf16.msrb.mxu1 %v3796_v51  ;;  %v3648_v45 = vor.u32 %v4014_v53, %v3647_v41  ;;  %v5445_v59 = vld.sshfl [vmem:[#allocation1 + $0x8] sm:$0xff pattern:$0x73625140]  ;;  %vm5687_vm7 = vmmov %vm5672_vm4 }
 0x391   : > { %1359 = vst [vmem:[#allocation2 + $0xe4] sm:$0xff] %v1347_v15  ;;  %v3783_v21 = vld [vmem:[#allocation2 + $0x180] sm:$0xf]  ;;  %v3929_v51 = vld [vmem:[#allocation2 + $0x2ac] sm:$0xf0]  ;;  %v3872_v56 = vor.u32 %v4069_v62, %v3869_v7  ;;  %v3636_v54 = vor.u32 %v4011_v52, %v3635_v46  ;;  %vm5688_vm0 = vmmov %vm5685_vm3 }
 0x392   : > { %v4084_v22 = vld [vmem:[#allocation2 + $0x2a4] sm:$0xf]  ;;  %v3599_v53 = vld [vmem:[#allocation2 + $0x8] sm:$0xf]  ;;  %v4030_v41 = vld [vmem:[#allocation2 + $0xf4] sm:$0xf] }
 0x393   : > { %3027 = vmatpush.bf16.msrb.mxu3 %v3608_v10  ;;  %2987 = vmatpush.bf16.msrb.mxu0 %v3712_v58  ;;  %v3932_v15 = vor.u32 %v4084_v22, %v3929_v51  ;;  %v4066_v58 = vld [vmem:[#allocation2 + $0x214] sm:$0xf]  ;;  %v4057_v7 = vld [vmem:[#allocation2 + $0x1cc] sm:$0xf] }
 0x394   : > { %3014 = vmatpush.bf16.msrb.mxu2 %v3892_v60  ;;  %v1640_v12 = vpop.permute.xlu1 %1639  ;;  %v4081_v60 = vld [vmem:[#allocation2 + $0x28c] sm:$0xf] }
 0x395   : > { %v1648_v32 = vrot.slane %v1640_v12, 4 }
 0x397   : > { %3028 = vmatpush.bf16.msrb.mxu3 %v3596_v20  ;;  %v1654_v48 = vsel %vm434_vm2, %v1647_v44, %v1648_v32  ;;  %v1656_v4 = vsel %vm5675_vm6, %v1640_v12, %v1648_v32  ;;  %v3857_v20 = vld [vmem:[#allocation2 + $0x21c] sm:$0xf0]  ;;  %v3624_v12 = vor.u32 %v4008_v26, %v3623_v33  ;;  %v4063_v44 = vld [vmem:[#allocation2 + $0x1fc] sm:$0xf]  ;;  %v4078_v32 = vld [vmem:[#allocation2 + $0x274] sm:$0xf] }
 0x398   : > { %3015 = vmatpush.bf16.msrb.mxu2 %v3880_v39  ;;  %v1655_v27 = vsel %vm5677_vm15, %v1638_v16, %v1654_v48  ;;  %1669 = vst [vmem:[#allocation2 + $0x194] sm:$0xf] %v1656_v4  ;;  %v4028_v36 = vld [vmem:[#allocation2 + $0xe0] sm:$0xf0]  ;;  %v4039_v16 = vld [vmem:[#allocation2 + $0x13c] sm:$0xf]  ;;  %v3860_v24 = vor.u32 %v4066_v58, %v3857_v20  ;;  %vm5692_vm15 = vmmov %vm5678_vm1 }
 0x399   : > { %1668 = vst [vmem:[#allocation2 + $0x18c] sm:$0xff] %v1655_v27  ;;  %v3700_v17 = vor.u32 %v4028_v36, %v3699_v61  ;;  %v3752_v9 = vor.u32 %v4039_v16, %v3749_v35  ;;  %v3611_v39 = vld [vmem:[#allocation2 + $0x20] sm:$0xf]  ;;  %v4005_v4 = vld [vmem:[#allocation2 + $0x28] sm:$0xf0]  ;;  %vm5689_vm6 = vcmask 883712  }
 0x39a   : > { %3029 = vmatmul.bf16.vlgmr.msrb.gmra.mxu3 %v5412_v8  ;;  %v3905_v48 = vld [vmem:[#allocation2 + $0x27c] sm:$0xf0]  ;;  %v3612_v61 = vor.u32 %v4005_v4, %v3611_v39  ;;  %v4033_v36 = vld [vmem:[#allocation2 + $0x10c] sm:$0xf]  ;;  %v3701_v51 = vld [vmem:[#allocation2 + $0xe4] sm:$0xf0] }
 0x39b   : > { %3073 = vmatpush.bf16.msra.mxu3 %v3684_v57  ;;  %3961 = vmatmul.msk.bf16.vlgmr.msrb.gmra.mxu2 %vm2957_vm14, %v5440_v25  ;;  %v3917_v57 = vld [vmem:[#allocation2 + $0x294] sm:$0xf0]  ;;  %v3908_v27 = vor.u32 %v4078_v32, %v3905_v48  ;;  %v3728_v0 = vor.u32 %v4033_v36, %v3725_v43  ;;  %v4024_v33 = vld [vmem:[#allocation2 + $0xc4] sm:$0xf]  ;;  %v3797_v16 = vld [vmem:[#allocation2 + $0x1a4] sm:$0xf0] }
 0x39c   : > { %3060 = vmatpush.bf16.msra.mxu2 %v2964_v18  ;;  %2988 = vmatpush.bf16.msrb.mxu0 %v3700_v17  ;;  %v3920_v6 = vor.u32 %v4081_v60, %v3917_v57  ;;  %v2437_v18 = vld [vmem:[#allocation2 + $0x2f0] sm:$0x3]  ;;  %v3959_v35 = vld [vmem:[#allocation2 + $0x2d8] sm:$0xf]  ;;  %v4047_v60 = vld [vmem:[#allocation2 + $0x178] sm:$0xf0] }
 0x39d   : > { %v3833_v17 = vld [vmem:[#allocation2 + $0x1ec] sm:$0xf0]  ;;  %v3960_v58 = vor.u32 %v4092_v14, %v3959_v35  ;;  %v4089_v20 = vld [vmem:[#allocation2 + $0x2c8] sm:$0xf0]  ;;  %v3947_v26 = vld [vmem:[#allocation2 + $0x2c0] sm:$0xf] }
 0x39e   : > { %v3836_v37 = vor.u32 %v4060_v38, %v3833_v17  ;;  %v4048_v32 = vld [vmem:[#allocation2 + $0x184] sm:$0xf]  ;;  %v4086_v39 = vld [vmem:[#allocation2 + $0x2b0] sm:$0xf0]  ;;  %v3935_v4 = vld [vmem:[#allocation2 + $0x2a8] sm:$0xf] }
 0x39f   : > { %3074 = vmatpush.bf16.msra.mxu3 %v3672_v19  ;;  %v3845_v19 = vld [vmem:[#allocation2 + $0x204] sm:$0xf0]  ;;  %v3923_v36 = vld [vmem:[#allocation2 + $0x290] sm:$0xf]  ;;  %v3755_v17 = vld [vmem:[#allocation2 + $0x140] sm:$0xf] }
 0x3a0   : > { %3061 = vmatpush.bf16.msra.mxu2 %v3956_v49  ;;  %2989 = vmatpush.bf16.msrb.mxu0 %v3688_v28  ;;  %v4049_v50 = vld [vmem:[#allocation2 + $0x188] sm:$0xf0]  ;;  %v3848_v40 = vor.u32 %v4063_v44, %v3845_v19  ;;  %v4002_v49 = vld [vmem:[#allocation2 + $0x10] sm:$0xf0]  ;;  %v3896_v28 = vor.u32 %v4075_v55, %v3893_v34  ;;  %v4071_v44 = vld [vmem:[#allocation2 + $0x238] sm:$0xf0] }
 0x3a1   : > { %v3784_v10 = vor.u32 %v4049_v50, %v3783_v21  ;;  %v3600_v30 = vor.u32 %v4002_v49, %v3599_v53  ;;  %v4072_v21 = vld [vmem:[#allocation2 + $0x244] sm:$0xf]  ;;  %v3767_v19 = vld [vmem:[#allocation2 + $0x158] sm:$0xf]  ;;  %v4083_v38 = vld [vmem:[#allocation2 + $0x298] sm:$0xf0] }
 0x3a2   : > { %v4068_v34 = vld [vmem:[#allocation2 + $0x220] sm:$0xf0]  ;;  %v3911_v55 = vld [vmem:[#allocation2 + $0x278] sm:$0xf]  ;;  %v4038_v53 = vld [vmem:[#allocation2 + $0x130] sm:$0xf0] }
 0x3a3   : > { %3075 = vmatpush.bf16.msra.mxu3 %v3660_v31  ;;  %2990 = vmatmul.bf16.vlgmr.msrb.gmra.mxu0 %v5445_v59  ;;  %v2767_v31 = vunpack.c.l.b16 %v2437_v18  ;;  %v3936_v18 = vor.u32 %v4086_v39, %v3935_v4  ;;  %v4032_v14 = vld [vmem:[#allocation2 + $0x100] sm:$0xf0]  ;;  %vm5690_vm9 = vmmov %vm5689_vm6 }
 0x3a4   : > { %3034 = vmatpush.bf16.msra.mxu0 %v3776_v42  ;;  %3062 = vmatpush.bf16.msra.mxu2 %v3944_v5  ;;  %v3821_v42 = vld [vmem:[#allocation2 + $0x1d4] sm:$0xf0]  ;;  %v3881_v5 = vld [vmem:[#allocation2 + $0x24c] sm:$0xf0] }
 0x3a5   : > { %3002 = vmatpush.bf16.msrb.mxu1 %v3784_v10  ;;  %v2863_v52 = vpack.c.b16 %v2767_v31, %v2767_v31  ;;  %v3824_v29 = vor.u32 %v4057_v7, %v3821_v42  ;;  %v3884_v50 = vor.u32 %v4072_v21, %v3881_v5  ;;  %v3809_v10 = vld [vmem:[#allocation2 + $0x1bc] sm:$0xf0]  ;;  %v3924_v31 = vor.u32 %v4083_v38, %v3923_v36  ;;  %v4080_v42 = vld [vmem:[#allocation2 + $0x280] sm:$0xf0]  ;;  %v4062_v7 = vld [vmem:[#allocation2 + $0x1f0] sm:$0xf0] }
 0x3a6   : > { %v3912_v5 = vor.u32 %v4080_v42, %v3911_v55 }
 0x3a7   : > { %3076 = vmatpush.bf16.msra.mxu3 %v3648_v45  ;;  %v3716_v45 = vor.u32 %v4030_v41, %v3713_v1  ;;  %v2967_v62 = vsel %vm5678_vm1, %v2863_v52, 0  ;;  %v3731_v41 = vld [vmem:[#allocation2 + $0x110] sm:$0xf]  ;;  %v4077_v52 = vld [vmem:[#allocation2 + $0x268] sm:$0xf0] }
 0x3a8   : > { %3035 = vmatpush.bf16.msra.mxu0 %v3764_v23  ;;  %3063 = vmatpush.bf16.msra.mxu2 %v3932_v15  ;;  %v4027_v23 = vld [vmem:[#allocation2 + $0xdc] sm:$0xf]  ;;  %v3689_v15 = vld [vmem:[#allocation2 + $0xcc] sm:$0xf0] }
 0x3a9   : > { %3047 = vmatpush.bf16.msra.mxu1 %v3872_v56  ;;  %v4054_v56 = vld [vmem:[#allocation2 + $0x1b4] sm:$0xf]  ;;  %v3704_v22 = vor.u32 %v4027_v23, %v3701_v51  ;;  %v3899_v51 = vld [vmem:[#allocation2 + $0x260] sm:$0xf] }
 0x3aa   : > { %3003 = vmatmul.bf16.vlgmr.msrb.gmra.mxu1 %v5448_v47  ;;  %v3812_v46 = vor.u32 %v4054_v56, %v3809_v10  ;;  %v3900_v10 = vor.u32 %v4077_v52, %v3899_v51  ;;  %v4074_v23 = vld [vmem:[#allocation2 + $0x250] sm:$0xf0]  ;;  %v3719_v56 = vld [vmem:[#allocation2 + $0xf8] sm:$0xf] }
 0x3ab   : > { %3077 = vmatpush.bf16.msra.mxu3 %v3636_v54  ;;  %v4051_v54 = vld [vmem:[#allocation2 + $0x19c] sm:$0xf] }
 0x3ac   : > { %3036 = vmatpush.bf16.msra.mxu0 %v3752_v9  ;;  %3064 = vmatpush.bf16.msra.mxu2 %v3920_v6  ;;  %v3800_v9 = vor.u32 %v4051_v54, %v3797_v16  ;;  %v3785_v6 = vld [vmem:[#allocation2 + $0x18c] sm:$0xf0] }
 0x3ad   : > { %3048 = vmatpush.bf16.msra.mxu1 %v3860_v24  ;;  %v3779_v24 = vld [vmem:[#allocation2 + $0x170] sm:$0xf]  ;;  %v3788_v11 = vor.u32 %v4048_v32, %v3785_v6  ;;  %v4053_v6 = vld [vmem:[#allocation2 + $0x1a8] sm:$0xf0] }
 0x3ae   : > { %v3780_v57 = vor.u32 %v4047_v60, %v3779_v24  ;;  %v4056_v60 = vld [vmem:[#allocation2 + $0x1c0] sm:$0xf0]  ;;  %v4026_v24 = vld [vmem:[#allocation2 + $0xd0] sm:$0xf0] }
 0x3af   : > { %3078 = vmatpush.bf16.msra.mxu3 %v3624_v12  ;;  %v3948_v12 = vor.u32 %v4089_v20, %v3947_v26  ;;  %v3815_v20 = vld [vmem:[#allocation2 + $0x1b8] sm:$0xf] }
 0x3b0   : > { %3037 = vmatpush.bf16.msra.mxu0 %v3740_v13  ;;  %3065 = vmatpush.bf16.msra.mxu2 %v3908_v27  ;;  %v3875_v13 = vld [vmem:[#allocation2 + $0x230] sm:$0xf]  ;;  %v4041_v27 = vld [vmem:[#allocation2 + $0x148] sm:$0xf0] }
 0x3b1   : > { %3049 = vmatpush.bf16.msra.mxu1 %v3848_v40  ;;  %v3768_v40 = vor.u32 %v4044_v2, %v3767_v19  ;;  %v3876_v48 = vor.u32 %v4071_v44, %v3875_v13  ;;  %v3756_v49 = vor.u32 %v4041_v27, %v3755_v17  ;;  %v4050_v2 = vld [vmem:[#allocation2 + $0x190] sm:$0xf0]  ;;  %v3791_v44 = vld [vmem:[#allocation2 + $0x188] sm:$0xf]  ;;  %v2442_v13 = vpop.permute.xlu2 %2441 }
 0x3b2   : > { %v3792_v32 = vor.u32 %v4050_v2, %v3791_v44 }
 0x3b3   : > { %3079 = vmatpush.bf16.msra.mxu3 %v3612_v61  ;;  %v3863_v61 = vld [vmem:[#allocation2 + $0x218] sm:$0xf] }
 0x3b4   : > { %3038 = vmatpush.bf16.msra.mxu0 %v3728_v0  ;;  %3066 = vmatpush.bf16.msra.mxu2 %v3896_v28  ;;  %v3864_v43 = vor.u32 %v4068_v34, %v3863_v61  ;;  %v3743_v0 = vld [vmem:[#allocation2 + $0x128] sm:$0xf]  ;;  %v4065_v28 = vld [vmem:[#allocation2 + $0x208] sm:$0xf0] }
 0x3b5   : > { %3050 = vmatpush.bf16.msra.mxu1 %v3836_v37  ;;  %v3851_v37 = vld [vmem:[#allocation2 + $0x200] sm:$0xf] }
 0x3b6   : > { %v3852_v1 = vor.u32 %v4065_v28, %v3851_v37 }
 0x3b7   : > { %3080 = vmatpush.bf16.msra.mxu3 %v3600_v30  ;;  %v3744_v30 = vor.u32 %v4038_v53, %v3743_v0 }
 0x3b8   : > { %3039 = vmatpush.bf16.msra.mxu0 %v3716_v45  ;;  %3067 = vmatpush.bf16.msra.mxu2 %v3884_v50  ;;  %v4035_v45 = vld [vmem:[#allocation2 + $0x118] sm:$0xf0] }
 0x3b9   : > { %3051 = vmatpush.bf16.msra.mxu1 %v3824_v29  ;;  %v3839_v29 = vld [vmem:[#allocation2 + $0x1e8] sm:$0xf]  ;;  %v3732_v21 = vor.u32 %v4035_v45, %v3731_v41 }
 0x3ba   : > { %3081 = vmatmul.bf16.vlgmr.msra.gmra.mxu3 %v5412_v8  ;;  %v3692_v8 = vor.u32 %v4024_v33, %v3689_v15  ;;  %v3840_v50 = vor.u32 %v4062_v7, %v3839_v29  ;;  %v3887_v15 = vld [vmem:[#allocation2 + $0x248] sm:$0xf]  ;;  %v3707_v33 = vld [vmem:[#allocation2 + $0xe0] sm:$0xf] }
 0x3bb   : > { %3962 = vmatmul.msk.bf16.vlgmr.msra.gmra.mxu2 %vm2957_vm14, %v5440_v25  ;;  %v3888_v54 = vor.u32 %v4074_v23, %v3887_v15 }
 0x3bc   : > { %3112 = vmatpush.bf16.msrb.mxu2 %v2967_v62  ;;  %3040 = vmatpush.bf16.msra.mxu0 %v3704_v22  ;;  %v4059_v62 = vld [vmem:[#allocation2 + $0x1d8] sm:$0xf0]  ;;  %v3827_v22 = vld [vmem:[#allocation2 + $0x1d0] sm:$0xf] }
 0x3bd   : > { %3052 = vmatpush.bf16.msra.mxu1 %v3812_v46  ;;  %v3720_v46 = vor.u32 %v4032_v14, %v3719_v56  ;;  %v3828_v35 = vor.u32 %v4059_v62, %v3827_v22 }
 0x3c0   : > { %3113 = vmatpush.bf16.msrb.mxu2 %v3960_v58  ;;  %3041 = vmatpush.bf16.msra.mxu0 %v3692_v8  ;;  %v4029_v58 = vld [vmem:[#allocation2 + $0xe8] sm:$0xf0]  ;;  %v3816_v8 = vor.u32 %v4056_v60, %v3815_v20 }
 0x3c1   : > { %3053 = vmatpush.bf16.msra.mxu1 %v3800_v9  ;;  %v3708_v16 = vor.u32 %v4029_v58, %v3707_v33  ;;  %v3695_v9 = vld [vmem:[#allocation2 + $0xc8] sm:$0xf] }
 0x3c2   : > { %v3696_v26 = vor.u32 %v4026_v24, %v3695_v9 }
 0x3c3   : > { %3042 = vmatmul.bf16.vlgmr.msra.gmra.mxu0 %v5445_v59 }
 0x3c4   : > { %3086 = vmatpush.bf16.msrb.mxu0 %v3780_v57  ;;  %3114 = vmatpush.bf16.msrb.mxu2 %v3948_v12  ;;  %v3803_v57 = vld [vmem:[#allocation2 + $0x1a0] sm:$0xf] }
 0x3c5   : > { %3054 = vmatpush.bf16.msra.mxu1 %v3788_v11  ;;  %v3804_v12 = vor.u32 %v4053_v6, %v3803_v57 }
 0x3c8   : > { %3087 = vmatpush.bf16.msrb.mxu0 %v3768_v40  ;;  %3115 = vmatpush.bf16.msrb.mxu2 %v3936_v18 }
 0x3c9   : > { %3099 = vmatpush.bf16.msrb.mxu1 %v3876_v48 }
 0x3ca   : > { %3055 = vmatmul.bf16.vlgmr.msra.gmra.mxu1 %v5448_v47 }
 0x3cc   : > { %3088 = vmatpush.bf16.msrb.mxu0 %v3756_v49  ;;  %3116 = vmatpush.bf16.msrb.mxu2 %v3924_v31 }
 0x3cd   : > { %3100 = vmatpush.bf16.msrb.mxu1 %v3864_v43 }
 0x3d0   : > { %3089 = vmatpush.bf16.msrb.mxu0 %v3744_v30  ;;  %3117 = vmatpush.bf16.msrb.mxu2 %v3912_v5 }
 0x3d1   : > { %3101 = vmatpush.bf16.msrb.mxu1 %v3852_v1 }
 0x3d4   : > { %3090 = vmatpush.bf16.msrb.mxu0 %v3732_v21  ;;  %3118 = vmatpush.bf16.msrb.mxu2 %v3900_v10 }
 0x3d5   : > { %3102 = vmatpush.bf16.msrb.mxu1 %v3840_v50 }
 0x3d8   : > { %3091 = vmatpush.bf16.msrb.mxu0 %v3720_v46  ;;  %3119 = vmatpush.bf16.msrb.mxu2 %v3888_v54 }
 0x3d9   : > { %3103 = vmatpush.bf16.msrb.mxu1 %v3828_v35 }
 0x3db   : > { %3963 = vmatmul.msk.bf16.vlgmr.msrb.gmra.mxu2 %vm2957_vm14, %v5440_v25  ;;  %vm5691_vm14 = vmmov %vm5686_vm5 }
 0x3dc   : > { %3092 = vmatpush.bf16.msrb.mxu0 %v3708_v16 }
 0x3dd   : > { %3104 = vmatpush.bf16.msrb.mxu1 %v3816_v8 }
 0x3e0   : > { %3093 = vmatpush.bf16.msrb.mxu0 %v3696_v26 }
 0x3e1   : > { %3105 = vmatpush.bf16.msrb.mxu1 %v3804_v12 }
 0x3e3   : > { %3094 = vmatmul.bf16.vlgmr.msrb.gmra.mxu0 %v5445_v59 }
 0x3e5   : > { %3106 = vmatpush.bf16.msrb.mxu1 %v3792_v32 }
 0x3e8   : > { %3107 = vmatmul.bf16.vlgmr.msrb.gmra.mxu1 %v5448_v47 }
 0x3fd   : > { %v2978_v39 = vpop.f32.mrf.mxu3 }
 0x3fe   : > { %v2979_v48 = vadd.f32 %v2978_v39, %v2442_v13 }
 0x405   : > { %v2980_v11 = vpop.f32.mrf.mxu3 }
 0x41d   : > { %v3030_v19 = vpop.f32.mrf.mxu3 }
 0x41e   : > { %v3017_v25 = vpop.f32.mrf.mxu2  ;;  %v3031_v0 = vadd.f32 %v3030_v19, %v2442_v13 }
 0x420   : > { %v2991_v40 = vpop.f32.mrf.mxu0 }
 0x421   : > { %v2992_v4 = vadd.f32 %v2991_v40, %v2979_v48 }
 0x425   : > { %v3032_v18 = vpop.f32.mrf.mxu3 }
 0x426   : > { %v3019_v36 = vpop.f32.mrf.mxu2 }
 0x427   : > { %v3004_v27 = vpop.f32.mrf.mxu1 }
 0x428   : > { %v3005_v61 = vadd.f32 %v3004_v27, %v2992_v4  ;;  %v2993_v34 = vpop.f32.mrf.mxu0 }
 0x42a   : > { %v3018_v17 = vadd.f32 %v3017_v25, %v3005_v61 }
 0x42c   : > { %v3128_v59 = vmul.f32 0.044715, %v3018_v17  ;;  %v3125_v62 = vmul.f32 0.5, %v3018_v17 }
 0x42e   : > { %v3131_v38 = vmul.f32 %v3128_v59, %v3018_v17 }
 0x42f   : > { %v3006_v49 = vpop.f32.mrf.mxu1 }
 0x430   : > { %v3134_v37 = vmul.f32 %v3131_v38, %v3018_v17 }
 0x432   : > { %v3137_v30 = vadd.f32 %v3134_v37, %v3018_v17 }
 0x434   : > { %v3140_v7 = vmul.f32 0.7978846, %v3137_v30 }
 0x436   : > { %4155 = vtanh.f32 %v3140_v7 }
 0x43c   : > { %v4156_v10 = vpop.eup %4155 }
 0x43d   : > { %v3082_v43 = vpop.f32.mrf.mxu3  ;;  %v3146_v14 = vadd.f32 1.0, %v4156_v10 }
 0x43e   : > { %v3069_v47 = vpop.f32.mrf.mxu2  ;;  %v3083_v33 = vadd.f32 %v3082_v43, %v2442_v13 }
 0x43f   : > { %v3149_v56 = vmul.f32 %v3146_v14, %v3125_v62 }
 0x440   : > { %v3043_v31 = vpop.f32.mrf.mxu0 }
 0x441   : > { %v3044_v55 = vadd.f32 %v3043_v31, %v3031_v0  ;;  %v3152_v58 = vsel %vm4429_vm11, %v3149_v56, 0.0  ;;  %vm5680_vm11 = vmmov %vm5678_vm1 }
 0x445   : > { %v3084_v28 = vpop.f32.mrf.mxu3 }
 0x446   : > { %v3071_v41 = vpop.f32.mrf.mxu2 }
 0x447   : > { %v3056_v53 = vpop.f32.mrf.mxu1 }
 0x448   : > { %v3057_v1 = vadd.f32 %v3056_v53, %v3044_v55  ;;  %v3045_v5 = vpop.f32.mrf.mxu0 }
 0x44a   : > { %v3070_v42 = vadd.f32 %v3069_v47, %v3057_v1 }
 0x44c   : > { %v3129_v52 = vmul.f32 0.044715, %v3070_v42  ;;  %v3126_v22 = vmul.f32 0.5, %v3070_v42 }
 0x44e   : > { %v3132_v45 = vmul.f32 %v3129_v52, %v3070_v42 }
 0x44f   : > { %v3058_v29 = vpop.f32.mrf.mxu1 }
 0x450   : > { %v3135_v21 = vmul.f32 %v3132_v45, %v3070_v42  ;;  %v3355_v29 = vld [vmem:[%s5538_s6] sm:$0xf] }
 0x452   : > { %v3138_v50 = vadd.f32 %v3135_v21, %v3070_v42 }
 0x454   : > { %v3141_v51 = vmul.f32 0.7978846, %v3138_v50 }
 0x456   : > { %4157 = vtanh.f32 %v3141_v51 }
 0x45c   : > { %v4158_v23 = vpop.eup %4157 }
 0x45d   : > { %v3147_v46 = vadd.f32 1.0, %v4158_v23 }
 0x45e   : > { %v3121_v15 = vpop.f32.mrf.mxu2 }
 0x45f   : > { %v3150_v35 = vmul.f32 %v3147_v46, %v3126_v22 }
 0x460   : > { %v3095_v54 = vpop.f32.mrf.mxu0 }
 0x461   : > { %v3153_v60 = vsel %vm4436_vm12, %v3150_v35, 0.0  ;;  %v3096_v20 = vadd.f32 %v3095_v54, %v3083_v33  ;;  %vm5681_vm12 = vcmask 1045508  }
 0x462   : > { %v3155_v16 = vpack.c.bf16 %v3153_v60, %v3152_v58 }
 0x464   : > { %v3159_v40 = vrot.slane %v3155_v16, 2 }
 0x465   : > { %v3108_v8 = vpop.f32.mrf.mxu1 }
 0x466   : > { %v3109_v9 = vadd.f32 %v3108_v8, %v3096_v20  ;;  %v3123_v24 = vpop.f32.mrf.mxu2  ;;  %v3164_v27 = vsel %vm5680_vm11, %v3155_v16, %v3159_v40  ;;  %vm5694_vm11 = vcmask 154624  }
 0x468   : > { %v3122_v57 = vadd.f32 %v3121_v15, %v3109_v9  ;;  %v3097_v26 = vpop.f32.mrf.mxu0 }
 0x46a   : > { %v3130_v6 = vmul.f32 0.044715, %v3122_v57  ;;  %v3127_v11 = vmul.f32 0.5, %v3122_v57 }
 0x46c   : > { %v3133_v12 = vmul.f32 %v3130_v6, %v3122_v57 }
 0x46d   : > { %v3110_v2 = vpop.f32.mrf.mxu1 }
 0x46e   : > { %v3136_v44 = vmul.f32 %v3133_v12, %v3122_v57 }
 0x470   : > { %v3139_v32 = vadd.f32 %v3136_v44, %v3122_v57 }
 0x472   : > { %v3142_v39 = vmul.f32 0.7978846, %v3139_v32 }
 0x474   : > { %4159 = vtanh.f32 %v3142_v39 }
 0x47a   : > { %v4160_v63 = vpop.eup %4159 }
 0x47b   : > { %v3148_v19 = vadd.f32 1.0, %v4160_v63 }
 0x47d   : > { %v3151_v3 = vmul.f32 %v3148_v19, %v3127_v11 }
 0x47f   : > { %v3154_v13 = vsel %vm4449_vm13, %v3151_v3, 0.0  ;;  %vm5683_vm13 = vcmask 171008  }
 0x480   : > { %v3156_v48 = vpack.c.bf16 %v3154_v13, %v3154_v13  ;;  %vm5684_vm8 = vmmov %vm5683_vm13 }
 0x482   : > { %v3160_v4 = vrot.slane %v3156_v48, 4  ;;  %v3161_v18 = vrot.slane %v3156_v48, 6 }
 0x484   : > { %v3167_v61 = vsel %vm5681_vm12, %v3160_v4, %v3161_v18  ;;  %vm5695_vm12 = vmmov %vm5694_vm11 }
 0x485   : > { %v3168_v36 = vsel %vm434_vm2, %v3164_v27, %v3167_v61 }
 0x486   : > { %3170 = vst [vmem:[#allocation4 + $0x2] sm:$0x3f] %v3168_v36 }
 0x48d   : > { %v3171_v17 = vld [vmem:[#allocation4] sm:$0xff] }
 0x48e   : > { %3173 = vst [vmem:[#allocation1] ss:$2 sm:$0xff] %v3171_v17  ;;  %v3253_v47 = vld [vmem:[#allocation4 + $0x2] sm:$0x3f] }
 0x48f   : > { %v3262_v28 = vld [vmem:[#allocation4 + $0x2] sm:$0xff] }
 0x495   : > { %v3176_v34 = vld.sshfl [vmem:[#allocation1 + $0x8] sm:$0xff pattern:$0x75643120]  ;;  %v3174_v49 = vld.sshfl [vmem:[#allocation1] sm:$0xff pattern:$0x75643120] }
 0x496   : > { %3180 = vrot.lane.b32.xlu0 %v3176_v34, %s5609_s17  ;;  %3178 = vrot.lane.b32.xlu2 %v3174_v49, %s5609_s17  ;;  %3194 = vst [vmem:[#allocation1 + $0x1] ss:$2 sm:$0xff] %v3171_v17 }
 0x49d   : > { %v3195_v59 = vld.sshfl [vmem:[#allocation1] sm:$0xff pattern:$0x75643120]  ;;  %v3197_v43 = vld.sshfl [vmem:[#allocation1 + $0x8] sm:$0xff pattern:$0x75643120] }
 0x49e   : > { %3214 = vst [vmem:[#allocation1] ss:$2 sm:$0xff] %v3171_v17 }
 0x4a5   : > { %v3215_v38 = vld.sshfl [vmem:[#allocation1] sm:$0xff pattern:$0x75643120]  ;;  %v3217_v31 = vld.sshfl [vmem:[#allocation1 + $0x8] sm:$0xff pattern:$0x75643120] }
 0x4a6   : > { %3235 = vst [vmem:[#allocation1 + $0x1] ss:$2 sm:$0xff] %v3171_v17 }
 0x4ad   : > { %v3236_v0 = vld.sshfl [vmem:[#allocation1] sm:$0xff pattern:$0x75643120]  ;;  %v3238_v37 = vld.sshfl [vmem:[#allocation1 + $0x8] sm:$0xff pattern:$0x75643120] }
 0x4ae   : > { %3255 = vst [vmem:[#allocation1] ss:$2 sm:$0xff] %v3253_v47 }
 0x4b5   : > { %v3256_v55 = vld.sshfl [vmem:[#allocation1] sm:$0xff pattern:$0x75643120]  ;;  %v3257_v53 = vld.sshfl [vmem:[#allocation1 + $0x8] sm:$0xff pattern:$0x75643120] }
 0x4b6   : > { %3260 = vst [vmem:[#allocation2 + $0x18] sm:$0x33] %v3256_v55 }
 0x4b7   : > { %3261 = vst [vmem:[#allocation2 + $0x20] sm:$0x3] %v3257_v53 }
 0x4b8   : > { %3265 = vst [vmem:[#allocation1 + $0x1] ss:$2 sm:$0xff] %v3262_v28 }
 0x4bf   : > { %v3268_v30 = vld.sshfl [vmem:[#allocation1 + $0x8] sm:$0xff pattern:$0x75643120]  ;;  %v3266_v1 = vld.sshfl [vmem:[#allocation1] sm:$0xff pattern:$0x75643120] }
 0x4c0   : > { %3272 = vrot.lane.b32.xlu0 %v3268_v30, %s5607_s28  ;;  %3270 = vrot.lane.b32.xlu2 %v3266_v1, %s5607_s28  ;;  %3285 = vst [vmem:[#allocation1] ss:$2 sm:$0xff] %v3262_v28 }
 0x4c7   : > { %v3288_v42 = vld.sshfl [vmem:[#allocation1 + $0x8] sm:$0xff pattern:$0x75643120]  ;;  %v3286_v5 = vld.sshfl [vmem:[#allocation1] sm:$0xff pattern:$0x75643120] }
 0x4c8   : > { %3292 = vrot.lane.b32.xlu2 %v3288_v42, %s4181_s18  ;;  %3290 = vrot.lane.b32.xlu1 %v3286_v5, %s4181_s18  ;;  %3306 = vst [vmem:[#allocation1 + $0x1] ss:$2 sm:$0xff] %v3262_v28 }
 0x4cf   : > { %v3309_v41 = vld.sshfl [vmem:[#allocation1 + $0x8] sm:$0xff pattern:$0x75643120]  ;;  %v3307_v7 = vld.sshfl [vmem:[#allocation1] sm:$0xff pattern:$0x75643120] }
 0x4d0   : > { %3201 = vrot.lane.b32.xlu2 %v3197_v43, %s5599_s23  ;;  %3313 = vrot.lane.b32.xlu1 %v3309_v41, %s4182_s19  ;;  %3326 = vst [vmem:[#allocation1] ss:$2 sm:$0xff] %v3262_v28 }
 0x4d1   : > { %3311 = vrot.lane.b32.xlu0 %v3307_v7, %s4182_s19  ;;  %s4100_s19 = smul.u32 12, %s5702_s25 }
 0x4d3   : > { %s278_s12 = scalar_lea.vmem %s5539_s7, %s4100_s19 }
 0x4d7   : > { %v3329_v52 = vld.sshfl [vmem:[#allocation1 + $0x8] sm:$0xff pattern:$0x75643120]  ;;  %v3327_v45 = vld.sshfl [vmem:[#allocation1] sm:$0xff pattern:$0x75643120] }
 0x4d8   : > { %3240 = vrot.lane.b32.xlu2 %v3236_v0, %s4179_s16  ;;  %3333 = vrot.lane.b32.xlu1 %v3329_v52, %s5682_s30 }
 0x4d9   : > { %3331 = vrot.lane.b32.xlu0 %v3327_v45, %s5682_s30 }
 0x4e0   : > { %3199 = vrot.lane.b32.xlu1 %v3195_v59, %s5599_s23 }
 0x4e1   : > { %3219 = vrot.lane.b32.xlu0 %v3215_v38, %s4178_s15 }
 0x4e8   : > { %3221 = vrot.lane.b32.xlu1 %v3217_v31, %s4178_s15 }
 0x4e9   : > { %3242 = vrot.lane.b32.xlu0 %v3238_v37, %s4179_s16 }
 0x4f0   : > { %3358 = vperm.xlu1 %4134, %v3355_v29   ;;  %v3179_v21 = vpop.permute.xlu2 %3178 }
 0x4f1   : > { %v3182_v51 = vrot.slane %v3179_v21, 4 }
 0x508   : > { %v3181_v50 = vpop.permute.xlu0 %3180 }
 0x509   : > { %v3183_v10 = vrot.slane %v3181_v50, 4 }
 0x50b   : > { %v3184_v14 = vsel %vm434_vm2, %v3182_v51, %v3183_v10  ;;  %v3186_v62 = vsel %vm5683_vm13, %v3181_v50, %v3183_v10  ;;  %vm5696_vm13 = vcmask 7168  }
 0x50c   : > { %v3185_v23 = vsel %vm5684_vm8, %v3179_v21, %v3184_v14  ;;  %3190 = vst [vmem:[#allocation2 + $0x8] sm:$0x3] %v3186_v62  ;;  %vm5697_vm8 = vmmov %vm5696_vm13 }
 0x50d   : > { %3189 = vst [vmem:[#allocation2] sm:$0x33] %v3185_v23 }
 0x51a   : > { %v3271_v56 = vpop.permute.xlu2 %3270 }
 0x51b   : > { %v3274_v33 = vrot.slane %v3271_v56, 4 }
 0x522   : > { %v3293_v22 = vpop.permute.xlu2 %3292 }
 0x523   : > { %v3295_v46 = vrot.slane %v3293_v22, 4 }
 0x525   : > { %v3298_v35 = vsel %vm5685_vm3, %v3293_v22, %v3295_v46  ;;  %vm5698_vm3 = vcmask 293888  }
 0x526   : > { %3302 = vst [vmem:[#allocation2 + $0x2c] sm:$0x3] %v3298_v35 }
 0x52a   : > { %v3202_v15 = vpop.permute.xlu2 %3201 }
 0x52b   : > { %v3204_v54 = vrot.slane %v3202_v15, 4 }
 0x52d   : > { %v3207_v58 = vsel %vm5686_vm5, %v3202_v15, %v3204_v54  ;;  %vm5699_vm5 = vmmov %vm5698_vm3 }
 0x52e   : > { %3211 = vst [vmem:[#allocation2 + $0x8] sm:$0xc] %v3207_v58 }
 0x532   : > { %v3273_v60 = vpop.permute.xlu0 %3272  ;;  %v3241_v47 = vpop.permute.xlu2 %3240 }
 0x533   : > { %v3275_v16 = vrot.slane %v3273_v60, 4  ;;  %v3244_v7 = vrot.slane %v3241_v47, 4 }
 0x535   : > { %v3276_v20 = vsel %vm434_vm2, %v3274_v33, %v3275_v16  ;;  %v3278_v8 = vsel %vm5672_vm4, %v3273_v60, %v3275_v16  ;;  %v3974_v16 = vld [vmem:[#allocation2 + $0x8] sm:$0xf]  ;;  %vm5700_vm4 = vmmov %vm5698_vm3 }
 0x536   : > { %v3277_v9 = vsel %vm5687_vm7, %v3271_v56, %v3276_v20  ;;  %3282 = vst [vmem:[#allocation2 + $0x20] sm:$0xc] %v3278_v8 }
 0x537   : > { %3281 = vst [vmem:[#allocation2 + $0x18] sm:$0xcc] %v3277_v9 }
 0x53a   : > { %v3291_v24 = vpop.permute.xlu1 %3290 }
 0x53b   : > { %v3294_v57 = vrot.slane %v3291_v24, 4 }
 0x53d   : > { %v3296_v26 = vsel %vm434_vm2, %v3294_v57, %v3295_v46  ;;  %v3986_v5 = vld [vmem:[#allocation2 + $0x20] sm:$0xf]  ;;  %v3344_v57 = vld [vmem:[%s5537_s5] sm:$0x3] }
 0x53e   : > { %v3297_v6 = vsel %vm5688_vm0, %v3291_v24, %v3296_v26  ;;  %v3978_v56 = vld [vmem:[#allocation2 + $0x18] sm:$0xf]  ;;  %v4096_v22 = vld [vmem:[#allocation2 + $0x1c] sm:$0xf] }
 0x53f   : > { %3301 = vst [vmem:[#allocation2 + $0x24] sm:$0x33] %v3297_v6 }
 0x542   : > { %v3314_v12 = vpop.permute.xlu1 %3313 }
 0x543   : > { %v3316_v2 = vrot.slane %v3314_v12, 4  ;;  %v3312_v44 = vpop.permute.xlu0 %3311 }
 0x544   : > { %v3315_v32 = vrot.slane %v3312_v44, 4 }
 0x545   : > { %v3319_v39 = vsel %vm5689_vm6, %v3314_v12, %v3316_v2 }
 0x546   : > { %3323 = vst [vmem:[#allocation2 + $0x2c] sm:$0xc] %v3319_v39  ;;  %v3317_v63 = vsel %vm434_vm2, %v3315_v32, %v3316_v2 }
 0x547   : > { %v3318_v11 = vsel %vm5690_vm9, %v3312_v44, %v3317_v63 }
 0x548   : > { %3322 = vst [vmem:[#allocation2 + $0x24] sm:$0xcc] %v3318_v11 }
 0x54a   : > { %v3334_v19 = vpop.permute.xlu1 %3333 }
 0x54b   : > { %v3336_v3 = vrot.slane %v3334_v19, 4  ;;  %v3332_v25 = vpop.permute.xlu0 %3331 }
 0x54c   : > { %v3335_v13 = vrot.slane %v3332_v25, 4 }
 0x54d   : > { %v3339_v40 = vsel %vm618_vm10, %v3334_v19, %v3336_v3  ;;  %v4098_v28 = vld [vmem:[#allocation2 + $0x28] sm:$0xf0] }
 0x54e   : > { %3343 = vst [vmem:[#allocation2 + $0x38] sm:$0x3] %v3339_v40  ;;  %v3337_v48 = vsel %vm434_vm2, %v3335_v13, %v3336_v3  ;;  %v3987_v10 = vor.u32 %v4098_v28, %v3986_v5 }
 0x54f   : > { %v3338_v4 = vsel %vm618_vm10, %v3332_v25, %v3337_v48  ;;  %v4097_v41 = vld [vmem:[#allocation2 + $0x20] sm:$0xf0]  ;;  %vm5693_vm10 = vmmov %vm5678_vm1  ;;  %v3980_v21 = vld [vmem:[#allocation2 + $0x24] sm:$0xf0] }
 0x550   : > { %3342 = vst [vmem:[#allocation2 + $0x30] sm:$0x33] %v3338_v4  ;;  %v3979_v35 = vor.u32 %v4097_v41, %v3978_v56  ;;  %v3983_v15 = vor.u32 %v4096_v22, %v3980_v21  ;;  %v3479_v21 = vld [vmem:[%s4269_s10 + $0x4] sm:$0xff] }
 0x552   : > { %v3200_v18 = vpop.permute.xlu1 %3199 }
 0x553   : > { %v3203_v27 = vrot.slane %v3200_v18, 4  ;;  %v3220_v61 = vpop.permute.xlu0 %3219 }
 0x554   : > { %v3223_v30 = vrot.slane %v3220_v61, 4 }
 0x555   : > { %v3205_v36 = vsel %vm434_vm2, %v3203_v27, %v3204_v54  ;;  %v3354_v17 = vld [vmem:[#allocation2 + $0x38] sm:$0x3] }
 0x556   : > { %v3206_v34 = vsel %vm5691_vm14, %v3200_v18, %v3205_v36  ;;  %v3385_v49 = vunpack.c.l.b16 %v3354_v17 }
 0x557   : > { %3210 = vst [vmem:[#allocation2] sm:$0xcc] %v3206_v34  ;;  %v3353_v59 = vld [vmem:[#allocation2 + $0x30] sm:$0x33] }
 0x558   : > { %v3394_v43 = vpack.c.b16 %v3385_v49, %v3385_v49  ;;  %v3383_v38 = vunpack.c.l.b16 %v3353_v59  ;;  %v3384_v31 = vunpack.c.h.b16 %v3353_v59 }
 0x55a   : > { %v3222_v0 = vpop.permute.xlu1 %3221  ;;  %v3411_v37 = vsel %vm5692_vm15, %v3394_v43, 0  ;;  %v3392_v55 = vpack.c.b16 %v3383_v38, %v3383_v38  ;;  %v3393_v53 = vpack.c.b16 %v3384_v31, %v3384_v31 }
 0x55b   : > { %v3224_v1 = vrot.slane %v3222_v0, 4  ;;  %v3243_v42 = vpop.permute.xlu0 %3242  ;;  %3444 = vmatpush.bf16.msra.mxu1 %v3411_v37 }
 0x55c   : > { %v3245_v52 = vrot.slane %v3243_v42, 4  ;;  %v3405_v45 = vsel %vm5693_vm10, %v3392_v55, 0  ;;  %v3408_v29 = vsel %vm5678_vm1, %v3393_v53, 0 }
 0x55d   : > { %v3225_v50 = vsel %vm434_vm2, %v3223_v30, %v3224_v1  ;;  %v3227_v51 = vsel %vm5694_vm11, %v3222_v0, %v3224_v1  ;;  %3418 = vmatpush.bf16.msrb.mxu3 %v3405_v45  ;;  %3431 = vmatpush.bf16.msra.mxu0 %v3408_v29  ;;  %v3480_v30 = vld [vmem:[%s4269_s10 + $0xc] sm:$0xf] }
 0x55e   : > { %v3226_v14 = vsel %vm5695_vm12, %v3220_v61, %v3225_v50  ;;  %3231 = vst [vmem:[#allocation2 + $0x14] sm:$0x3] %v3227_v51  ;;  %v3246_v62 = vsel %vm434_vm2, %v3244_v7, %v3245_v52  ;;  %v3248_v23 = vsel %vm5696_vm13, %v3243_v42, %v3245_v52  ;;  %v3966_v54 = vld [vmem:[#allocation2] sm:$0xf]  ;;  %v4093_v60 = vld [vmem:[#allocation2 + $0x4] sm:$0xf] }
 0x55f   : > { %3230 = vst [vmem:[#allocation2 + $0xc] sm:$0x33] %v3226_v14  ;;  %v3247_v46 = vsel %vm5697_vm8, %v3241_v47, %v3246_v62  ;;  %3445 = vmatpush.bf16.msra.mxu1 %v3987_v10 }
 0x560   : > { %3251 = vst [vmem:[#allocation2 + $0xc] sm:$0xcc] %v3247_v46 }
 0x561   : > { %3252 = vst [vmem:[#allocation2 + $0x14] sm:$0xc] %v3248_v23  ;;  %3419 = vmatpush.bf16.msrb.mxu3 %v3979_v35  ;;  %3432 = vmatpush.bf16.msra.mxu0 %v3983_v15 }
 0x562   : > { %v3359_v26 = vpop.permute.xlu1 %3358 }
 0x567   : > { %v4094_v58 = vld [vmem:[#allocation2 + $0x8] sm:$0xf0]  ;;  %v3968_v33 = vld [vmem:[#allocation2 + $0xc] sm:$0xf0] }
 0x568   : > { %v4095_v20 = vld [vmem:[#allocation2 + $0x10] sm:$0xf0]  ;;  %v3967_v8 = vor.u32 %v4094_v58, %v3966_v54  ;;  %v3971_v9 = vor.u32 %v4093_v60, %v3968_v33 }
 0x569   : > { %v3975_v24 = vor.u32 %v4095_v20, %v3974_v16 }
 0x56a   : > { %3420 = vmatpush.bf16.msrb.mxu3 %v3967_v8  ;;  %3433 = vmatpush.bf16.msra.mxu0 %v3971_v9 }
 0x56b   : > { %3446 = vmatpush.bf16.msra.mxu1 %v3975_v24 }
 0x56d   : > { %3988 = vmatmul.msk.bf16.vlgmr.msrb.gmra.mxu3 %vm5698_vm3, %v3344_v57  ;;  %3989 = vmatmul.msk.bf16.vlgmr.msra.gmra.mxu0 %vm5699_vm5, %v3344_v57 }
 0x56e   : > { %3990 = vmatmul.msk.bf16.vlgmr.msra.gmra.mxu1 %vm5700_vm4, %v3344_v57 }
 0x5ea   : > { %v3435_v6 = vpop.f32.mrf.mxu0 }
 0x5eb   : > { %v3448_v12 = vpop.f32.mrf.mxu1  ;;  %v3436_v2 = vadd.f32 %v3435_v6, %v3359_v26 }
 0x5ec   : > { %v3449_v44 = vadd.f32 %v3448_v12, %v3359_v26 }
 0x5ed   : > { %v3456_v32 = vmul.f32 0.044715, %v3436_v2  ;;  %v3453_v47 = vmul.f32 0.5, %v3436_v2 }
 0x5ee   : > { %v3457_v39 = vmul.f32 0.044715, %v3449_v44  ;;  %v3454_v37 = vmul.f32 0.5, %v3449_v44 }
 0x5ef   : > { %v3459_v63 = vmul.f32 %v3456_v32, %v3436_v2 }
 0x5f0   : > { %v3460_v11 = vmul.f32 %v3457_v39, %v3449_v44  ;;  %v3422_v19 = vpop.f32.mrf.mxu3 }
 0x5f1   : > { %v3462_v3 = vmul.f32 %v3459_v63, %v3436_v2  ;;  %v3423_v25 = vadd.f32 %v3422_v19, %v3359_v26 }
 0x5f2   : > { %v3463_v13 = vmul.f32 %v3460_v11, %v3449_v44  ;;  %v3437_v40 = vpop.f32.mrf.mxu0 }
 0x5f3   : > { %v3465_v48 = vadd.f32 %v3462_v3, %v3436_v2  ;;  %v3455_v4 = vmul.f32 0.044715, %v3423_v25  ;;  %v3450_v18 = vpop.f32.mrf.mxu1  ;;  %v3452_v41 = vmul.f32 0.5, %v3423_v25 }
 0x5f4   : > { %v3466_v27 = vadd.f32 %v3463_v13, %v3449_v44 }
 0x5f5   : > { %v3468_v61 = vmul.f32 0.7978846, %v3465_v48  ;;  %v3458_v36 = vmul.f32 %v3455_v4, %v3423_v25 }
 0x5f6   : > { %v3469_v17 = vmul.f32 0.7978846, %v3466_v27 }
 0x5f7   : > { %4161 = vtanh.f32 %v3468_v61  ;;  %v3461_v34 = vmul.f32 %v3458_v36, %v3423_v25 }
 0x5f8   : > { %4163 = vtanh.f32 %v3469_v17  ;;  %v3424_v49 = vpop.f32.mrf.mxu3 }
 0x5f9   : > { %v3464_v59 = vadd.f32 %v3461_v34, %v3423_v25 }
 0x5fb   : > { %v3467_v43 = vmul.f32 0.7978846, %v3464_v59 }
 0x5fd   : > { %v4162_v38 = vpop.eup %4161  ;;  %4165 = vtanh.f32 %v3467_v43 }
 0x5fe   : > { %v4164_v31 = vpop.eup %4163  ;;  %v3474_v0 = vadd.f32 1.0, %v4162_v38 }
 0x5ff   : > { %v3475_v55 = vadd.f32 1.0, %v4164_v31 }
 0x600   : > { %v3477_v53 = vmul.f32 %v3474_v0, %v3453_v47 }
 0x601   : > { %v3478_v28 = vmul.f32 %v3475_v55, %v3454_v37 }
 0x602   : > { %v3482_v5 = vmul.f32 0.05, %v3477_v53 }
 0x603   : > { %v4166_v1 = vpop.eup %4165  ;;  %v3483_v42 = vmul.f32 0.05, %v3478_v28 }
 0x604   : > { %v3473_v7 = vadd.f32 1.0, %v4166_v1  ;;  %v3486_v29 = vrot.slane %v3482_v5, 4 }
 0x605   : > { %v3490_v52 = vadd.f32 %v3483_v42, %v3480_v30 }
 0x606   : > { %v3476_v45 = vmul.f32 %v3473_v7, %v3452_v41 }
 0x607   : > { %3492 = vst [vmem:[%s278_s12 + $0x8] sm:$0xf] %v3490_v52 }
 0x608   : > { %v3481_v50 = vmul.f32 0.05, %v3476_v45 }
 0x60a   : > { %v3487_v51 = vsel %vm434_vm2, %v3481_v50, %v3486_v29 }
 0x60b   : > { %v3489_v10 = vadd.f32 %v3487_v51, %v3479_v21 }
 0x60d   : > { %3491 = vst [vmem:[%s278_s12] sm:$0xff] %v3489_v10 }
 0x60e PF: > { %s17_s24 = sadd.s32 1, %s4173_s24  }
 0x60f   : > { %p14_p4 = scmp.ge.s32.totalorder %s17_s24, 4  }
 0x611   :  { %16 = sbr.rel (!%p14_p4) target bundleno = 1 (0x1), region = 88 }

</bundles_post_ra>
